<compile_context>
chip_gen: v5e
topology: v5e:2x2
jax: 0.10.0
libtpu: 0.0.40
codegen_flags: <defaults>
</compile_context>

<pallas_src>
import jax
import jax.numpy as jnp
from jax.experimental import pallas as pl
from jax.experimental.pallas import tpu as pltpu  # noqa: F401  (TPU backend)

LEAKY_SLOPE = 0.01
LN_EPS = 1e-5
BN_EPS = 1e-5


# ---------------------------------------------------------------------------
# The single fused Pallas kernel
# ---------------------------------------------------------------------------
def _st_block_kernel(a_ref, wfused_ref, bfused_ref, ln_g_ref, ln_b_ref,
                     buildT_ref, aggT_ref, sage_wblk_ref, sage_b_ref,
                     a_all_ref, wd1_blk_ref, sl_blk_ref, v_blk_ref,
                     tatt_b_ref, bn_g_ref, bn_b_ref, tmask_ref,
                     out_ref, tcoef_ref):
    BL = a_ref.shape[0]                  # B * tem_size   (rows = (batch, time))
    L = tcoef_ref.shape[1]               # tem_size
    B = BL // L
    CN = ln_g_ref.shape[1]               # c_out * num_nodes  (lane dim)
    C = a_all_ref.shape[1] // 4          # c_out
    n_layers = sage_b_ref.shape[0]
    f32 = jnp.float32
    bf16 = jnp.bfloat16

    def bdot(a, b):                      # big matmuls: bf16 operands, f32 accumulate
        return jnp.dot(a.astype(bf16), b.astype(bf16), preferred_element_type=f32)

    def fdot(a, b):                      # tiny TATT matmuls: keep f32
        return jnp.dot(a, b, preferred_element_type=f32)

    def leaky(v):
        return jnp.where(v >= 0, v, LEAKY_SLOPE * v)

    def sigmoid(v):
        return 1.0 / (1.0 + jnp.exp(-v))

    ln_g = ln_g_ref[...]
    ln_b = ln_b_ref[...]

    def layer_norm(v):
        # LayerNorm([c_out, N, L]) over one batch slab v: (L, CN), elementwise affine.
        d = v.shape[0] * v.shape[1]
        mu = jnp.sum(jnp.sum(v, axis=1, keepdims=True), axis=0, keepdims=True) / d
        dev = v - mu
        var = jnp.sum(jnp.sum(dev * dev, axis=1, keepdims=True),
                      axis=0, keepdims=True) / d
        return dev * jax.lax.rsqrt(var + LN_EPS) * ln_g + ln_b

    # ---- fused (1,Kt) time-conv + 1x1 residual conv: ONE batch-packed MXU matmul ----
    y = bdot(a_ref[...], wfused_ref[...]) + bfused_ref[...]        # (B*L, 2CN)
    x1_s = y[:, :CN]                                               # time-conv branch
    xin_s = y[:, CN:]                                              # 1x1 residual branch

    # ---- per-batch LayerNorm + leaky_relu (LN statistics are per batch) ----
    x1n = jnp.concatenate(
        [leaky(layer_norm(x1_s[b * L:(b + 1) * L, :])) for b in range(B)], axis=0)

    # ---- GraphSAGE ('mean', 2 layers), batch-packed ----
    h = bdot(x1n, buildT_ref[...])                                 # (B*L, 2CN): [4x | adj^T x]
    for layer in range(n_layers):
        hn = bdot(h, aggT_ref[...])                                # in-neighbour mean
        h = (bdot(sage_wblk_ref[2 * layer], h) +                   # fc_self  (block-diag over B)
             bdot(sage_wblk_ref[2 * layer + 1], hn) +              # fc_neigh
             sage_b_ref[layer])

    # ---- GLU (filter = lanes [0,CN), gate = lanes [CN,2CN)) ----
    x1g = sigmoid(h[:, CN:]) * leaky(h[:, :CN])                    # (B*L, CN)

    # ---- TATT_1 logits with pre-folded constants ----
    p_all = bdot(x1g, a_all_ref[...])                              # (B*L, 4C): [f1-taps | f2-taps]
    g1 = (fdot(wd1_blk_ref[0], p_all[:, 0:C]) +
          fdot(wd1_blk_ref[1], p_all[:, C:2 * C]))                 # (B*L, C) == f1 @ w
    f2t = (fdot(sl_blk_ref[0], p_all[:, 2 * C:3 * C]) +
           fdot(sl_blk_ref[1], p_all[:, 3 * C:4 * C]))             # (B*L, C) == f2^T
    s_parts = []
    for b in range(B):                                             # bilinear is genuinely per-batch
        s_parts.append(jax.lax.dot_general(                        # contract last-with-last (no .T)
            g1[b * L:(b + 1) * L, :], f2t[b * L:(b + 1) * L, :],
            (((1,), (1,)), ((), ())), preferred_element_type=f32))
    s_stack = jnp.concatenate(s_parts, axis=0)                     # (B*L, L)
    logits = fdot(v_blk_ref[...], sigmoid(s_stack + tatt_b_ref[...]))   # (B*L, L)

    # ---- BatchNorm1d(tem_size): training stats, per-column over (batch, rows) ----
    nstat = float(BL)
    mu = jnp.sum(logits, axis=0, keepdims=True) / nstat
    dev = logits - mu
    var = jnp.sum(dev * dev, axis=0, keepdims=True) / nstat
    z = dev * jax.lax.rsqrt(var + BN_EPS) * bn_g_ref[...] + bn_b_ref[...] + tmask_ref[...]

    # ---- masked softmax over the last dim ----
    z = z - jnp.max(z, axis=-1, keepdims=True)
    e = jnp.exp(z)
    coefs = e * pl.reciprocal(jnp.sum(e, axis=-1, keepdims=True), approx=True)
    tcoef_ref[...] = coefs                                         # untransposed; wrapper swaps

    # ---- attention apply + residual + output LayerNorm (per batch) ----
    out_parts = []
    for b in range(B):
        yb = bdot(coefs[b * L:(b + 1) * L, :], x1g[b * L:(b + 1) * L, :])   # (L, CN)
        out_parts.append(layer_norm(leaky(yb) + xin_s[b * L:(b + 1) * L, :]))
    out_ref[...] = jnp.concatenate(out_parts, axis=0)              # full-lane (B*L, CN) store


# ---------------------------------------------------------------------------
# Wrapper: one-time layout/constant preparation + single pallas_call
# ---------------------------------------------------------------------------
def st_block_forward(x, supports, p):
    B, Cin, N, L = x.shape
    Cout = p['conv1_w'].shape[0]
    Kt = p['time_w'].shape[2]
    CN = Cout * N
    BL = B * L
    f32 = jnp.float32
    bf16 = jnp.bfloat16
    eye_n = jnp.eye(N, dtype=f32)
    eye_c = jnp.eye(Cout, dtype=f32)
    eye_b = jnp.eye(B, dtype=f32)

    # -- activation: Kt-tap im2col, batches stacked on sublanes, (c,n) on lanes --------
    x_cn_l = x.astype(f32).reshape(B, Cin * N, L)
    xpad = jnp.pad(x_cn_l, ((0, 0), (0, 0), (1, 1)))                       # (B, Cin*N, L+2)
    taps = jnp.stack([xpad[:, :, t:t + L] for t in range(Kt)], axis=1)     # (B, Kt, Cin*N, L)
    a_im2col = taps.transpose(0, 3, 1, 2).reshape(BL, Kt * Cin * N)        # (B*L, Kt*Cin*N)

    # -- fused [time_conv | conv1] weight (transposed layout) + fused bias -------------
    w_time = jnp.concatenate(
        [jnp.kron(p['time_w'][:, :, t].T, eye_n) for t in range(Kt)], axis=0)   # (Kt*Cin*N, CN)
    zero_blk = jnp.zeros((Cin * N, CN), f32)
    # padding=(0,1): tap index 1 of the Kt=3 window is the un-shifted sample -> 1x1 conv tap
    w_conv1 = jnp.concatenate(
        [jnp.kron(p['conv1_w'].T, eye_n) if t == 1 else zero_blk for t in range(Kt)], axis=0)
    w_fused = jnp.concatenate([w_time, w_conv1], axis=1)                   # (Kt*Cin*N, 2CN)
    b_fused = jnp.concatenate([jnp.repeat(p['time_b'], N),
                               jnp.repeat(p['conv1_b'], N)]).reshape(1, 2 * CN)

    # -- LayerNorm affine, transposed ---------------------------------------------------
    ln_g = p['ln_gamma'].reshape(CN, L).T                                  # (L, CN)
    ln_b = p['ln_beta'].reshape(CN, L).T

    # -- GraphSAGE constants (dense 'mean' in-neighbour aggregation; DGL semantics) -----
    adj = supports.astype(f32)
    madj = (adj != 0).astype(f32)
    deg_in = jnp.sum(madj, axis=0)
    mean_mat = madj.T / jnp.maximum(deg_in, 1.0)[:, None]                  # (N, N)
    build = jnp.kron(eye_c, jnp.concatenate([4.0 * eye_n, adj.T], axis=0))  # (2CN, CN)
    buildT = build.T                                                       # (CN, 2CN)
    aggT = jnp.kron(jnp.eye(2 * Cout, dtype=f32), mean_mat.T)              # (2CN, 2CN)
    sage_wblk = jnp.stack([jnp.kron(eye_b, m)
                           for (ws, wn, _) in p['sage'] for m in (ws, wn)])  # (4, BL, BL)
    sage_b = jnp.stack([jnp.tile(bb.reshape(L, 1), (B, 1))
                        for (_, _, bb) in p['sage']])                       # (2, BL, 1)

    # -- TATT constants, pre-folded ------------------------------------------------------
    wc1_T = jnp.kron(p['tatt_wc1'].reshape(Cout, 1), eye_n)                # (CN, N)
    wc2_T = jnp.kron(eye_c, p['tatt_wc2'].reshape(N, 1))                   # (CN, Cout)
    idx_n = jnp.arange(N)
    idx_l = jnp.arange(L)
    sn_prev = (idx_n[:, None] == (idx_n[None, :] - 1)).astype(f32)         # X @ S -> col j-1
    sn_next = (idx_n[:, None] == (idx_n[None, :] + 1)).astype(f32)         # X @ S -> col j+1
    sl_prev_l = (idx_l[None, :] == (idx_l[:, None] - 1)).astype(f32)       # (S @ X)[l] = X[l-1]
    sl_next_l = (idx_l[None, :] == (idx_l[:, None] + 1)).astype(f32)       # (S @ X)[l] = X[l+1]
    a1_0 = wc1_T @ sn_prev @ p['tatt_w']                                   # (CN, Cout)
    a1_1 = wc1_T @ sn_next @ p['tatt_w']
    a2_0 = wc2_T @ p['tatt_wd2'][:, :, 0].T                                # (CN, Cout)
    a2_1 = wc2_T @ p['tatt_wd2'][:, :, 1].T
    a_all = jnp.concatenate([a1_0, a1_1, a2_0, a2_1], axis=1)              # (CN, 4*Cout)
    wd1_blk = jnp.stack([jnp.kron(eye_b, p['tatt_wd1'][:, :, k]) for k in range(2)])  # (2, BL, BL)
    sl_blk = jnp.stack([jnp.kron(eye_b, sl_prev_l), jnp.kron(eye_b, sl_next_l)])      # (2, BL, BL)
    v_blk = jnp.kron(eye_b, p['tatt_v'])                                   # (BL, BL)
    tatt_b_t = jnp.tile(p['tatt_b'], (B, 1))                               # (BL, L)
    tmask_t = jnp.tile(p['tatt_mask'], (B, 1))                             # (BL, L)
    bn_g = p['bn_gamma'].reshape(1, L)
    bn_b = p['bn_beta'].reshape(1, L)

    # -- advisory cost estimate ----------------------------------------------------------
    flops = 2 * (BL * (Kt * Cin * N) * (2 * CN)
                 + BL * CN * (2 * CN)
                 + 2 * (BL * (2 * CN) * (2 * CN) + 2 * BL * BL * (2 * CN))
                 + BL * CN * (4 * Cout)
                 + B * L * L * CN)
    bytes_accessed = (2 * (a_im2col.size + w_fused.size + buildT.size + aggT.size
                           + sage_wblk.size + a_all.size)
                      + 4 * (BL * CN + BL * L + ln_g.size + ln_b.size
                             + wd1_blk.size + sl_blk.size + v_blk.size))
    cost = pl.CostEstimate(flops=int(flops),
                           transcendentals=int(BL * (2 * CN + 3 * L)),
                           bytes_accessed=int(bytes_accessed))

    out_s, coef_s = pl.pallas_call(
        _st_block_kernel,
        out_shape=(jax.ShapeDtypeStruct((BL, CN), f32),
                   jax.ShapeDtypeStruct((BL, L), f32)),
        cost_estimate=cost,
    )(a_im2col.astype(bf16), w_fused.astype(bf16), b_fused, ln_g, ln_b,
      buildT.astype(bf16), aggT.astype(bf16), sage_wblk.astype(bf16), sage_b,
      a_all.astype(bf16), wd1_blk, sl_blk, v_blk, tatt_b_t, bn_g, bn_b, tmask_t)

    out = out_s.reshape(B, L, CN).transpose(0, 2, 1).reshape(B, Cout, N, L)
    t_coef = jnp.swapaxes(coef_s.reshape(B, L, L), -1, -2)   # T_coef = coefs.transpose(-1,-2)
    return out, supports, t_coef


# ---------------------------------------------------------------------------
# Deterministic parameter initialization
# ---------------------------------------------------------------------------
def init_params(key, c_in, c_out, num_nodes, tem_size, Kt):
    ks = jax.random.split(key, 12)

    def rnd(k, shape, scale=0.1):
        return (scale * jax.random.normal(k, shape)).astype(jnp.float32)

    p = {}
    p['conv1_w'] = rnd(ks[0], (c_out, c_in))
    p['conv1_b'] = rnd(ks[1], (c_out,))
    p['time_w'] = rnd(ks[2], (c_out, c_in, Kt))
    p['time_b'] = rnd(ks[3], (c_out,))
    p['ln_gamma'] = jnp.ones((c_out, num_nodes, tem_size), jnp.float32)
    p['ln_beta'] = jnp.zeros((c_out, num_nodes, tem_size), jnp.float32)

    sage = []
    for i in range(2):
        k1, k2 = jax.random.split(ks[4 + i], 2)
        sage.append((rnd(k1, (tem_size, tem_size)),          # fc_self weight
                     rnd(k2, (tem_size, tem_size)),          # fc_neigh weight
                     jnp.zeros((tem_size,), jnp.float32)))   # SAGE bias
    p['sage'] = sage

    p['tatt_wc1'] = rnd(ks[6], (c_out,))
    p['tatt_wc2'] = rnd(ks[7], (num_nodes,))
    p['tatt_wd1'] = rnd(ks[8], (tem_size, tem_size, 2))
    p['tatt_wd2'] = rnd(ks[9], (c_out, c_out, 2))
    p['tatt_w'] = rnd(ks[10], (num_nodes, c_out))
    p['tatt_b'] = jnp.zeros((tem_size, tem_size), jnp.float32)
    p['tatt_v'] = rnd(ks[11], (tem_size, tem_size))
    p['bn_gamma'] = jnp.ones((tem_size,), jnp.float32)       # BatchNorm1d affine (fresh module)
    p['bn_beta'] = jnp.zeros((tem_size,), jnp.float32)

    # block mask (the reference hard-codes a 24x24 two-block structure)
    half = tem_size // 2
    idx = jnp.arange(tem_size)
    A = ((idx[:, None] // half) == (idx[None, :] // half)).astype(jnp.float32)
    p['tatt_mask'] = (-1.0e13 * (1.0 - A)).astype(jnp.float32)
    return p


# ---------------------------------------------------------------------------
if __name__ == "__main__":
    key = jax.random.PRNGKey(0)
    B, c_in, c_out = 2, 4, 8
    num_nodes, tem_size = 16, 24        # tem_size must be 24 (SAGEConv(24,24) + 24x24 mask)
    K, Kt = 3, 3

    kx, ka, kp = jax.random.split(key, 3)
    x = jax.random.normal(kx, (B, c_in, num_nodes, tem_size), jnp.float32)

    # random 0/1 adjacency; add a ring so every node has an in-neighbour
    adj = (jax.random.uniform(ka, (num_nodes, num_nodes)) < 0.3).astype(jnp.float32)
    ring = jnp.roll(jnp.eye(num_nodes, dtype=jnp.float32), 1, axis=1)
    adj = jnp.clip(adj + ring, 0.0, 1.0)

    params = init_params(kp, c_in, c_out, num_nodes, tem_size, Kt)

    out, sup, T_coef = jax.jit(st_block_forward)(x, adj, params)
    jax.block_until_ready(out)
    jax.block_until_ready(T_coef)

    assert out.shape == (B, c_out, num_nodes, tem_size)
    assert T_coef.shape == (B, tem_size, tem_size)
    assert bool(jnp.all(jnp.isfinite(out))) and bool(jnp.all(jnp.isfinite(T_coef)))
    print("KERNEL_OK")
</pallas_src>

<mosaic_0001>
module attributes {stable_mosaic.version = 11 : i64} {
  func.func @_st_block_kernel(%arg0: memref<48x192xbf16, #tpu.memory_space<vmem>>, %arg1: memref<192x256xbf16, #tpu.memory_space<vmem>>, %arg2: memref<1x256xf32, #tpu.memory_space<vmem>>, %arg3: memref<24x128xf32, #tpu.memory_space<vmem>>, %arg4: memref<24x128xf32, #tpu.memory_space<vmem>>, %arg5: memref<128x256xbf16, #tpu.memory_space<vmem>>, %arg6: memref<256x256xbf16, #tpu.memory_space<vmem>>, %arg7: memref<4x48x48xbf16, #tpu.memory_space<vmem>>, %arg8: memref<2x48x1xf32, #tpu.memory_space<vmem>>, %arg9: memref<128x32xbf16, #tpu.memory_space<vmem>>, %arg10: memref<2x48x48xf32, #tpu.memory_space<vmem>>, %arg11: memref<2x48x48xf32, #tpu.memory_space<vmem>>, %arg12: memref<48x48xf32, #tpu.memory_space<vmem>>, %arg13: memref<48x24xf32, #tpu.memory_space<vmem>>, %arg14: memref<1x24xf32, #tpu.memory_space<vmem>>, %arg15: memref<1x24xf32, #tpu.memory_space<vmem>>, %arg16: memref<48x24xf32, #tpu.memory_space<vmem>>, %arg17: memref<48x128xf32, #tpu.memory_space<vmem>>, %arg18: memref<48x24xf32, #tpu.memory_space<vmem>>) attributes {dimension_semantics = [], scalar_prefetch = 0 : i64, scratch_operands = 0 : i64, tpu.core_type = #tpu.core_type<tc>} {
    %c0 = arith.constant 0 : index
    %c0_0 = arith.constant 0 : index
    %0 = vector.load %arg3[%c0, %c0_0] : memref<24x128xf32, #tpu.memory_space<vmem>>, vector<24x128xf32>
    %c0_1 = arith.constant 0 : index
    %c0_2 = arith.constant 0 : index
    %1 = vector.load %arg4[%c0_1, %c0_2] : memref<24x128xf32, #tpu.memory_space<vmem>>, vector<24x128xf32>
    %c0_3 = arith.constant 0 : index
    %c0_4 = arith.constant 0 : index
    %2 = vector.load %arg0[%c0_3, %c0_4] : memref<48x192xbf16, #tpu.memory_space<vmem>>, vector<48x192xbf16>
    %c0_5 = arith.constant 0 : index
    %c0_6 = arith.constant 0 : index
    %3 = vector.load %arg1[%c0_5, %c0_6] : memref<192x256xbf16, #tpu.memory_space<vmem>>, vector<192x256xbf16>
    %cst = arith.constant dense<0.000000e+00> : vector<48x256xf32>
    %4 = tpu.matmul %2, %3, %cst {dimension_numbers = #tpu.dot_dimension_numbers<[1], [0], [0], [1], [0, 0, 1, 1], [], []>} : vector<48x192xbf16>, vector<192x256xbf16>, vector<48x256xf32> -> vector<48x256xf32>
    %c0_7 = arith.constant 0 : index
    %c0_8 = arith.constant 0 : index
    %5 = vector.load %arg2[%c0_7, %c0_8] : memref<1x256xf32, #tpu.memory_space<vmem>>, vector<1x256xf32>
    %6 = vector.broadcast %5 : vector<1x256xf32> to vector<48x256xf32>
    %7 = arith.addf %4, %6 : vector<48x256xf32>
    %8 = vector.extract_strided_slice %7 {offsets = [0, 0], sizes = [48, 128], strides = [1, 1]} : vector<48x256xf32> to vector<48x128xf32>
    %9 = vector.extract_strided_slice %7 {offsets = [0, 128], sizes = [48, 128], strides = [1, 1]} : vector<48x256xf32> to vector<48x128xf32>
    %10 = vector.extract_strided_slice %8 {offsets = [0, 0], sizes = [24, 128], strides = [1, 1]} : vector<48x128xf32> to vector<24x128xf32>
    %cst_9 = arith.constant dense<0.000000e+00> : vector<24xf32>
    %11 = vector.multi_reduction <add>, %10, %cst_9 [1] : vector<24x128xf32> to vector<24xf32>
    %12 = vector.shape_cast %11 : vector<24xf32> to vector<24x1xf32>
    %cst_10 = arith.constant dense<0.000000e+00> : vector<1xf32>
    %13 = vector.multi_reduction <add>, %12, %cst_10 [0] : vector<24x1xf32> to vector<1xf32>
    %14 = vector.shape_cast %13 : vector<1xf32> to vector<1x1xf32>
    %cst_11 = arith.constant 3.072000e+03 : f32
    %15 = vector.broadcast %cst_11 : f32 to vector<1x1xf32>
    %16 = arith.divf %14, %15 : vector<1x1xf32>
    %17 = vector.broadcast %16 : vector<1x1xf32> to vector<24x128xf32>
    %18 = arith.subf %10, %17 : vector<24x128xf32>
    %19 = arith.mulf %18, %18 : vector<24x128xf32>
    %cst_12 = arith.constant dense<0.000000e+00> : vector<24xf32>
    %20 = vector.multi_reduction <add>, %19, %cst_12 [1] : vector<24x128xf32> to vector<24xf32>
    %21 = vector.shape_cast %20 : vector<24xf32> to vector<24x1xf32>
    %cst_13 = arith.constant dense<0.000000e+00> : vector<1xf32>
    %22 = vector.multi_reduction <add>, %21, %cst_13 [0] : vector<24x1xf32> to vector<1xf32>
    %23 = vector.shape_cast %22 : vector<1xf32> to vector<1x1xf32>
    %cst_14 = arith.constant 3.072000e+03 : f32
    %24 = vector.broadcast %cst_14 : f32 to vector<1x1xf32>
    %25 = arith.divf %23, %24 : vector<1x1xf32>
    %cst_15 = arith.constant 9.99999974E-6 : f32
    %26 = vector.broadcast %cst_15 : f32 to vector<1x1xf32>
    %27 = arith.addf %25, %26 : vector<1x1xf32>
    %28 = math.rsqrt %27 : vector<1x1xf32>
    %29 = vector.broadcast %28 : vector<1x1xf32> to vector<24x128xf32>
    %30 = arith.mulf %18, %29 : vector<24x128xf32>
    %31 = arith.mulf %30, %0 : vector<24x128xf32>
    %32 = arith.addf %31, %1 : vector<24x128xf32>
    %cst_16 = arith.constant 0.000000e+00 : f32
    %33 = vector.broadcast %cst_16 : f32 to vector<24x128xf32>
    %34 = arith.cmpf oge, %32, %33 : vector<24x128xf32>
    %cst_17 = arith.constant 0.00999999977 : f32
    %35 = vector.broadcast %cst_17 : f32 to vector<24x128xf32>
    %36 = arith.mulf %35, %32 : vector<24x128xf32>
    %37 = arith.select %34, %32, %36 : vector<24x128xi1>, vector<24x128xf32>
    %38 = vector.extract_strided_slice %8 {offsets = [24, 0], sizes = [24, 128], strides = [1, 1]} : vector<48x128xf32> to vector<24x128xf32>
    %cst_18 = arith.constant dense<0.000000e+00> : vector<24xf32>
    %39 = vector.multi_reduction <add>, %38, %cst_18 [1] : vector<24x128xf32> to vector<24xf32>
    %40 = vector.shape_cast %39 : vector<24xf32> to vector<24x1xf32>
    %cst_19 = arith.constant dense<0.000000e+00> : vector<1xf32>
    %41 = vector.multi_reduction <add>, %40, %cst_19 [0] : vector<24x1xf32> to vector<1xf32>
    %42 = vector.shape_cast %41 : vector<1xf32> to vector<1x1xf32>
    %cst_20 = arith.constant 3.072000e+03 : f32
    %43 = vector.broadcast %cst_20 : f32 to vector<1x1xf32>
    %44 = arith.divf %42, %43 : vector<1x1xf32>
    %45 = vector.broadcast %44 : vector<1x1xf32> to vector<24x128xf32>
    %46 = arith.subf %38, %45 : vector<24x128xf32>
    %47 = arith.mulf %46, %46 : vector<24x128xf32>
    %cst_21 = arith.constant dense<0.000000e+00> : vector<24xf32>
    %48 = vector.multi_reduction <add>, %47, %cst_21 [1] : vector<24x128xf32> to vector<24xf32>
    %49 = vector.shape_cast %48 : vector<24xf32> to vector<24x1xf32>
    %cst_22 = arith.constant dense<0.000000e+00> : vector<1xf32>
    %50 = vector.multi_reduction <add>, %49, %cst_22 [0] : vector<24x1xf32> to vector<1xf32>
    %51 = vector.shape_cast %50 : vector<1xf32> to vector<1x1xf32>
    %cst_23 = arith.constant 3.072000e+03 : f32
    %52 = vector.broadcast %cst_23 : f32 to vector<1x1xf32>
    %53 = arith.divf %51, %52 : vector<1x1xf32>
    %cst_24 = arith.constant 9.99999974E-6 : f32
    %54 = vector.broadcast %cst_24 : f32 to vector<1x1xf32>
    %55 = arith.addf %53, %54 : vector<1x1xf32>
    %56 = math.rsqrt %55 : vector<1x1xf32>
    %57 = vector.broadcast %56 : vector<1x1xf32> to vector<24x128xf32>
    %58 = arith.mulf %46, %57 : vector<24x128xf32>
    %59 = arith.mulf %58, %0 : vector<24x128xf32>
    %60 = arith.addf %59, %1 : vector<24x128xf32>
    %cst_25 = arith.constant 0.000000e+00 : f32
    %61 = vector.broadcast %cst_25 : f32 to vector<24x128xf32>
    %62 = arith.cmpf oge, %60, %61 : vector<24x128xf32>
    %cst_26 = arith.constant 0.00999999977 : f32
    %63 = vector.broadcast %cst_26 : f32 to vector<24x128xf32>
    %64 = arith.mulf %63, %60 : vector<24x128xf32>
    %65 = arith.select %62, %60, %64 : vector<24x128xi1>, vector<24x128xf32>
    %66 = tpu.concatenate %37, %65 in 0 : vector<24x128xf32>, vector<24x128xf32> -> vector<48x128xf32>
    %c0_27 = arith.constant 0 : index
    %c0_28 = arith.constant 0 : index
    %67 = vector.load %arg5[%c0_27, %c0_28] : memref<128x256xbf16, #tpu.memory_space<vmem>>, vector<128x256xbf16>
    %68 = arith.truncf %66 : vector<48x128xf32> to vector<48x128xbf16>
    %cst_29 = arith.constant dense<0.000000e+00> : vector<48x256xf32>
    %69 = tpu.matmul %68, %67, %cst_29 {dimension_numbers = #tpu.dot_dimension_numbers<[1], [0], [0], [1], [0, 0, 1, 1], [], []>} : vector<48x128xbf16>, vector<128x256xbf16>, vector<48x256xf32> -> vector<48x256xf32>
    %c0_30 = arith.constant 0 : index
    %c0_31 = arith.constant 0 : index
    %70 = vector.load %arg6[%c0_30, %c0_31] : memref<256x256xbf16, #tpu.memory_space<vmem>>, vector<256x256xbf16>
    %71 = arith.truncf %69 : vector<48x256xf32> to vector<48x256xbf16>
    %cst_32 = arith.constant dense<0.000000e+00> : vector<48x256xf32>
    %72 = tpu.matmul %71, %70, %cst_32 {dimension_numbers = #tpu.dot_dimension_numbers<[1], [0], [0], [1], [0, 0, 1, 1], [], []>} : vector<48x256xbf16>, vector<256x256xbf16>, vector<48x256xf32> -> vector<48x256xf32>
    %c0_33 = arith.constant 0 : index
    %c0_34 = arith.constant 0 : index
    %c0_35 = arith.constant 0 : index
    %73 = vector.load %arg7[%c0_33, %c0_34, %c0_35] : memref<4x48x48xbf16, #tpu.memory_space<vmem>>, vector<1x48x48xbf16>
    %74 = vector.shape_cast %73 : vector<1x48x48xbf16> to vector<48x48xbf16>
    %75 = arith.truncf %69 : vector<48x256xf32> to vector<48x256xbf16>
    %cst_36 = arith.constant dense<0.000000e+00> : vector<48x256xf32>
    %76 = tpu.matmul %74, %75, %cst_36 {dimension_numbers = #tpu.dot_dimension_numbers<[1], [0], [0], [1], [0, 0, 1, 1], [], []>} : vector<48x48xbf16>, vector<48x256xbf16>, vector<48x256xf32> -> vector<48x256xf32>
    %c1 = arith.constant 1 : index
    %c0_37 = arith.constant 0 : index
    %c0_38 = arith.constant 0 : index
    %77 = vector.load %arg7[%c1, %c0_37, %c0_38] : memref<4x48x48xbf16, #tpu.memory_space<vmem>>, vector<1x48x48xbf16>
    %78 = vector.shape_cast %77 : vector<1x48x48xbf16> to vector<48x48xbf16>
    %79 = arith.truncf %72 : vector<48x256xf32> to vector<48x256xbf16>
    %cst_39 = arith.constant dense<0.000000e+00> : vector<48x256xf32>
    %80 = tpu.matmul %78, %79, %cst_39 {dimension_numbers = #tpu.dot_dimension_numbers<[1], [0], [0], [1], [0, 0, 1, 1], [], []>} : vector<48x48xbf16>, vector<48x256xbf16>, vector<48x256xf32> -> vector<48x256xf32>
    %81 = arith.addf %76, %80 : vector<48x256xf32>
    %c0_40 = arith.constant 0 : index
    %c0_41 = arith.constant 0 : index
    %c0_42 = arith.constant 0 : index
    %82 = vector.load %arg8[%c0_40, %c0_41, %c0_42] : memref<2x48x1xf32, #tpu.memory_space<vmem>>, vector<1x48x1xf32>
    %83 = vector.shape_cast %82 : vector<1x48x1xf32> to vector<48x1xf32>
    %84 = vector.broadcast %83 : vector<48x1xf32> to vector<48x256xf32>
    %85 = arith.addf %81, %84 : vector<48x256xf32>
    %c0_43 = arith.constant 0 : index
    %c0_44 = arith.constant 0 : index
    %86 = vector.load %arg6[%c0_43, %c0_44] : memref<256x256xbf16, #tpu.memory_space<vmem>>, vector<256x256xbf16>
    %87 = arith.truncf %85 : vector<48x256xf32> to vector<48x256xbf16>
    %cst_45 = arith.constant dense<0.000000e+00> : vector<48x256xf32>
    %88 = tpu.matmul %87, %86, %cst_45 {dimension_numbers = #tpu.dot_dimension_numbers<[1], [0], [0], [1], [0, 0, 1, 1], [], []>} : vector<48x256xbf16>, vector<256x256xbf16>, vector<48x256xf32> -> vector<48x256xf32>
    %c2 = arith.constant 2 : index
    %c0_46 = arith.constant 0 : index
    %c0_47 = arith.constant 0 : index
    %89 = vector.load %arg7[%c2, %c0_46, %c0_47] : memref<4x48x48xbf16, #tpu.memory_space<vmem>>, vector<1x48x48xbf16>
    %90 = vector.shape_cast %89 : vector<1x48x48xbf16> to vector<48x48xbf16>
    %91 = arith.truncf %85 : vector<48x256xf32> to vector<48x256xbf16>
    %cst_48 = arith.constant dense<0.000000e+00> : vector<48x256xf32>
    %92 = tpu.matmul %90, %91, %cst_48 {dimension_numbers = #tpu.dot_dimension_numbers<[1], [0], [0], [1], [0, 0, 1, 1], [], []>} : vector<48x48xbf16>, vector<48x256xbf16>, vector<48x256xf32> -> vector<48x256xf32>
    %c3 = arith.constant 3 : index
    %c0_49 = arith.constant 0 : index
    %c0_50 = arith.constant 0 : index
    %93 = vector.load %arg7[%c3, %c0_49, %c0_50] : memref<4x48x48xbf16, #tpu.memory_space<vmem>>, vector<1x48x48xbf16>
    %94 = vector.shape_cast %93 : vector<1x48x48xbf16> to vector<48x48xbf16>
    %95 = arith.truncf %88 : vector<48x256xf32> to vector<48x256xbf16>
    %cst_51 = arith.constant dense<0.000000e+00> : vector<48x256xf32>
    %96 = tpu.matmul %94, %95, %cst_51 {dimension_numbers = #tpu.dot_dimension_numbers<[1], [0], [0], [1], [0, 0, 1, 1], [], []>} : vector<48x48xbf16>, vector<48x256xbf16>, vector<48x256xf32> -> vector<48x256xf32>
    %97 = arith.addf %92, %96 : vector<48x256xf32>
    %c1_52 = arith.constant 1 : index
    %c0_53 = arith.constant 0 : index
    %c0_54 = arith.constant 0 : index
    %98 = vector.load %arg8[%c1_52, %c0_53, %c0_54] : memref<2x48x1xf32, #tpu.memory_space<vmem>>, vector<1x48x1xf32>
    %99 = vector.shape_cast %98 : vector<1x48x1xf32> to vector<48x1xf32>
    %100 = vector.broadcast %99 : vector<48x1xf32> to vector<48x256xf32>
    %101 = arith.addf %97, %100 : vector<48x256xf32>
    %102 = vector.extract_strided_slice %101 {offsets = [0, 128], sizes = [48, 128], strides = [1, 1]} : vector<48x256xf32> to vector<48x128xf32>
    %cst_55 = arith.constant 0.000000e+00 : f32
    %103 = vector.broadcast %cst_55 : f32 to vector<48x128xf32>
    %104 = arith.subf %103, %102 : vector<48x128xf32>
    %105 = math.exp %104 : vector<48x128xf32>
    %cst_56 = arith.constant 1.000000e+00 : f32
    %106 = vector.broadcast %cst_56 : f32 to vector<48x128xf32>
    %107 = arith.addf %106, %105 : vector<48x128xf32>
    %cst_57 = arith.constant 1.000000e+00 : f32
    %108 = vector.broadcast %cst_57 : f32 to vector<48x128xf32>
    %109 = arith.divf %108, %107 : vector<48x128xf32>
    %110 = vector.extract_strided_slice %101 {offsets = [0, 0], sizes = [48, 128], strides = [1, 1]} : vector<48x256xf32> to vector<48x128xf32>
    %cst_58 = arith.constant 0.000000e+00 : f32
    %111 = vector.broadcast %cst_58 : f32 to vector<48x128xf32>
    %112 = arith.cmpf oge, %110, %111 : vector<48x128xf32>
    %cst_59 = arith.constant 0.00999999977 : f32
    %113 = vector.broadcast %cst_59 : f32 to vector<48x128xf32>
    %114 = arith.mulf %113, %110 : vector<48x128xf32>
    %115 = arith.select %112, %110, %114 : vector<48x128xi1>, vector<48x128xf32>
    %116 = arith.mulf %109, %115 : vector<48x128xf32>
    %c0_60 = arith.constant 0 : index
    %c0_61 = arith.constant 0 : index
    %117 = vector.load %arg9[%c0_60, %c0_61] : memref<128x32xbf16, #tpu.memory_space<vmem>>, vector<128x32xbf16>
    %118 = arith.truncf %116 : vector<48x128xf32> to vector<48x128xbf16>
    %cst_62 = arith.constant dense<0.000000e+00> : vector<48x32xf32>
    %119 = tpu.matmul %118, %117, %cst_62 {dimension_numbers = #tpu.dot_dimension_numbers<[1], [0], [0], [1], [0, 0, 1, 1], [], []>} : vector<48x128xbf16>, vector<128x32xbf16>, vector<48x32xf32> -> vector<48x32xf32>
    %c0_63 = arith.constant 0 : index
    %c0_64 = arith.constant 0 : index
    %c0_65 = arith.constant 0 : index
    %120 = vector.load %arg10[%c0_63, %c0_64, %c0_65] : memref<2x48x48xf32, #tpu.memory_space<vmem>>, vector<1x48x48xf32>
    %121 = vector.shape_cast %120 : vector<1x48x48xf32> to vector<48x48xf32>
    %122 = vector.extract_strided_slice %119 {offsets = [0, 0], sizes = [48, 8], strides = [1, 1]} : vector<48x32xf32> to vector<48x8xf32>
    %cst_66 = arith.constant dense<0.000000e+00> : vector<48x8xf32>
    %123 = tpu.matmul %121, %122, %cst_66 {dimension_numbers = #tpu.dot_dimension_numbers<[1], [0], [0], [1], [0, 0, 1, 1], [], []>} : vector<48x48xf32>, vector<48x8xf32>, vector<48x8xf32> -> vector<48x8xf32>
    %c1_67 = arith.constant 1 : index
    %c0_68 = arith.constant 0 : index
    %c0_69 = arith.constant 0 : index
    %124 = vector.load %arg10[%c1_67, %c0_68, %c0_69] : memref<2x48x48xf32, #tpu.memory_space<vmem>>, vector<1x48x48xf32>
    %125 = vector.shape_cast %124 : vector<1x48x48xf32> to vector<48x48xf32>
    %126 = vector.extract_strided_slice %119 {offsets = [0, 8], sizes = [48, 8], strides = [1, 1]} : vector<48x32xf32> to vector<48x8xf32>
    %cst_70 = arith.constant dense<0.000000e+00> : vector<48x8xf32>
    %127 = tpu.matmul %125, %126, %cst_70 {dimension_numbers = #tpu.dot_dimension_numbers<[1], [0], [0], [1], [0, 0, 1, 1], [], []>} : vector<48x48xf32>, vector<48x8xf32>, vector<48x8xf32> -> vector<48x8xf32>
    %128 = arith.addf %123, %127 : vector<48x8xf32>
    %c0_71 = arith.constant 0 : index
    %c0_72 = arith.constant 0 : index
    %c0_73 = arith.constant 0 : index
    %129 = vector.load %arg11[%c0_71, %c0_72, %c0_73] : memref<2x48x48xf32, #tpu.memory_space<vmem>>, vector<1x48x48xf32>
    %130 = vector.shape_cast %129 : vector<1x48x48xf32> to vector<48x48xf32>
    %131 = vector.extract_strided_slice %119 {offsets = [0, 16], sizes = [48, 8], strides = [1, 1]} : vector<48x32xf32> to vector<48x8xf32>
    %cst_74 = arith.constant dense<0.000000e+00> : vector<48x8xf32>
    %132 = tpu.matmul %130, %131, %cst_74 {dimension_numbers = #tpu.dot_dimension_numbers<[1], [0], [0], [1], [0, 0, 1, 1], [], []>} : vector<48x48xf32>, vector<48x8xf32>, vector<48x8xf32> -> vector<48x8xf32>
    %c1_75 = arith.constant 1 : index
    %c0_76 = arith.constant 0 : index
    %c0_77 = arith.constant 0 : index
    %133 = vector.load %arg11[%c1_75, %c0_76, %c0_77] : memref<2x48x48xf32, #tpu.memory_space<vmem>>, vector<1x48x48xf32>
    %134 = vector.shape_cast %133 : vector<1x48x48xf32> to vector<48x48xf32>
    %135 = vector.extract_strided_slice %119 {offsets = [0, 24], sizes = [48, 8], strides = [1, 1]} : vector<48x32xf32> to vector<48x8xf32>
    %cst_78 = arith.constant dense<0.000000e+00> : vector<48x8xf32>
    %136 = tpu.matmul %134, %135, %cst_78 {dimension_numbers = #tpu.dot_dimension_numbers<[1], [0], [0], [1], [0, 0, 1, 1], [], []>} : vector<48x48xf32>, vector<48x8xf32>, vector<48x8xf32> -> vector<48x8xf32>
    %137 = arith.addf %132, %136 : vector<48x8xf32>
    %138 = vector.extract_strided_slice %128 {offsets = [0, 0], sizes = [24, 8], strides = [1, 1]} : vector<48x8xf32> to vector<24x8xf32>
    %139 = vector.extract_strided_slice %137 {offsets = [0, 0], sizes = [24, 8], strides = [1, 1]} : vector<48x8xf32> to vector<24x8xf32>
    %cst_79 = arith.constant dense<0.000000e+00> : vector<24x24xf32>
    %140 = tpu.matmul %138, %139, %cst_79 {dimension_numbers = #tpu.dot_dimension_numbers<[1], [1], [0], [0], [0, 0, 1, 0], [], []>} : vector<24x8xf32>, vector<24x8xf32>, vector<24x24xf32> -> vector<24x24xf32>
    %141 = vector.extract_strided_slice %128 {offsets = [24, 0], sizes = [24, 8], strides = [1, 1]} : vector<48x8xf32> to vector<24x8xf32>
    %142 = vector.extract_strided_slice %137 {offsets = [24, 0], sizes = [24, 8], strides = [1, 1]} : vector<48x8xf32> to vector<24x8xf32>
    %cst_80 = arith.constant dense<0.000000e+00> : vector<24x24xf32>
    %143 = tpu.matmul %141, %142, %cst_80 {dimension_numbers = #tpu.dot_dimension_numbers<[1], [1], [0], [0], [0, 0, 1, 0], [], []>} : vector<24x8xf32>, vector<24x8xf32>, vector<24x24xf32> -> vector<24x24xf32>
    %144 = tpu.concatenate %140, %143 in 0 : vector<24x24xf32>, vector<24x24xf32> -> vector<48x24xf32>
    %c0_81 = arith.constant 0 : index
    %c0_82 = arith.constant 0 : index
    %145 = vector.load %arg12[%c0_81, %c0_82] : memref<48x48xf32, #tpu.memory_space<vmem>>, vector<48x48xf32>
    %c0_83 = arith.constant 0 : index
    %c0_84 = arith.constant 0 : index
    %146 = vector.load %arg13[%c0_83, %c0_84] : memref<48x24xf32, #tpu.memory_space<vmem>>, vector<48x24xf32>
    %147 = arith.addf %144, %146 : vector<48x24xf32>
    %cst_85 = arith.constant 0.000000e+00 : f32
    %148 = vector.broadcast %cst_85 : f32 to vector<48x24xf32>
    %149 = arith.subf %148, %147 : vector<48x24xf32>
    %150 = math.exp %149 : vector<48x24xf32>
    %cst_86 = arith.constant 1.000000e+00 : f32
    %151 = vector.broadcast %cst_86 : f32 to vector<48x24xf32>
    %152 = arith.addf %151, %150 : vector<48x24xf32>
    %cst_87 = arith.constant 1.000000e+00 : f32
    %153 = vector.broadcast %cst_87 : f32 to vector<48x24xf32>
    %154 = arith.divf %153, %152 : vector<48x24xf32>
    %cst_88 = arith.constant dense<0.000000e+00> : vector<48x24xf32>
    %155 = tpu.matmul %145, %154, %cst_88 {dimension_numbers = #tpu.dot_dimension_numbers<[1], [0], [0], [1], [0, 0, 1, 1], [], []>} : vector<48x48xf32>, vector<48x24xf32>, vector<48x24xf32> -> vector<48x24xf32>
    %cst_89 = arith.constant dense<0.000000e+00> : vector<24xf32>
    %156 = vector.multi_reduction <add>, %155, %cst_89 [0] : vector<48x24xf32> to vector<24xf32>
    %157 = vector.shape_cast %156 : vector<24xf32> to vector<1x24xf32>
    %cst_90 = arith.constant 4.800000e+01 : f32
    %158 = vector.broadcast %cst_90 : f32 to vector<1x24xf32>
    %159 = arith.divf %157, %158 : vector<1x24xf32>
    %160 = vector.broadcast %159 : vector<1x24xf32> to vector<48x24xf32>
    %161 = arith.subf %155, %160 : vector<48x24xf32>
    %162 = arith.mulf %161, %161 : vector<48x24xf32>
    %cst_91 = arith.constant dense<0.000000e+00> : vector<24xf32>
    %163 = vector.multi_reduction <add>, %162, %cst_91 [0] : vector<48x24xf32> to vector<24xf32>
    %164 = vector.shape_cast %163 : vector<24xf32> to vector<1x24xf32>
    %cst_92 = arith.constant 4.800000e+01 : f32
    %165 = vector.broadcast %cst_92 : f32 to vector<1x24xf32>
    %166 = arith.divf %164, %165 : vector<1x24xf32>
    %cst_93 = arith.constant 9.99999974E-6 : f32
    %167 = vector.broadcast %cst_93 : f32 to vector<1x24xf32>
    %168 = arith.addf %166, %167 : vector<1x24xf32>
    %169 = math.rsqrt %168 : vector<1x24xf32>
    %170 = vector.broadcast %169 : vector<1x24xf32> to vector<48x24xf32>
    %171 = arith.mulf %161, %170 : vector<48x24xf32>
    %c0_94 = arith.constant 0 : index
    %c0_95 = arith.constant 0 : index
    %172 = vector.load %arg14[%c0_94, %c0_95] : memref<1x24xf32, #tpu.memory_space<vmem>>, vector<1x24xf32>
    %173 = vector.broadcast %172 : vector<1x24xf32> to vector<48x24xf32>
    %174 = arith.mulf %171, %173 : vector<48x24xf32>
    %c0_96 = arith.constant 0 : index
    %c0_97 = arith.constant 0 : index
    %175 = vector.load %arg15[%c0_96, %c0_97] : memref<1x24xf32, #tpu.memory_space<vmem>>, vector<1x24xf32>
    %176 = vector.broadcast %175 : vector<1x24xf32> to vector<48x24xf32>
    %177 = arith.addf %174, %176 : vector<48x24xf32>
    %c0_98 = arith.constant 0 : index
    %c0_99 = arith.constant 0 : index
    %178 = vector.load %arg16[%c0_98, %c0_99] : memref<48x24xf32, #tpu.memory_space<vmem>>, vector<48x24xf32>
    %179 = arith.addf %177, %178 : vector<48x24xf32>
    %cst_100 = arith.constant dense<0xFF800000> : vector<48xf32>
    %180 = vector.multi_reduction <maximumf>, %179, %cst_100 [1] : vector<48x24xf32> to vector<48xf32>
    %181 = vector.shape_cast %180 : vector<48xf32> to vector<48x1xf32>
    %182 = vector.broadcast %181 : vector<48x1xf32> to vector<48x24xf32>
    %183 = arith.subf %179, %182 : vector<48x24xf32>
    %184 = math.exp %183 : vector<48x24xf32>
    %cst_101 = arith.constant dense<0.000000e+00> : vector<48xf32>
    %185 = vector.multi_reduction <add>, %184, %cst_101 [1] : vector<48x24xf32> to vector<48xf32>
    %186 = vector.shape_cast %185 : vector<48xf32> to vector<48x1xf32>
    %187 = tpu.reciprocal %186 {approx = true} : vector<48x1xf32> -> vector<48x1xf32>
    %188 = vector.broadcast %187 : vector<48x1xf32> to vector<48x24xf32>
    %189 = arith.mulf %184, %188 : vector<48x24xf32>
    %c0_102 = arith.constant 0 : index
    %c0_103 = arith.constant 0 : index
    %190 = vector.load %arg18[%c0_102, %c0_103] : memref<48x24xf32, #tpu.memory_space<vmem>>, vector<48x24xf32>
    tpu.vector_store %arg18[%c0_102, %c0_103], %189 {strides = array<i32>} : memref<48x24xf32, #tpu.memory_space<vmem>>, vector<48x24xf32>,
    %191 = vector.extract_strided_slice %189 {offsets = [0, 0], sizes = [24, 24], strides = [1, 1]} : vector<48x24xf32> to vector<24x24xf32>
    %192 = vector.extract_strided_slice %116 {offsets = [0, 0], sizes = [24, 128], strides = [1, 1]} : vector<48x128xf32> to vector<24x128xf32>
    %193 = arith.truncf %191 : vector<24x24xf32> to vector<24x24xbf16>
    %194 = arith.truncf %192 : vector<24x128xf32> to vector<24x128xbf16>
    %cst_104 = arith.constant dense<0.000000e+00> : vector<24x128xf32>
    %195 = tpu.matmul %193, %194, %cst_104 {dimension_numbers = #tpu.dot_dimension_numbers<[1], [0], [0], [1], [0, 0, 1, 1], [], []>} : vector<24x24xbf16>, vector<24x128xbf16>, vector<24x128xf32> -> vector<24x128xf32>
    %cst_105 = arith.constant 0.000000e+00 : f32
    %196 = vector.broadcast %cst_105 : f32 to vector<24x128xf32>
    %197 = arith.cmpf oge, %195, %196 : vector<24x128xf32>
    %cst_106 = arith.constant 0.00999999977 : f32
    %198 = vector.broadcast %cst_106 : f32 to vector<24x128xf32>
    %199 = arith.mulf %198, %195 : vector<24x128xf32>
    %200 = arith.select %197, %195, %199 : vector<24x128xi1>, vector<24x128xf32>
    %201 = vector.extract_strided_slice %9 {offsets = [0, 0], sizes = [24, 128], strides = [1, 1]} : vector<48x128xf32> to vector<24x128xf32>
    %202 = arith.addf %200, %201 : vector<24x128xf32>
    %cst_107 = arith.constant dense<0.000000e+00> : vector<24xf32>
    %203 = vector.multi_reduction <add>, %202, %cst_107 [1] : vector<24x128xf32> to vector<24xf32>
    %204 = vector.shape_cast %203 : vector<24xf32> to vector<24x1xf32>
    %cst_108 = arith.constant dense<0.000000e+00> : vector<1xf32>
    %205 = vector.multi_reduction <add>, %204, %cst_108 [0] : vector<24x1xf32> to vector<1xf32>
    %206 = vector.shape_cast %205 : vector<1xf32> to vector<1x1xf32>
    %cst_109 = arith.constant 3.072000e+03 : f32
    %207 = vector.broadcast %cst_109 : f32 to vector<1x1xf32>
    %208 = arith.divf %206, %207 : vector<1x1xf32>
    %209 = vector.broadcast %208 : vector<1x1xf32> to vector<24x128xf32>
    %210 = arith.subf %202, %209 : vector<24x128xf32>
    %211 = arith.mulf %210, %210 : vector<24x128xf32>
    %cst_110 = arith.constant dense<0.000000e+00> : vector<24xf32>
    %212 = vector.multi_reduction <add>, %211, %cst_110 [1] : vector<24x128xf32> to vector<24xf32>
    %213 = vector.shape_cast %212 : vector<24xf32> to vector<24x1xf32>
    %cst_111 = arith.constant dense<0.000000e+00> : vector<1xf32>
    %214 = vector.multi_reduction <add>, %213, %cst_111 [0] : vector<24x1xf32> to vector<1xf32>
    %215 = vector.shape_cast %214 : vector<1xf32> to vector<1x1xf32>
    %cst_112 = arith.constant 3.072000e+03 : f32
    %216 = vector.broadcast %cst_112 : f32 to vector<1x1xf32>
    %217 = arith.divf %215, %216 : vector<1x1xf32>
    %cst_113 = arith.constant 9.99999974E-6 : f32
    %218 = vector.broadcast %cst_113 : f32 to vector<1x1xf32>
    %219 = arith.addf %217, %218 : vector<1x1xf32>
    %220 = math.rsqrt %219 : vector<1x1xf32>
    %221 = vector.broadcast %220 : vector<1x1xf32> to vector<24x128xf32>
    %222 = arith.mulf %210, %221 : vector<24x128xf32>
    %223 = arith.mulf %222, %0 : vector<24x128xf32>
    %224 = arith.addf %223, %1 : vector<24x128xf32>
    %225 = vector.extract_strided_slice %189 {offsets = [24, 0], sizes = [24, 24], strides = [1, 1]} : vector<48x24xf32> to vector<24x24xf32>
    %226 = vector.extract_strided_slice %116 {offsets = [24, 0], sizes = [24, 128], strides = [1, 1]} : vector<48x128xf32> to vector<24x128xf32>
    %227 = arith.truncf %225 : vector<24x24xf32> to vector<24x24xbf16>
    %228 = arith.truncf %226 : vector<24x128xf32> to vector<24x128xbf16>
    %cst_114 = arith.constant dense<0.000000e+00> : vector<24x128xf32>
    %229 = tpu.matmul %227, %228, %cst_114 {dimension_numbers = #tpu.dot_dimension_numbers<[1], [0], [0], [1], [0, 0, 1, 1], [], []>} : vector<24x24xbf16>, vector<24x128xbf16>, vector<24x128xf32> -> vector<24x128xf32>
    %cst_115 = arith.constant 0.000000e+00 : f32
    %230 = vector.broadcast %cst_115 : f32 to vector<24x128xf32>
    %231 = arith.cmpf oge, %229, %230 : vector<24x128xf32>
    %cst_116 = arith.constant 0.00999999977 : f32
    %232 = vector.broadcast %cst_116 : f32 to vector<24x128xf32>
    %233 = arith.mulf %232, %229 : vector<24x128xf32>
    %234 = arith.select %231, %229, %233 : vector<24x128xi1>, vector<24x128xf32>
    %235 = vector.extract_strided_slice %9 {offsets = [24, 0], sizes = [24, 128], strides = [1, 1]} : vector<48x128xf32> to vector<24x128xf32>
    %236 = arith.addf %234, %235 : vector<24x128xf32>
    %cst_117 = arith.constant dense<0.000000e+00> : vector<24xf32>
    %237 = vector.multi_reduction <add>, %236, %cst_117 [1] : vector<24x128xf32> to vector<24xf32>
    %238 = vector.shape_cast %237 : vector<24xf32> to vector<24x1xf32>
    %cst_118 = arith.constant dense<0.000000e+00> : vector<1xf32>
    %239 = vector.multi_reduction <add>, %238, %cst_118 [0] : vector<24x1xf32> to vector<1xf32>
    %240 = vector.shape_cast %239 : vector<1xf32> to vector<1x1xf32>
    %cst_119 = arith.constant 3.072000e+03 : f32
    %241 = vector.broadcast %cst_119 : f32 to vector<1x1xf32>
    %242 = arith.divf %240, %241 : vector<1x1xf32>
    %243 = vector.broadcast %242 : vector<1x1xf32> to vector<24x128xf32>
    %244 = arith.subf %236, %243 : vector<24x128xf32>
    %245 = arith.mulf %244, %244 : vector<24x128xf32>
    %cst_120 = arith.constant dense<0.000000e+00> : vector<24xf32>
    %246 = vector.multi_reduction <add>, %245, %cst_120 [1] : vector<24x128xf32> to vector<24xf32>
    %247 = vector.shape_cast %246 : vector<24xf32> to vector<24x1xf32>
    %cst_121 = arith.constant dense<0.000000e+00> : vector<1xf32>
    %248 = vector.multi_reduction <add>, %247, %cst_121 [0] : vector<24x1xf32> to vector<1xf32>
    %249 = vector.shape_cast %248 : vector<1xf32> to vector<1x1xf32>
    %cst_122 = arith.constant 3.072000e+03 : f32
    %250 = vector.broadcast %cst_122 : f32 to vector<1x1xf32>
    %251 = arith.divf %249, %250 : vector<1x1xf32>
    %cst_123 = arith.constant 9.99999974E-6 : f32
    %252 = vector.broadcast %cst_123 : f32 to vector<1x1xf32>
    %253 = arith.addf %251, %252 : vector<1x1xf32>
    %254 = math.rsqrt %253 : vector<1x1xf32>
    %255 = vector.broadcast %254 : vector<1x1xf32> to vector<24x128xf32>
    %256 = arith.mulf %244, %255 : vector<24x128xf32>
    %257 = arith.mulf %256, %0 : vector<24x128xf32>
    %258 = arith.addf %257, %1 : vector<24x128xf32>
    %259 = tpu.concatenate %224, %258 in 0 : vector<24x128xf32>, vector<24x128xf32> -> vector<48x128xf32>
    %c0_124 = arith.constant 0 : index
    %c0_125 = arith.constant 0 : index
    %260 = vector.load %arg17[%c0_124, %c0_125] : memref<48x128xf32, #tpu.memory_space<vmem>>, vector<48x128xf32>
    tpu.vector_store %arg17[%c0_124, %c0_125], %259 {strides = array<i32>} : memref<48x128xf32, #tpu.memory_space<vmem>>, vector<48x128xf32>,
    return
  }
}

</mosaic_0001>

<bundles_post_ra>
// kernel: st_block_forward.1
= control target key start
LH: loop header
LB: loop body
LE: loop exit
PB: predicated region body
PF: predicated region fallthrough
CT: control target
= control target key end

     0   :  { %vm248_vm0 = vcmask 523264   ;;  %vm966_vm14 = vcmask 392192   ;;  %s4892_s1 = inlined_call_operand.vmem [shape: bf16[192,256], index: 1, kind: input, shape index: {}]   ;;  %s4893_s0 = inlined_call_operand.vmem [shape: bf16[48,192], index: 0, kind: input, shape index: {}]   ;;  %s4894_s2 = inlined_call_operand.vmem [shape: f32[1,256], index: 2, kind: input, shape index: {}]   ;;  %s4895_s5 = inlined_call_operand.vmem [shape: bf16[128,256], index: 5, kind: input, shape index: {}]   ;;  %s4896_s3 = inlined_call_operand.vmem [shape: f32[24,128], index: 3, kind: input, shape index: {}]   ;;  %s4897_s4 = inlined_call_operand.vmem [shape: f32[24,128], index: 4, kind: input, shape index: {}]   ;;  %s4898_s6 = inlined_call_operand.vmem [shape: bf16[256,256], index: 6, kind: input, shape index: {}]   ;;  %s4899_s7 = inlined_call_operand.vmem [shape: bf16[4,48,48], index: 7, kind: input, shape index: {}]   ;;  %s4900_s8 = inlined_call_operand.vmem [shape: f32[2,48,1], index: 8, kind: input, shape index: {}]   ;;  %s4901_s9 = inlined_call_operand.vmem [shape: bf16[128,32], index: 9, kind: input, shape index: {}]   ;;  %s4902_s11 = inlined_call_operand.vmem [shape: f32[2,48,48], index: 11, kind: input, shape index: {}]   ;;  %s4903_s10 = inlined_call_operand.vmem [shape: f32[2,48,48], index: 10, kind: input, shape index: {}]   ;;  %s4904_s13 = inlined_call_operand.vmem [shape: f32[48,24], index: 13, kind: input, shape index: {}]   ;;  %s4905_s12 = inlined_call_operand.vmem [shape: f32[48,48], index: 12, kind: input, shape index: {}]   ;;  %s4906_s14 = inlined_call_operand.vmem [shape: f32[1,24], index: 14, kind: input, shape index: {}]   ;;  %s4907_s15 = inlined_call_operand.vmem [shape: f32[1,24], index: 15, kind: input, shape index: {}]   ;;  %s4908_s16 = inlined_call_operand.vmem [shape: f32[48,24], index: 16, kind: input, shape index: {}]   ;;  %s4909_s18 = inlined_call_operand.vmem [shape: f32[48,24], index: 18, kind: output, shape index: {1}]   ;;  %s4910_s17 = inlined_call_operand.vmem [shape: f32[48,128], index: 17, kind: output, shape index: {0}]  }
   0x1   :  { %4915 = sst [smem:[#allocation3_spill]] %s4892_s1 }
   0x2   :  { %4916 = sst [smem:[#allocation4_spill]] %s4893_s0 }
   0x3   :  { %4917 = sst [smem:[#allocation5_spill]] %s4894_s2 }
   0x4   :  { %s4918_s29 = sld [smem:[#allocation3_spill]] }
   0x5   :  { %s4919_s23 = sld [smem:[#allocation4_spill]] }
   0x6   :  { %s4920_s21 = sld [smem:[#allocation5_spill]] }
   0xa   :  { %v2731_v0 = vld [vmem:[%s4918_s29 + $0x70] sm:$0xf]  ;;  %v3174_v1 = vld [vmem:[%s4918_s29 + $0x74] sm:$0xf0]  ;;  %v2723_v2 = vld [vmem:[%s4918_s29 + $0x60] sm:$0xf] }
   0xb   :  { %v2732_v3 = vor.u32 %v3174_v1, %v2731_v0  ;;  %v3172_v4 = vld [vmem:[%s4918_s29 + $0x64] sm:$0xf0]  ;;  %v2763_v5 = vld [vmem:[%s4918_s29 + $0xb0] sm:$0xf]  ;;  %v3182_v6 = vld [vmem:[%s4918_s29 + $0xb4] sm:$0xf0] }
   0xc   :  { %v2724_v7 = vor.u32 %v3172_v4, %v2723_v2  ;;  %v2764_v8 = vor.u32 %v3182_v6, %v2763_v5  ;;  %v2755_v9 = vld [vmem:[%s4918_s29 + $0xa0] sm:$0xf]  ;;  %v3180_v10 = vld [vmem:[%s4918_s29 + $0xa4] sm:$0xf0]  ;;  %v2715_v11 = vld [vmem:[%s4918_s29 + $0x50] sm:$0xf] }
   0xd   :  { %258 = vmatpush.bf16.msra.mxu0 %v2732_v3  ;;  %v3170_v12 = vld [vmem:[%s4918_s29 + $0x54] sm:$0xf0]  ;;  %v2756_v13 = vor.u32 %v3180_v10, %v2755_v9  ;;  %v2747_v14 = vld [vmem:[%s4918_s29 + $0x90] sm:$0xf]  ;;  %v2707_v17 = vld [vmem:[%s4918_s29 + $0x40] sm:$0xf] }
   0xe   :  { %286 = vmatpush.bf16.msra.mxu1 %v2764_v8  ;;  %v3178_v15 = vld [vmem:[%s4918_s29 + $0x94] sm:$0xf0]  ;;  %v2716_v16 = vor.u32 %v3170_v12, %v2715_v11  ;;  %v3168_v18 = vld [vmem:[%s4918_s29 + $0x44] sm:$0xf0]  ;;  %v2739_v20 = vld [vmem:[%s4918_s29 + $0x80] sm:$0xf] }
   0xf   :  { %v2748_v19 = vor.u32 %v3178_v15, %v2747_v14  ;;  %v3176_v21 = vld [vmem:[%s4918_s29 + $0x84] sm:$0xf0]  ;;  %v2708_v22 = vor.u32 %v3168_v18, %v2707_v17  ;;  %v2699_v23 = vld [vmem:[%s4918_s29 + $0x30] sm:$0xf]  ;;  %v3166_v24 = vld [vmem:[%s4918_s29 + $0x34] sm:$0xf0] }
  0x10   :  { %v2740_v25 = vor.u32 %v3176_v21, %v2739_v20  ;;  %v3153_v26 = vld [vmem:[%s4919_s23 + $0x4] sm:$0xf]  ;;  %v2653_v27 = vld [vmem:[%s4919_s23 + $0x8] sm:$0xf0]  ;;  %v2700_v28 = vor.u32 %v3166_v24, %v2699_v23  ;;  %v2691_v29 = vld [vmem:[%s4918_s29 + $0x20] sm:$0xf] }
  0x11   :  { %259 = vmatpush.bf16.msra.mxu0 %v2724_v7  ;;  %v3164_v30 = vld [vmem:[%s4918_s29 + $0x24] sm:$0xf0]  ;;  %v3575_v31 = vor.u32 %v3153_v26, %v2653_v27  ;;  %v2683_v33 = vld [vmem:[%s4918_s29 + $0x10] sm:$0xf]  ;;  %v3162_v34 = vld [vmem:[%s4918_s29 + $0x14] sm:$0xf0] }
  0x12   :  { %287 = vmatpush.bf16.msra.mxu1 %v2756_v13  ;;  %v2692_v32 = vor.u32 %v3164_v30, %v2691_v29  ;;  %v2684_v35 = vor.u32 %v3162_v34, %v2683_v33  ;;  %v2675_v36 = vld [vmem:[%s4918_s29] sm:$0xf]  ;;  %v3160_v37 = vld [vmem:[%s4918_s29 + $0x4] sm:$0xf0]  ;;  %v3155_v41 = vld [vmem:[%s4919_s23 + $0x14] sm:$0xf] }
  0x13   :  { %v2676_v38 = vor.u32 %v3160_v37, %v2675_v36  ;;  %v2651_v39 = vld [vmem:[%s4919_s23] sm:$0xf]  ;;  %v3154_v40 = vld [vmem:[%s4919_s23 + $0x4] sm:$0xf0]  ;;  %v2661_v42 = vld [vmem:[%s4919_s23 + $0x18] sm:$0xf0] }
  0x14   :  { %v3603_v43 = vor.u32 %v3154_v40, %v2651_v39  ;;  %v3605_v44 = vor.u32 %v3155_v41, %v2661_v42  ;;  %v2659_v45 = vld [vmem:[%s4919_s23 + $0x10] sm:$0xf]  ;;  %v3156_v46 = vld [vmem:[%s4919_s23 + $0x14] sm:$0xf0]  ;;  %v3157_v47 = vld [vmem:[%s4919_s23 + $0x24] sm:$0xf] }
  0x15   :  { %260 = vmatpush.bf16.msra.mxu0 %v2716_v16  ;;  %v2669_v48 = vld [vmem:[%s4919_s23 + $0x28] sm:$0xf0]  ;;  %v3622_v49 = vor.u32 %v3156_v46, %v2659_v45  ;;  %v2667_v51 = vld [vmem:[%s4919_s23 + $0x20] sm:$0xf]  ;;  %v3158_v52 = vld [vmem:[%s4919_s23 + $0x24] sm:$0xf0] }
  0x16   :  { %288 = vmatpush.bf16.msra.mxu1 %v2748_v19  ;;  %v3624_v50 = vor.u32 %v3157_v47, %v2669_v48  ;;  %v3635_v53 = vor.u32 %v3158_v52, %v2667_v51  ;;  %v3641_v55 = vld [vmem:[%s4920_s21] sm:$0x3]  ;;  %v3408_v17 = vmov 3072.0   ;;  %v2733_v36 = vld [vmem:[%s4918_s29 + $0x78] sm:$0xf0]  ;;  %s3411_s21 = smov 112  }
  0x17   :  { %v97_v56 = vperm.slane %v3641_v55, 0  ;;  %3316 = vrcp.f32 %v3408_v17  ;;  %v3171_v39 = vld [vmem:[%s4918_s29 + $0x64] sm:$0xf]  ;;  %v2725_v40 = vld [vmem:[%s4918_s29 + $0x68] sm:$0xf0]  ;;  %s3412_s23 = smov 120  }
  0x18   :  { %v3181_v47 = vld [vmem:[%s4918_s29 + $0xb4] sm:$0xf]  ;;  %v2765_v48 = vld [vmem:[%s4918_s29 + $0xb8] sm:$0xf0]  ;;  %v2728_v51 = vor.u32 %v3171_v39, %v2725_v40 }
  0x19   :  { %261 = vmatpush.bf16.msra.mxu0 %v2708_v22  ;;  %v2768_v52 = vor.u32 %v3181_v47, %v2765_v48  ;;  %v2701_v17 = vld [vmem:[%s4918_s29 + $0x38] sm:$0xf0]  ;;  %v3195_v47 = vld [vmem:[%s4895_s5 + $0x64] sm:$0xf] }
  0x1a   :  { %289 = vmatpush.bf16.msra.mxu1 %v2740_v25 }
  0x1b   :  { %334 = vmatpush.bf16.msra.mxu3 %v2768_v52 }
  0x1d   :  { %262 = vmatpush.bf16.msra.mxu0 %v2700_v28  ;;  %2769 = vmatmul.msk.bf16.vlgmr.msra.gmra.mxu1 %vm248_vm0, %v3575_v31  ;;  %v3317_v18 = vpop.eup %3316 }
  0x1e   :  { %v369_v20 = vmul.f32 3072.0, %v3317_v18  ;;  %vm373_vm1 = vweird.f32 %v3317_v18 }
  0x20   :  { %v370_v23 = vsub.f32 1.0, %v369_v20 }
  0x21   :  { %263 = vmatpush.bf16.msra.mxu0 %v2692_v32 }
  0x22   :  { %v371_v26 = vmul.f32 %v3317_v18, %v370_v23  ;;  %v2693_v23 = vld [vmem:[%s4918_s29 + $0x28] sm:$0xf0] }
  0x24   :  { %v372_v29 = vadd.f32 %v3317_v18, %v371_v26 }
  0x25   :  { %264 = vmatpush.bf16.msra.mxu0 %v2684_v35  ;;  %v3173_v35 = vld [vmem:[%s4918_s29 + $0x74] sm:$0xf] }
  0x26   :  { %v3653_v33 = vsel %vm373_vm1, %v3317_v18, %v372_v29 }
  0x27   :  { %4921 = vst [vmem:[#allocation2_spill] sm:$0xff] %v3653_v33 }
  0x29   :  { %265 = vmatpush.bf16.msra.mxu0 %v2676_v38  ;;  %v2736_v38 = vor.u32 %v3173_v35, %v2733_v36  ;;  %v2677_v35 = vld [vmem:[%s4918_s29 + $0x8] sm:$0xf0] }
  0x2b   :  { %306 = vmatpush.bf16.msra.mxu2 %v2736_v38 }
  0x2c   :  { %266 = vmatmul.bf16.vlgmr.msra.gmra.mxu0 %v3603_v43 }
  0x2d   :  { %2770 = vmatmul.msk.bf16.gmra.mxu1 %vm248_vm0, %v3605_v44 }
  0x2f   :  { %307 = vmatpush.bf16.msra.mxu2 %v2728_v51  ;;  %v2827_v51 = vld [vmem:[%s4895_s5 + $0x68] sm:$0xf0] }
  0x30   :  { %v2830_v52 = vor.u32 %v3195_v47, %v2827_v51 }
  0x3c   :  { %271 = vmatmul.bf16.gmra.mxu0 %v3622_v49 }
  0x3d   :  { %2771 = vmatmul.msk.bf16.gmra.mxu1 %vm248_vm0, %v3624_v50 }
  0x4c   :  { %276 = vmatmul.bf16.gmra.mxu0 %v3635_v53 }
  0x9a   :  { %v291_v54 = vpop.f32.mrf.mxu1 }
  0xa2   :  { %v293_v59 = vpop.f32.mrf.mxu1 }
  0xa9   :  { %v267_v57 = vpop.f32.mrf.mxu0 }
  0xaa   :  { %v268_v58 = vadd.f32 %v267_v57, %v97_v56  ;;  %v296_v0 = vpop.f32.mrf.mxu1 }
  0xac   :  { %v292_v60 = vadd.f32 %v291_v54, %v268_v58  ;;  %v3179_v54 = vld [vmem:[%s4918_s29 + $0xa4] sm:$0xf] }
  0xae   :  { %354 = vadd.xlane.f32.xlu0 %v292_v60 }
  0xb1   :  { %v269_v61 = vpop.f32.mrf.mxu0 }
  0xb2   :  { %v270_v62 = vadd.f32 %v269_v61, %v97_v56  ;;  %v298_v4 = vpop.f32.mrf.mxu1  ;;  %v2757_v61 = vld [vmem:[%s4918_s29 + $0xa8] sm:$0xf0] }
  0xb4   :  { %v294_v63 = vadd.f32 %v293_v59, %v270_v62  ;;  %v3169_v59 = vld [vmem:[%s4918_s29 + $0x54] sm:$0xf]  ;;  %v2760_v62 = vor.u32 %v3179_v54, %v2757_v61  ;;  %v2817_v54 = vld [vmem:[%s4895_s5 + $0x50] sm:$0xf]  ;;  %v2809_v61 = vld [vmem:[%s4895_s5 + $0x40] sm:$0xf] }
  0xb6   :  { %356 = vadd.xlane.f32.xlu0 %v294_v63  ;;  %335 = vmatpush.bf16.msra.mxu3 %v2760_v62  ;;  %v3192_v62 = vld [vmem:[%s4895_s5 + $0x44] sm:$0xf0] }
  0xb9   :  { %v272_v1 = vpop.f32.mrf.mxu0 }
  0xba   :  { %v273_v2 = vadd.f32 %v272_v1, %v97_v56  ;;  %v301_v8 = vpop.f32.mrf.mxu1 }
  0xbc   :  { %v297_v3 = vadd.f32 %v296_v0, %v273_v2  ;;  %v2749_v0 = vld [vmem:[%s4918_s29 + $0x98] sm:$0xf0] }
  0xbe   :  { %358 = vadd.xlane.f32.xlu1 %v297_v3 }
  0xc1   :  { %v274_v5 = vpop.f32.mrf.mxu0 }
  0xc2   :  { %v275_v6 = vadd.f32 %v274_v5, %v97_v56  ;;  %v303_v14 = vpop.f32.mrf.mxu1  ;;  %v2709_v5 = vld [vmem:[%s4918_s29 + $0x48] sm:$0xf0] }
  0xc4   :  { %v3644_v7 = vadd.f32 %v298_v4, %v275_v6  ;;  %v3167_v4 = vld [vmem:[%s4918_s29 + $0x44] sm:$0xf] }
  0xc6   :  { %426 = vadd.xlane.f32.xlu1 %v3644_v7 }
  0xc9   :  { %v277_v9 = vpop.f32.mrf.mxu0 }
  0xca   :  { %v278_v10 = vadd.f32 %v277_v9, %v97_v56 }
  0xcc   :  { %v3647_v11 = vadd.f32 %v301_v8, %v278_v10  ;;  %v3175_v10 = vld [vmem:[%s4918_s29 + $0x84] sm:$0xf] }
  0xce   :  { %428 = vadd.xlane.f32.xlu2 %v3647_v11 }
  0xd1   :  { %v279_v12 = vpop.f32.mrf.mxu0 }
  0xd2   :  { %v280_v13 = vadd.f32 %v279_v12, %v97_v56  ;;  %v2741_v12 = vld [vmem:[%s4918_s29 + $0x88] sm:$0xf0] }
  0xd3   :  { %v2744_v18 = vor.u32 %v3175_v10, %v2741_v12  ;;  %v2803_v12 = vld [vmem:[%s4895_s5 + $0x38] sm:$0xf0] }
  0xd4   :  { %v3650_v15 = vadd.f32 %v303_v14, %v280_v13  ;;  %v2712_v13 = vor.u32 %v3167_v4, %v2709_v5  ;;  %v2801_v5 = vld [vmem:[%s4895_s5 + $0x30] sm:$0xf] }
  0xd6   :  { %430 = vadd.xlane.f32.xlu2 %v3650_v15 }
 0x121   :  { %v355_v16 = vpop.xlane.xlu0 %354 }
 0x129   :  { %v357_v19 = vpop.xlane.xlu0 %356 }
 0x12a   :  { %v360_v21 = vadd.f32 %v357_v19, %v355_v16  ;;  %v3165_v16 = vld [vmem:[%s4918_s29 + $0x34] sm:$0xf] }
 0x12b   :  { %v2704_v20 = vor.u32 %v3165_v16, %v2701_v17  ;;  %v2793_v17 = vld [vmem:[%s4895_s5 + $0x20] sm:$0xf] }
 0x131   :  { %v359_v22 = vpop.xlane.xlu1 %358 }
 0x132   :  { %v361_v24 = vadd.f32 %v360_v21, %v359_v22  ;;  %v3163_v22 = vld [vmem:[%s4918_s29 + $0x24] sm:$0xf] }
 0x134   :  { %v362_v25 = vrot.slane %v361_v24, 4 }
 0x136   :  { %v363_v27 = vadd.f32 %v362_v25, %v361_v24  ;;  %v2696_v25 = vor.u32 %v3163_v22, %v2693_v23  ;;  %v2795_v22 = vld [vmem:[%s4895_s5 + $0x28] sm:$0xf0] }
 0x138   :  { %v364_v28 = vrot.slane %v363_v27, 2 }
 0x139   :  { %v427_v1 = vpop.xlane.xlu1 %426 }
 0x13a   :  { %v365_v30 = vadd.f32 %v364_v28, %v363_v27  ;;  %v3161_v27 = vld [vmem:[%s4918_s29 + $0x14] sm:$0xf]  ;;  %v2685_v28 = vld [vmem:[%s4918_s29 + $0x18] sm:$0xf0] }
 0x13c   :  { %v366_v32 = vrot.slane %v365_v30, 1 }
 0x13e   :  { %v367_v34 = vadd.f32 %v366_v32, %v365_v30  ;;  %v2688_v30 = vor.u32 %v3161_v27, %v2685_v28  ;;  %v3185_v27 = vld [vmem:[%s4895_s5 + $0x14] sm:$0xf] }
 0x140   :  { %v375_v37 = vmul.f32 %v3653_v33, %v367_v34  ;;  %v3159_v34 = vld [vmem:[%s4918_s29 + $0x4] sm:$0xf] }
 0x141   :  { %v429_v41 = vpop.xlane.xlu2 %428  ;;  %v2680_v38 = vor.u32 %v3159_v34, %v2677_v35  ;;  %v2777_v35 = vld [vmem:[%s4895_s5] sm:$0xf] }
 0x142   :  { %v3668_v42 = vsub.f32 %v297_v3, %v375_v37  ;;  %v3670_v45 = vsub.f32 %v294_v63, %v375_v37  ;;  %v3672_v46 = vsub.f32 %v292_v60, %v375_v37  ;;  %v2717_v60 = vld [vmem:[%s4918_s29 + $0x58] sm:$0xf0]  ;;  %v3177_v63 = vld [vmem:[%s4918_s29 + $0x94] sm:$0xf]  ;;  %v432_v3 = vadd.f32 %v429_v41, %v427_v1  ;;  %v2811_v1 = vld [vmem:[%s4895_s5 + $0x48] sm:$0xf0] }
 0x143   :  { %v2720_v2 = vor.u32 %v3169_v59, %v2717_v60  ;;  %v2752_v8 = vor.u32 %v3177_v63, %v2749_v0  ;;  %v2819_v59 = vld [vmem:[%s4895_s5 + $0x58] sm:$0xf0]  ;;  %v3191_v63 = vld [vmem:[%s4895_s5 + $0x44] sm:$0xf]  ;;  %v2810_v0 = vor.u32 %v3192_v62, %v2809_v61 }
 0x144   :  { %v381_v56 = vmul.f32 %v3668_v42, %v3668_v42  ;;  %v380_v57 = vmul.f32 %v3670_v45, %v3670_v45  ;;  %v379_v58 = vmul.f32 %v3672_v46, %v3672_v46 }
 0x145   :  { %308 = vmatpush.bf16.msra.mxu2 %v2720_v2  ;;  %336 = vmatpush.bf16.msra.mxu3 %v2752_v8  ;;  %v2814_v2 = vor.u32 %v3191_v63, %v2811_v1  ;;  %v3189_v8 = vld [vmem:[%s4895_s5 + $0x34] sm:$0xf]  ;;  %v3870_v1 = vld [vmem:[%s4896_s3 + $0x8] sm:$0xff] }
 0x146   :  { %386 = vadd.xlane.f32.xlu2 %v381_v56  ;;  %384 = vadd.xlane.f32.xlu1 %v380_v57  ;;  %v3194_v56 = vld [vmem:[%s4895_s5 + $0x54] sm:$0xf0]  ;;  %v3193_v57 = vld [vmem:[%s4895_s5 + $0x54] sm:$0xf] }
 0x147   :  { %382 = vadd.xlane.f32.xlu0 %v379_v58  ;;  %v2818_v58 = vor.u32 %v3194_v56, %v2817_v54  ;;  %v2822_v60 = vor.u32 %v3193_v57, %v2819_v59 }
 0x149   :  { %v431_v6 = vpop.xlane.xlu2 %430  ;;  %309 = vmatpush.bf16.msra.mxu2 %v2712_v13  ;;  %337 = vmatpush.bf16.msra.mxu3 %v2744_v18  ;;  %v3188_v18 = vld [vmem:[%s4895_s5 + $0x24] sm:$0xf0] }
 0x14a   :  { %v433_v9 = vadd.f32 %v432_v3, %v431_v6  ;;  %v3190_v6 = vld [vmem:[%s4895_s5 + $0x34] sm:$0xf0] }
 0x14b   :  { %v2802_v10 = vor.u32 %v3190_v6, %v2801_v5  ;;  %v3877_v6 = vld [vmem:[%s4897_s4] sm:$0xff] }
 0x14c   :  { %v434_v14 = vrot.slane %v433_v9, 4  ;;  %2772 = vmatmul.msk.bf16.vlgmr.msra.gmra.mxu3 %vm248_vm0, %v3575_v31 }
 0x14d   :  { %310 = vmatpush.bf16.msra.mxu2 %v2704_v20 }
 0x14e   :  { %v435_v19 = vadd.f32 %v434_v14, %v433_v9  ;;  %v2806_v14 = vor.u32 %v3189_v8, %v2803_v12  ;;  %v3882_v8 = vld [vmem:[%s4897_s4 + $0x8] sm:$0xff] }
 0x150   :  { %v436_v21 = vrot.slane %v435_v19, 2 }
 0x151   :  { %311 = vmatpush.bf16.msra.mxu2 %v2696_v25  ;;  %v2785_v25 = vld [vmem:[%s4895_s5 + $0x10] sm:$0xf] }
 0x152   :  { %v437_v24 = vadd.f32 %v436_v21, %v435_v19  ;;  %v3187_v19 = vld [vmem:[%s4895_s5 + $0x24] sm:$0xf]  ;;  %v2794_v21 = vor.u32 %v3188_v18, %v2793_v17 }
 0x153   :  { %v2798_v23 = vor.u32 %v3187_v19, %v2795_v22 }
 0x154   :  { %v438_v26 = vrot.slane %v437_v24, 1 }
 0x155   :  { %312 = vmatpush.bf16.msra.mxu2 %v2688_v30  ;;  %v2787_v30 = vld [vmem:[%s4895_s5 + $0x18] sm:$0xf0] }
 0x156   :  { %v439_v29 = vadd.f32 %v438_v26, %v437_v24  ;;  %v3186_v26 = vld [vmem:[%s4895_s5 + $0x14] sm:$0xf0] }
 0x158   :  { %v440_v32 = vmul.f32 %v439_v29, %v3653_v33  ;;  %v2786_v29 = vor.u32 %v3186_v26, %v2785_v25  ;;  %v3893_v25 = vld [vmem:[%s4896_s3 + $0x10] sm:$0xff] }
 0x159   :  { %313 = vmatpush.bf16.msra.mxu2 %v2680_v38  ;;  %v3184_v38 = vld [vmem:[%s4895_s5 + $0x4] sm:$0xf0] }
 0x15a   :  { %v3744_v36 = vsub.f32 %v3650_v15, %v440_v32  ;;  %v3747_v37 = vsub.f32 %v3647_v11, %v440_v32  ;;  %v3750_v31 = vsub.f32 %v3644_v7, %v440_v32  ;;  %v2833_v7 = vld [vmem:[%s4895_s5 + $0x70] sm:$0xf]  ;;  %v3198_v11 = vld [vmem:[%s4895_s5 + $0x74] sm:$0xf0]  ;;  %v3196_v15 = vld [vmem:[%s4895_s5 + $0x64] sm:$0xf0]  ;;  %v2790_v32 = vor.u32 %v3185_v27, %v2787_v30 }
 0x15b   :  { %v3898_v27 = vld [vmem:[%s4897_s4 + $0x10] sm:$0xff] }
 0x15c   :  { %v446_v39 = vmul.f32 %v3744_v36, %v3744_v36  ;;  %v445_v40 = vmul.f32 %v3747_v37, %v3747_v37  ;;  %v444_v41 = vmul.f32 %v3750_v31, %v3750_v31  ;;  %314 = vmatmul.bf16.vlgmr.msra.gmra.mxu2 %v3603_v43  ;;  %2773 = vmatmul.msk.bf16.gmra.mxu3 %vm248_vm0, %v3605_v44  ;;  %v3197_v43 = vld [vmem:[%s4895_s5 + $0x74] sm:$0xf] }
 0x15d   :  { %v2834_v44 = vor.u32 %v3198_v11, %v2833_v7  ;;  %v2779_v7 = vld [vmem:[%s4895_s5 + $0x8] sm:$0xf0] }
 0x15e   :  { %451 = vadd.xlane.f32.xlu2 %v446_v39  ;;  %449 = vadd.xlane.f32.xlu1 %v445_v40  ;;  %v3183_v39 = vld [vmem:[%s4895_s5 + $0x4] sm:$0xf] }
 0x15f   :  { %447 = vadd.xlane.f32.xlu0 %v444_v41  ;;  %590 = vmatpush.bf16.msrb.mxu1 %v2834_v44  ;;  %v2778_v41 = vor.u32 %v3184_v38, %v2777_v35  ;;  %v2782_v11 = vor.u32 %v3183_v39, %v2779_v7  ;;  %v3213_v39 = vld [vmem:[%s4898_s6 + $0x74] sm:$0xf] }
 0x16c   :  { %319 = vmatmul.bf16.gmra.mxu2 %v3622_v49  ;;  %2774 = vmatmul.msk.bf16.gmra.mxu3 %vm248_vm0, %v3624_v50  ;;  %v2835_v49 = vld [vmem:[%s4895_s5 + $0x78] sm:$0xf0] }
 0x16d   :  { %v2838_v50 = vor.u32 %v3197_v43, %v2835_v49 }
 0x16f   :  { %614 = vmatpush.bf16.msrb.mxu3 %v2838_v50 }
 0x173   :  { %615 = vmatpush.bf16.msrb.mxu3 %v2830_v52 }
 0x177   :  { %616 = vmatpush.bf16.msrb.mxu3 %v2822_v60 }
 0x17b   :  { %617 = vmatpush.bf16.msrb.mxu3 %v2814_v2 }
 0x17c   :  { %324 = vmatmul.bf16.gmra.mxu2 %v3635_v53  ;;  %v2825_v53 = vld [vmem:[%s4895_s5 + $0x60] sm:$0xf] }
 0x17d   :  { %v2826_v48 = vor.u32 %v3196_v15, %v2825_v53 }
 0x17f   :  { %591 = vmatpush.bf16.msrb.mxu1 %v2826_v48  ;;  %618 = vmatpush.bf16.msrb.mxu3 %v2806_v14 }
 0x183   :  { %592 = vmatpush.bf16.msrb.mxu1 %v2818_v58  ;;  %619 = vmatpush.bf16.msrb.mxu3 %v2798_v23 }
 0x187   :  { %593 = vmatpush.bf16.msrb.mxu1 %v2810_v0  ;;  %620 = vmatpush.bf16.msrb.mxu3 %v2790_v32  ;;  %v3865_v0 = vld [vmem:[%s4896_s3] sm:$0xff]  ;;  %v2897_v32 = vld [vmem:[%s4898_s6 + $0x70] sm:$0xf] }
 0x18b   :  { %594 = vmatpush.bf16.msrb.mxu1 %v2802_v10  ;;  %621 = vmatpush.bf16.msrb.mxu3 %v2782_v11 }
 0x18f   :  { %595 = vmatpush.bf16.msrb.mxu1 %v2794_v21 }
 0x193   :  { %596 = vmatpush.bf16.msrb.mxu1 %v2786_v29 }
 0x197   :  { %597 = vmatpush.bf16.msrb.mxu1 %v2778_v41 }
 0x1b9   :  { %v385_v3 = vpop.xlane.xlu1 %384  ;;  %v387_v13 = vpop.xlane.xlu2 %386 }
 0x1ba   :  { %v383_v4 = vpop.xlane.xlu0 %382 }
 0x1bb   :  { %v388_v9 = vadd.f32 %v385_v3, %v383_v4 }
 0x1bd   :  { %v389_v16 = vadd.f32 %v388_v9, %v387_v13 }
 0x1bf   :  { %v390_v20 = vrot.slane %v389_v16, 4 }
 0x1c1   :  { %v391_v24 = vadd.f32 %v390_v20, %v389_v16 }
 0x1c3   :  { %v392_v28 = vrot.slane %v391_v24, 2 }
 0x1c5   :  { %v393_v34 = vadd.f32 %v392_v28, %v391_v24 }
 0x1c7   :  { %v394_v40 = vrot.slane %v393_v34, 1 }
 0x1c9   :  { %v395_v43 = vadd.f32 %v394_v40, %v393_v34  ;;  %v3214_v34 = vld [vmem:[%s4898_s6 + $0x74] sm:$0xf0]  ;;  %v2889_v40 = vld [vmem:[%s4898_s6 + $0x60] sm:$0xf] }
 0x1ca   :  { %v3914_v38 = vor.u32 %v3214_v34, %v2897_v32  ;;  %v2937_v32 = vld [vmem:[%s4898_s6 + $0xc0] sm:$0xf] }
 0x1cb   :  { %v396_v44 = vmul.f32 %v395_v43, %v3653_v33  ;;  %v3212_v43 = vld [vmem:[%s4898_s6 + $0x64] sm:$0xf0] }
 0x1cc   :  { %836 = vmatpush.bf16.msrb.mxu0 %v3914_v38 }
 0x1cd   :  { %v397_v49 = vadd.f32 1e-05, %v396_v44  ;;  %v3211_v44 = vld [vmem:[%s4898_s6 + $0x64] sm:$0xf] }
 0x1cf   :  { %3318 = vrsqrt.f32 %v397_v49  ;;  %vm404_vm3 = vweird.f32 %v397_v49  ;;  %v339_v30 = vpop.f32.mrf.mxu3 }
 0x1d1   :  { %v450_v50 = vpop.xlane.xlu1 %449  ;;  %v452_v47 = vpop.xlane.xlu2 %451 }
 0x1d2   :  { %v448_v53 = vpop.xlane.xlu0 %447 }
 0x1d3   :  { %v453_v15 = vadd.f32 %v450_v50, %v448_v53  ;;  %v3938_v50 = vor.u32 %v3212_v43, %v2889_v40  ;;  %v2961_v53 = vld [vmem:[%s4898_s6 + $0xf0] sm:$0xf]  ;;  %v3223_v40 = vld [vmem:[%s4898_s6 + $0xc4] sm:$0xf] }
 0x1d5   :  { %v3319_v48 = vpop.eup %3318  ;;  %v454_v51 = vadd.f32 %v453_v15, %v452_v47  ;;  %v3230_v15 = vld [vmem:[%s4898_s6 + $0xf4] sm:$0xf0]  ;;  %v3229_v47 = vld [vmem:[%s4898_s6 + $0xf4] sm:$0xf]  ;;  %837 = vmatpush.bf16.msrb.mxu0 %v3938_v50 }
 0x1d6   :  { %v399_v52 = vmul.f32 %v3319_v48, %v397_v49  ;;  %vm405_vm2 = vweird.f32 %v3319_v48  ;;  %v2891_v49 = vld [vmem:[%s4898_s6 + $0x68] sm:$0xf0] }
 0x1d7   :  { %v455_v54 = vrot.slane %v454_v51, 4  ;;  %vm406_vm4 = vmor %vm404_vm3, %vm405_vm2 }
 0x1d8   :  { %v400_v56 = vmul.f32 %v3319_v48, %v399_v52  ;;  %v3954_v52 = vor.u32 %v3211_v44, %v2891_v49  ;;  %v3205_v44 = vld [vmem:[%s4898_s6 + $0x34] sm:$0xf]  ;;  %v2867_v49 = vld [vmem:[%s4898_s6 + $0x38] sm:$0xf0] }
 0x1d9   :  { %v456_v57 = vadd.f32 %v455_v54, %v454_v51  ;;  %v3956_v54 = vor.u32 %v3230_v15, %v2961_v53 }
 0x1da   :  { %v401_v58 = vmul.f32 0.5, %v400_v56  ;;  %v2963_v56 = vld [vmem:[%s4898_s6 + $0xf8] sm:$0xf0] }
 0x1db   :  { %v457_v59 = vrot.slane %v456_v57, 2  ;;  %860 = vmatpush.bf16.msrb.mxu2 %v3956_v54 }
 0x1dc   :  { %v402_v60 = vsub.f32 1.5, %v401_v58  ;;  %v3210_v58 = vld [vmem:[%s4898_s6 + $0x54] sm:$0xf0] }
 0x1dd   :  { %v458_v61 = vadd.f32 %v457_v59, %v456_v57  ;;  %v2881_v57 = vld [vmem:[%s4898_s6 + $0x50] sm:$0xf] }
 0x1de   :  { %v403_v62 = vmul.f32 %v3319_v48, %v402_v60 }
 0x1df   :  { %v459_v63 = vrot.slane %v458_v61, 1  ;;  %v315_v29 = vpop.f32.mrf.mxu2 }
 0x1e0   :  { %v407_v2 = vsel %vm406_vm4, %v3319_v48, %v403_v62  ;;  %v3209_v62 = vld [vmem:[%s4898_s6 + $0x54] sm:$0xf] }
 0x1e1   :  { %v460_v3 = vadd.f32 %v459_v63, %v458_v61  ;;  %v408_v4 = vmul.f32 %v407_v2, %v3672_v46  ;;  %v409_v5 = vmul.f32 %v407_v2, %v3670_v45  ;;  %v410_v23 = vmul.f32 %v407_v2, %v3668_v42  ;;  %v2883_v63 = vld [vmem:[%s4898_s6 + $0x58] sm:$0xf0]  ;;  %v2953_v2 = vld [vmem:[%s4898_s6 + $0xe0] sm:$0xf] }
 0x1e2   :  { %v3905_v42 = vperm.slane %v3641_v55, 1  ;;  %v2899_v55 = vld [vmem:[%s4898_s6 + $0x78] sm:$0xf0]  ;;  %v3969_v61 = vor.u32 %v3229_v47, %v2963_v56 }
 0x1e3   :  { %v461_v9 = vmul.f32 %v460_v3, %v3653_v33  ;;  %v411_v10 = vmul.f32 %v408_v4, %v3865_v0  ;;  %v412_v12 = vmul.f32 %v409_v5, %v3870_v1  ;;  %v413_v35 = vmul.f32 %v410_v23, %v3893_v25  ;;  %v3227_v3 = vld [vmem:[%s4898_s6 + $0xe4] sm:$0xf]  ;;  %v2955_v4 = vld [vmem:[%s4898_s6 + $0xe8] sm:$0xf0] }
 0x1e4   :  { %v316_v7 = vadd.f32 %v315_v29, %v3905_v42  ;;  %v3926_v11 = vor.u32 %v3213_v39, %v2899_v55  ;;  %908 = vmatpush.bf16.msra.mxu3 %v3969_v61  ;;  %v2865_v29 = vld [vmem:[%s4898_s6 + $0x30] sm:$0xf]  ;;  %v3224_v55 = vld [vmem:[%s4898_s6 + $0xc4] sm:$0xf0] }
 0x1e5   :  { %v462_v13 = vadd.f32 1e-05, %v461_v9  ;;  %v414_v46 = vadd.f32 %v411_v10, %v3877_v6  ;;  %v415_v45 = vadd.f32 %v412_v12, %v3882_v8  ;;  %v416_v59 = vadd.f32 %v413_v35, %v3898_v27  ;;  %v2873_v10 = vld [vmem:[%s4898_s6 + $0x40] sm:$0xf] }
 0x1e6   :  { %v3951_v51 = vadd.f32 %v339_v30, %v316_v7  ;;  %884 = vmatpush.bf16.msra.mxu1 %v3926_v11  ;;  %v3993_v9 = vor.u32 %v3210_v58, %v2881_v57  ;;  %v3206_v30 = vld [vmem:[%s4898_s6 + $0x34] sm:$0xf0]  ;;  %v4072_v53 = vor.u32 %v3224_v55, %v2937_v32  ;;  %v4083_v58 = vor.u32 %v3205_v44, %v2867_v49  ;;  %v2851_v55 = vld [vmem:[%s4898_s6 + $0x18] sm:$0xf0]  ;;  %v2923_v49 = vld [vmem:[%s4898_s6 + $0xa8] sm:$0xf0] }
 0x1e7   :  { %3320 = vrsqrt.f32 %v462_v13  ;;  %vm417_vm5 = vcmp.ge.f32.partialorder %v414_v46, 0.0  ;;  %vm418_vm6 = vcmp.ge.f32.partialorder %v415_v45, 0.0  ;;  %v420_v14 = vmul.f32 0.01, %v414_v46  ;;  %v3998_v12 = vpop.f32.mrf.mxu2 }
 0x1e8   :  { %v421_v16 = vmul.f32 0.01, %v415_v45  ;;  %vm469_vm8 = vweird.f32 %v462_v13  ;;  %vm419_vm10 = vcmp.ge.f32.partialorder %v416_v59, 0.0  ;;  %838 = vmatpush.bf16.msrb.mxu0 %v3993_v9  ;;  %v4077_v47 = vor.u32 %v3206_v30, %v2865_v29  ;;  %v2849_v29 = vld [vmem:[%s4898_s6 + $0x10] sm:$0xf] }
 0x1e9   :  { %v423_v17 = vsel %vm417_vm5, %v414_v46, %v420_v14  ;;  %v4003_v46 = vor.u32 %v3209_v62, %v2883_v63  ;;  %v3208_v14 = vld [vmem:[%s4898_s6 + $0x44] sm:$0xf0]  ;;  %v3202_v30 = vld [vmem:[%s4898_s6 + $0x14] sm:$0xf0] }
 0x1ea   :  { %v424_v18 = vsel %vm418_vm6, %v415_v45, %v421_v16  ;;  %885 = vmatpush.bf16.msra.mxu1 %v3954_v52  ;;  %v2945_v16 = vld [vmem:[%s4898_s6 + $0xd0] sm:$0xf] }
 0x1eb   :  { %v507_v19 = vpack.c.bf16 %v424_v18, %v423_v17  ;;  %v3226_v17 = vld [vmem:[%s4898_s6 + $0xd4] sm:$0xf0]  ;;  %v422_v18 = vmul.f32 0.01, %v416_v59 }
 0x1ed   :  { %v3321_v20 = vpop.eup %3320  ;;  %598 = vmatmul.bf16.vlgmr.msrb.gmra.mxu1 %v507_v19  ;;  %622 = vmatmul.bf16.vlgmr.msrb.gmra.mxu3 %v507_v19  ;;  %v425_v34 = vsel %vm419_vm10, %v416_v59, %v422_v18  ;;  %v3203_v18 = vld [vmem:[%s4898_s6 + $0x24] sm:$0xf] }
 0x1ee   :  { %v464_v21 = vmul.f32 %v3321_v20, %v462_v13  ;;  %vm470_vm7 = vweird.f32 %v3321_v20  ;;  %v4000_v13 = vpop.f32.mrf.mxu3  ;;  %886 = vmatpush.bf16.msra.mxu1 %v4003_v46 }
 0x1ef   :  { %vm3900_vm9 = vmor %vm469_vm8, %vm470_vm7 }
 0x1f0   :  { %v465_v22 = vmul.f32 %v3321_v20, %v464_v21  ;;  %v2947_v21 = vld [vmem:[%s4898_s6 + $0xd8] sm:$0xf0] }
 0x1f2   :  { %v466_v24 = vmul.f32 0.5, %v465_v22 }
 0x1f4   :  { %v467_v26 = vsub.f32 1.5, %v466_v24  ;;  %v3207_v24 = vld [vmem:[%s4898_s6 + $0x44] sm:$0xf] }
 0x1f6   :  { %v468_v41 = vmul.f32 %v3321_v20, %v467_v26  ;;  %v4034_v26 = vor.u32 %v3226_v17, %v2945_v16  ;;  %v344_v56 = vpop.f32.mrf.mxu3  ;;  %v2857_v16 = vld [vmem:[%s4898_s6 + $0x20] sm:$0xf]  ;;  %v3204_v17 = vld [vmem:[%s4898_s6 + $0x24] sm:$0xf0] }
 0x1f8   :  { %v472_v48 = vsel %vm3900_vm9, %v3321_v20, %v468_v41  ;;  %v3225_v20 = vld [vmem:[%s4898_s6 + $0xd4] sm:$0xf]  ;;  %v2939_v41 = vld [vmem:[%s4898_s6 + $0xc8] sm:$0xf0] }
 0x1f9   :  { %v473_v60 = vmul.f32 %v472_v48, %v3750_v31  ;;  %v3228_v31 = vld [vmem:[%s4898_s6 + $0xe4] sm:$0xf0]  ;;  %v474_v22 = vmul.f32 %v472_v48, %v3747_v37  ;;  %v475_v23 = vmul.f32 %v472_v48, %v3744_v36  ;;  %v4038_v37 = vor.u32 %v3208_v14, %v2873_v10  ;;  %v320_v48 = vpop.f32.mrf.mxu2 }
 0x1fa   :  { %v4005_v45 = vor.u32 %v3228_v31, %v2953_v2  ;;  %v4040_v36 = vor.u32 %v3225_v20, %v2947_v21  ;;  %v321_v57 = vadd.f32 %v320_v48, %v3905_v42  ;;  %v2859_v20 = vld [vmem:[%s4898_s6 + $0x28] sm:$0xf0]  ;;  %v2841_v48 = vld [vmem:[%s4898_s6] sm:$0xf] }
 0x1fb   :  { %v476_v5 = vmul.f32 %v473_v60, %v3865_v0  ;;  %v4007_v0 = vor.u32 %v3227_v3, %v2955_v4  ;;  %v477_v43 = vmul.f32 %v474_v22, %v3870_v1  ;;  %v478_v15 = vmul.f32 %v475_v23, %v3893_v25  ;;  %839 = vmatpush.bf16.msrb.mxu0 %v4038_v37  ;;  %v2929_v22 = vld [vmem:[%s4898_s6 + $0xb0] sm:$0xf]  ;;  %v3222_v23 = vld [vmem:[%s4898_s6 + $0xb4] sm:$0xf0] }
 0x1fc   :  { %861 = vmatpush.bf16.msrb.mxu2 %v4005_v45  ;;  %v4079_v1 = vor.u32 %v3223_v40, %v2939_v41  ;;  %v4088_v60 = vadd.f32 %v344_v56, %v321_v57  ;;  %v4114_v21 = vor.u32 %v3203_v18, %v2859_v20  ;;  %v2921_v41 = vld [vmem:[%s4898_s6 + $0xa0] sm:$0xf]  ;;  %v3200_v56 = vld [vmem:[%s4898_s6 + $0x4] sm:$0xf0]  ;;  %v3199_v57 = vld [vmem:[%s4898_s6 + $0x4] sm:$0xf] }
 0x1fd   :  { %v479_v19 = vadd.f32 %v476_v5, %v3877_v6  ;;  %v2875_v6 = vld [vmem:[%s4898_s6 + $0x48] sm:$0xf0]  ;;  %909 = vmatpush.bf16.msra.mxu3 %v4007_v0  ;;  %v480_v25 = vadd.f32 %v477_v43, %v3882_v8  ;;  %v481_v59 = vadd.f32 %v478_v15, %v3898_v27  ;;  %v3219_v43 = vld [vmem:[%s4898_s6 + $0xa4] sm:$0xf] }
 0x1fe   :  { %v4053_v39 = vor.u32 %v3207_v24, %v2875_v6  ;;  %v4095_v31 = vpop.f32.mrf.mxu3  ;;  %v3221_v24 = vld [vmem:[%s4898_s6 + $0xb4] sm:$0xf]  ;;  %v4126_v6 = vor.u32 %v3222_v23, %v2929_v22  ;;  %v4168_v15 = vor.u32 %v3219_v43, %v2923_v49  ;;  %v2907_v20 = vld [vmem:[%s4898_s6 + $0x88] sm:$0xf0] }
 0x1ff   :  { %vm482_vm11 = vcmp.ge.f32.partialorder %v479_v19, 0.0  ;;  %v485_v28 = vmul.f32 0.01, %v479_v19  ;;  %840 = vmatpush.bf16.msrb.mxu0 %v4077_v47  ;;  %v486_v62 = vmul.f32 0.01, %v480_v25  ;;  %vm483_vm12 = vcmp.ge.f32.partialorder %v480_v25, 0.0 }
 0x200   :  { %862 = vmatpush.bf16.msrb.mxu2 %v4034_v26  ;;  %887 = vmatpush.bf16.msra.mxu1 %v4053_v39  ;;  %v487_v63 = vmul.f32 0.01, %v481_v59  ;;  %vm484_vm13 = vcmp.ge.f32.partialorder %v481_v59, 0.0 }
 0x201   :  { %v488_v35 = vsel %vm482_vm11, %v479_v19, %v485_v28  ;;  %910 = vmatpush.bf16.msra.mxu3 %v4040_v36  ;;  %v4093_v2 = vpop.f32.mrf.mxu2  ;;  %v489_v3 = vsel %vm483_vm12, %v480_v25, %v486_v62  ;;  %v4109_v19 = vor.u32 %v3204_v17, %v2857_v16  ;;  %v2931_v28 = vld [vmem:[%s4898_s6 + $0xb8] sm:$0xf0]  ;;  %v4180_v25 = vor.u32 %v3200_v56, %v2841_v48  ;;  %v3216_v16 = vld [vmem:[%s4898_s6 + $0x84] sm:$0xf0]  ;;  %v3215_v17 = vld [vmem:[%s4898_s6 + $0x84] sm:$0xf] }
 0x202   :  { %v508_v7 = vpack.c.bf16 %v488_v35, %v425_v34  ;;  %v490_v8 = vsel %vm484_vm13, %v481_v59, %v487_v63  ;;  %v4138_v32 = vor.u32 %v3221_v24, %v2931_v28  ;;  %v4140_v34 = vor.u32 %v3202_v30, %v2849_v29  ;;  %v3201_v35 = vld [vmem:[%s4898_s6 + $0x14] sm:$0xf]  ;;  %v2843_v59 = vld [vmem:[%s4898_s6 + $0x8] sm:$0xf0]  ;;  %v2913_v63 = vld [vmem:[%s4898_s6 + $0x90] sm:$0xf] }
 0x203   :  { %v509_v4 = vpack.c.bf16 %v490_v8, %v489_v3  ;;  %841 = vmatpush.bf16.msrb.mxu0 %v4109_v19  ;;  %v4149_v40 = vor.u32 %v3201_v35, %v2851_v55  ;;  %v4186_v62 = vor.u32 %v3199_v57, %v2843_v59  ;;  %v3218_v3 = vld [vmem:[%s4898_s6 + $0x94] sm:$0xf0]  ;;  %v3217_v8 = vld [vmem:[%s4898_s6 + $0x94] sm:$0xf]  ;;  %v2910_v22 = vor.u32 %v3215_v17, %v2907_v20 }
 0x204   :  { %603 = vmatmul.bf16.gmra.mxu1 %v508_v7  ;;  %627 = vmatmul.bf16.gmra.mxu3 %v508_v7  ;;  %v3220_v7 = vld [vmem:[%s4898_s6 + $0xa4] sm:$0xf0] }
 0x205   :  { %863 = vmatpush.bf16.msrb.mxu2 %v4072_v53  ;;  %911 = vmatpush.bf16.msra.mxu3 %v4079_v1  ;;  %v4162_v44 = vor.u32 %v3220_v7, %v2921_v41 }
 0x206   :  { %888 = vmatpush.bf16.msra.mxu1 %v4083_v58  ;;  %v349_v10 = vpop.f32.mrf.mxu3 }
 0x207   :  { %842 = vmatpush.bf16.msrb.mxu0 %v4140_v34 }
 0x209   :  { %v325_v27 = vpop.f32.mrf.mxu2  ;;  %864 = vmatpush.bf16.msrb.mxu2 %v4126_v6  ;;  %912 = vmatpush.bf16.msra.mxu3 %v4138_v32 }
 0x20a   :  { %v326_v5 = vadd.f32 %v325_v27, %v3905_v42  ;;  %889 = vmatpush.bf16.msra.mxu1 %v4114_v21  ;;  %v2915_v27 = vld [vmem:[%s4898_s6 + $0x98] sm:$0xf0] }
 0x20b   :  { %843 = vmatpush.bf16.msrb.mxu0 %v4180_v25 }
 0x20c   :  { %v4098_v14 = vadd.f32 %v349_v10, %v326_v5  ;;  %v2918_v5 = vor.u32 %v3217_v8, %v2915_v27  ;;  %v2905_v10 = vld [vmem:[%s4898_s6 + $0x80] sm:$0xf] }
 0x20d   :  { %865 = vmatpush.bf16.msrb.mxu2 %v4162_v44  ;;  %913 = vmatpush.bf16.msra.mxu3 %v4168_v15  ;;  %v4214_v18 = vor.u32 %v3216_v16, %v2905_v10 }
 0x20e   :  { %890 = vmatpush.bf16.msra.mxu1 %v4149_v40  ;;  %v4220_v23 = vpop.f32.mrf.mxu3 }
 0x211   :  { %914 = vmatpush.bf16.msra.mxu3 %v2918_v5 }
 0x212   :  { %891 = vmatpush.bf16.msra.mxu1 %v4186_v62 }
 0x214   :  { %608 = vmatmul.bf16.gmra.mxu1 %v509_v4  ;;  %632 = vmatmul.bf16.gmra.mxu3 %v509_v4  ;;  %v4198_v4 = vor.u32 %v3218_v3, %v2913_v63 }
 0x215   :  { %915 = vmatpush.bf16.msra.mxu3 %v2910_v22 }
 0x216   :  { %866 = vmatpush.bf16.msrb.mxu2 %v4198_v4 }
 0x21a   :  { %867 = vmatpush.bf16.msrb.mxu2 %v4214_v18 }
 0x26a   :  { %v599_v24 = vpop.f32.mrf.mxu1 }
 0x270   :  { %v623_v28 = vpop.f32.mrf.mxu3 }
 0x272   :  { %v601_v29 = vpop.f32.mrf.mxu1 }
 0x273   :  { %v670_v30 = vpack.c.bf16 %v601_v29, %v599_v24  ;;  %v3233_v24 = vld [vmem:[%s4899_s7 + $0x10] sm:$0xff]  ;;  %v3409_v29 = vmov 0  }
 0x274   :  { %3267 = vset.pattern.permute.xlu1 %v3409_v29  ;;  %3266 = vset.pattern.permute.xlu0 %v3409_v29 }
 0x275   :  { %844 = vmatmul.bf16.vlgmr.msrb.gmra.mxu0 %v670_v30  ;;  %892 = vmatmul.bf16.vlgmr.msra.gmra.mxu1 %v670_v30 }
 0x276   :  { %3268 = vset.pattern.permute.xlu2 %v3409_v29 }
 0x278   :  { %v625_v35 = vpop.f32.mrf.mxu3 }
 0x279   :  { %v671_v55 = vpack.c.bf16 %v625_v35, %v623_v28  ;;  %v1097_v28 = vld [vmem:[%s4900_s8 + $0x8] sm:$0xff] }
 0x27a   :  { %1109 = vperm.xlu1 %3267, %v1097_v28  }
 0x27b   :  { %868 = vmatmul.bf16.vlgmr.msrb.gmra.mxu2 %v671_v55  ;;  %916 = vmatmul.bf16.vlgmr.msra.gmra.mxu3 %v671_v55 }
 0x281   :  { %v604_v41 = vpop.f32.mrf.mxu1 }
 0x287   :  { %v628_v7 = vpop.f32.mrf.mxu3 }
 0x289   :  { %v606_v43 = vpop.f32.mrf.mxu1 }
 0x28a   :  { %v672_v49 = vpack.c.bf16 %v606_v43, %v604_v41  ;;  %v1100_v43 = vld [vmem:[%s4900_s8 + $0x20] sm:$0xff] }
 0x28b   :  { %1124 = vperm.xlu1 %3267, %v1100_v43  }
 0x28c   :  { %849 = vmatmul.bf16.gmra.mxu0 %v672_v49  ;;  %897 = vmatmul.bf16.gmra.mxu1 %v672_v49 }
 0x28f   :  { %v630_v48 = vpop.f32.mrf.mxu3 }
 0x290   :  { %v673_v56 = vpack.c.bf16 %v630_v48, %v628_v7 }
 0x291   :  { %v609_v57 = vpop.f32.mrf.mxu1 }
 0x292   :  { %873 = vmatmul.bf16.gmra.mxu2 %v673_v56  ;;  %921 = vmatmul.bf16.gmra.mxu3 %v673_v56 }
 0x297   :  { %v633_v59 = vpop.f32.mrf.mxu3 }
 0x299   :  { %v611_v63 = vpop.f32.mrf.mxu1 }
 0x29a   :  { %v674_v3 = vpack.c.bf16 %v611_v63, %v609_v57 }
 0x29c   :  { %854 = vmatmul.bf16.gmra.mxu0 %v674_v3  ;;  %902 = vmatmul.bf16.gmra.mxu1 %v674_v3 }
 0x29d   :  { %1053 = vmatpush.bf16.msrb.mxu1 %v674_v3 }
 0x29f   :  { %v635_v8 = vpop.f32.mrf.mxu3 }
 0x2a0   :  { %v675_v27 = vpack.c.bf16 %v635_v8, %v633_v59 }
 0x2a1   :  { %1054 = vmatpush.bf16.msrb.mxu1 %v672_v49  ;;  %v1096_v49 = vld [vmem:[%s4900_s8] sm:$0xff] }
 0x2a2   :  { %878 = vmatmul.bf16.gmra.mxu2 %v675_v27  ;;  %926 = vmatmul.bf16.gmra.mxu3 %v675_v27 }
 0x2a3   :  { %1077 = vmatpush.bf16.msrb.mxu3 %v675_v27  ;;  %1104 = vperm.xlu0 %3266, %v1096_v49  }
 0x2a5   :  { %1055 = vmatpush.bf16.msrb.mxu1 %v670_v30 }
 0x2a7   :  { %1078 = vmatpush.bf16.msrb.mxu3 %v673_v56 }
 0x2a9   :  { %1198 = vmatpush.bf16.msra.mxu1 %v3926_v11  ;;  %v4236_v11 = vpop.f32.mrf.mxu2 }
 0x2ab   :  { %1079 = vmatpush.bf16.msrb.mxu3 %v671_v55 }
 0x2ad   :  { %1199 = vmatpush.bf16.msra.mxu1 %v3954_v52 }
 0x2af   :  { %1222 = vmatpush.bf16.msra.mxu3 %v3969_v61  ;;  %v3231_v61 = vld [vmem:[%s4899_s7] sm:$0xff] }
 0x2b0   :  { %3003 = vmatmul.msk.bf16.vlgmr.msrb.gmra.mxu1 %vm966_vm14, %v3231_v61 }
 0x2b1   :  { %1200 = vmatpush.bf16.msra.mxu1 %v4003_v46 }
 0x2b2   :  { %3006 = vmatmul.msk.bf16.vlgmr.msrb.gmra.mxu3 %vm966_vm14, %v3231_v61 }
 0x2b3   :  { %1223 = vmatpush.bf16.msra.mxu3 %v4007_v0 }
 0x2b5   :  { %1201 = vmatpush.bf16.msra.mxu1 %v4053_v39 }
 0x2b7   :  { %1224 = vmatpush.bf16.msra.mxu3 %v4040_v36 }
 0x2b9   :  { %1202 = vmatpush.bf16.msra.mxu1 %v4083_v58 }
 0x2bb   :  { %1225 = vmatpush.bf16.msra.mxu3 %v4079_v1 }
 0x2bd   :  { %1203 = vmatpush.bf16.msra.mxu1 %v4114_v21 }
 0x2bf   :  { %1226 = vmatpush.bf16.msra.mxu3 %v4138_v32 }
 0x2c1   :  { %1204 = vmatpush.bf16.msra.mxu1 %v4149_v40  ;;  %v3232_v40 = vld [vmem:[%s4899_s7 + $0x8] sm:$0xff] }
 0x2c2   :  { %3004 = vmatmul.msk.bf16.gmra.mxu1 %vm966_vm14, %v3232_v40  ;;  %3007 = vmatmul.msk.bf16.gmra.mxu3 %vm966_vm14, %v3232_v40 }
 0x2c3   :  { %1227 = vmatpush.bf16.msra.mxu3 %v4168_v15 }
 0x2c5   :  { %1205 = vmatpush.bf16.msra.mxu1 %v4186_v62 }
 0x2c7   :  { %1228 = vmatpush.bf16.msra.mxu3 %v2918_v5 }
 0x2cb   :  { %1229 = vmatpush.bf16.msra.mxu3 %v2910_v22 }
 0x2d2   :  { %3005 = vmatmul.msk.bf16.gmra.mxu1 %vm966_vm14, %v3233_v24  ;;  %3008 = vmatmul.msk.bf16.gmra.mxu3 %vm966_vm14, %v3233_v24 }
 0x2f2   :  { %v845_v52 = vpop.f32.mrf.mxu0  ;;  %v4245_v36 = vpop.f32.mrf.mxu1 }
 0x2fa   :  { %v847_v39 = vpop.f32.mrf.mxu0  ;;  %v895_v21 = vpop.f32.mrf.mxu1 }
 0x2fe   :  { %v869_v46 = vpop.f32.mrf.mxu2  ;;  %v4241_v0 = vpop.f32.mrf.mxu3 }
 0x2ff   :  { %v870_v24 = vadd.f32 %v869_v46, %v845_v52 }
 0x306   :  { %v871_v1 = vpop.f32.mrf.mxu2  ;;  %v919_v58 = vpop.f32.mrf.mxu3 }
 0x307   :  { %v872_v8 = vadd.f32 %v871_v1, %v847_v39  ;;  %v920_v52 = vadd.f32 %v919_v58, %v895_v21  ;;  %v1098_v1 = vld [vmem:[%s4900_s8 + $0x10] sm:$0xff]  ;;  %v1099_v58 = vld [vmem:[%s4900_s8 + $0x18] sm:$0xff]  ;;  %v3060_v21 = vld [vmem:[%s4900_s8 + $0x48] sm:$0xff] }
 0x308   :  { %1114 = vperm.xlu2 %3268, %v1098_v1  }
 0x309   :  { %v850_v32 = vpop.f32.mrf.mxu0  ;;  %v898_v5 = vpop.f32.mrf.mxu1  ;;  %v945_v29 = vpack.c.bf16 %v872_v8, %v870_v24 }
 0x310   :  { %1119 = vperm.xlu2 %3268, %v1099_v58  }
 0x311   :  { %v852_v10 = vpop.f32.mrf.mxu0  ;;  %v900_v20 = vpop.f32.mrf.mxu1 }
 0x315   :  { %v874_v15 = vpop.f32.mrf.mxu2  ;;  %v922_v62 = vpop.f32.mrf.mxu3 }
 0x316   :  { %v875_v63 = vadd.f32 %v874_v15, %v850_v32  ;;  %v3236_v32 = vld [vmem:[%s4899_s7 + $0x28] sm:$0xff]  ;;  %v923_v39 = vadd.f32 %v922_v62, %v898_v5  ;;  %v3057_v15 = vld [vmem:[%s4900_s8 + $0x30] sm:$0xff]  ;;  %v3058_v62 = vld [vmem:[%s4900_s8 + $0x38] sm:$0xff] }
 0x317   :  { %1419 = vperm.xlu1 %3267, %v3057_v15   ;;  %1424 = vperm.xlu0 %3266, %v3058_v62   ;;  %v3061_v5 = vld [vmem:[%s4900_s8 + $0x50] sm:$0xff] }
 0x319   :  { %v855_v22 = vpop.f32.mrf.mxu0  ;;  %v903_v55 = vpop.f32.mrf.mxu1 }
 0x31d   :  { %v876_v16 = vpop.f32.mrf.mxu2  ;;  %v924_v17 = vpop.f32.mrf.mxu3 }
 0x31e   :  { %v877_v57 = vadd.f32 %v876_v16, %v852_v10  ;;  %v925_v33 = vadd.f32 %v924_v17, %v900_v20  ;;  %v3234_v10 = vld [vmem:[%s4899_s7 + $0x18] sm:$0xff]  ;;  %v1105_v16 = vpop.permute.xlu0 %1104 }
 0x31f   :  { %1434 = vperm.xlu1 %3267, %v3060_v21   ;;  %1439 = vperm.xlu0 %3266, %v3061_v5  }
 0x320   :  { %v947_v27 = vpack.c.bf16 %v877_v57, %v875_v63  ;;  %v948_v46 = vpack.c.bf16 %v925_v33, %v923_v39  ;;  %v918_v33 = vadd.f32 %v4241_v0, %v4245_v36 }
 0x321   :  { %v857_v41 = vpop.f32.mrf.mxu0  ;;  %v905_v61 = vpop.f32.mrf.mxu1 }
 0x325   :  { %v879_v30 = vpop.f32.mrf.mxu2  ;;  %v927_v35 = vpop.f32.mrf.mxu3 }
 0x326   :  { %v880_v48 = vadd.f32 %v879_v30, %v855_v22  ;;  %v928_v28 = vadd.f32 %v927_v35, %v903_v55 }
 0x32d   :  { %v881_v7 = vpop.f32.mrf.mxu2  ;;  %v929_v3 = vpop.f32.mrf.mxu3 }
 0x32e   :  { %v882_v56 = vadd.f32 %v881_v7, %v857_v41  ;;  %v930_v40 = vadd.f32 %v929_v3, %v905_v61 }
 0x330   :  { %v949_v59 = vpack.c.bf16 %v882_v56, %v880_v48  ;;  %v950_v22 = vpack.c.bf16 %v930_v40, %v928_v28 }
 0x332   :  { %981 = vmatpush.bf16.msra.mxu0 %v949_v59  ;;  %3251 = vmatpush.bf16.msra.mxu2 %v949_v59 }
 0x336   :  { %982 = vmatpush.bf16.msra.mxu0 %v947_v27  ;;  %3252 = vmatpush.bf16.msra.mxu2 %v947_v27 }
 0x33a   :  { %983 = vmatpush.bf16.msra.mxu0 %v945_v29  ;;  %3253 = vmatpush.bf16.msra.mxu2 %v945_v29 }
 0x33d   :  { %2985 = vmatmul.msk.bf16.vlgmr.msra.gmra.mxu0 %vm966_vm14, %v3234_v10  ;;  %2987 = vmatmul.msk.bf16.vlgmr.msra.gmra.mxu2 %vm966_vm14, %v3236_v32 }
 0x33e   :  { %1005 = vmatpush.bf16.msrb.mxu2 %v950_v22  ;;  %1150 = vmatpush.bf16.msrb.mxu0 %v3914_v38  ;;  %v946_v38 = vpack.c.bf16 %v920_v52, %v918_v33 }
 0x342   :  { %1006 = vmatpush.bf16.msrb.mxu2 %v948_v46  ;;  %1151 = vmatpush.bf16.msrb.mxu0 %v3938_v50  ;;  %v3235_v50 = vld [vmem:[%s4899_s7 + $0x20] sm:$0xff] }
 0x346   :  { %1007 = vmatpush.bf16.msrb.mxu2 %v946_v38  ;;  %1152 = vmatpush.bf16.msrb.mxu0 %v3993_v9  ;;  %v3059_v9 = vld [vmem:[%s4900_s8 + $0x40] sm:$0xff] }
 0x34a   :  { %1174 = vmatpush.bf16.msra.mxu2 %v3956_v54  ;;  %1153 = vmatpush.bf16.msrb.mxu0 %v4038_v37  ;;  %v1101_v54 = vld [vmem:[%s4900_s8 + $0x28] sm:$0xff] }
 0x34b   :  { %1129 = vperm.xlu2 %3268, %v1101_v54  }
 0x34d   :  { %2986 = vmatmul.msk.bf16.gmra.mxu0 %vm966_vm14, %v3235_v50  ;;  %2988 = vmatmul.msk.bf16.vlgmr.msrb.gmra.mxu2 %vm966_vm14, %v3234_v10 }
 0x34e   :  { %1175 = vmatpush.bf16.msra.mxu2 %v4005_v45  ;;  %1154 = vmatpush.bf16.msrb.mxu0 %v4077_v47  ;;  %v3062_v45 = vld [vmem:[%s4900_s8 + $0x58] sm:$0xff] }
 0x352   :  { %1176 = vmatpush.bf16.msra.mxu2 %v4034_v26  ;;  %1155 = vmatpush.bf16.msrb.mxu0 %v4109_v19  ;;  %v1057_v26 = vpop.f32.mrf.mxu1 }
 0x353   :  { %1429 = vperm.xlu2 %3268, %v3059_v9  }
 0x356   :  { %1177 = vmatpush.bf16.msra.mxu2 %v4072_v53  ;;  %1156 = vmatpush.bf16.msrb.mxu0 %v4140_v34 }
 0x35a   :  { %1178 = vmatpush.bf16.msra.mxu2 %v4126_v6  ;;  %1157 = vmatpush.bf16.msrb.mxu0 %v4180_v25  ;;  %v1059_v37 = vpop.f32.mrf.mxu1 }
 0x35b   :  { %1444 = vperm.xlu2 %3268, %v3062_v45  }
 0x35d   :  { %2989 = vmatmul.msk.bf16.gmra.mxu2 %vm966_vm14, %v3235_v50 }
 0x35e   :  { %1179 = vmatpush.bf16.msra.mxu2 %v4162_v44  ;;  %v1110_v44 = vpop.permute.xlu1 %1109 }
 0x362   :  { %1180 = vmatpush.bf16.msra.mxu2 %v4198_v4  ;;  %v1062_v53 = vpop.f32.mrf.mxu1  ;;  %v1115_v19 = vpop.permute.xlu2 %1114 }
 0x366   :  { %1181 = vmatpush.bf16.msra.mxu2 %v4214_v18  ;;  %v1081_v18 = vpop.f32.mrf.mxu3  ;;  %v1125_v41 = vpop.permute.xlu1 %1124 }
 0x36a   :  { %v1064_v47 = vpop.f32.mrf.mxu1  ;;  %v1120_v25 = vpop.permute.xlu2 %1119 }
 0x36d   :  { %2990 = vmatmul.msk.bf16.gmra.mxu2 %vm966_vm14, %v3236_v32 }
 0x36e   :  { %v1083_v27 = vpop.f32.mrf.mxu3 }
 0x372   :  { %v1067_v34 = vpop.f32.mrf.mxu1 }
 0x376   :  { %v1086_v39 = vpop.f32.mrf.mxu3 }
 0x37a   :  { %v1069_v35 = vpop.f32.mrf.mxu1 }
 0x37e   :  { %v1088_v62 = vpop.f32.mrf.mxu3 }
 0x386   :  { %v1091_v54 = vpop.f32.mrf.mxu3 }
 0x3a5   :  { %v1130_v49 = vpop.permute.xlu2 %1129 }
 0x3ba   :  { %v985_v6 = vpop.f32.mrf.mxu0 }
 0x3bb   :  { %v1058_v0 = vadd.f32 %v1057_v26, %v985_v6  ;;  %v1093_v26 = vpop.f32.mrf.mxu3 }
 0x3bd   :  { %v1132_v20 = vadd.f32 %v1105_v16, %v1058_v0 }
 0x3c0   :  { %v995_v36 = vpop.f32.mrf.mxu2 }
 0x3c1   :  { %v1068_v55 = vadd.f32 %v1067_v34, %v995_v36 }
 0x3c2   :  { %v987_v4 = vpop.f32.mrf.mxu0 }
 0x3c3   :  { %v1060_v17 = vadd.f32 %v1059_v37, %v987_v4  ;;  %v1140_v57 = vadd.f32 %v1125_v41, %v1068_v55 }
 0x3c5   :  { %v1134_v30 = vadd.f32 %v1110_v44, %v1060_v17 }
 0x3c7   :  { %v1144_v7 = vpack.c.bf16 %v1134_v30, %v1132_v20 }
 0x3c8   :  { %v997_v43 = vpop.f32.mrf.mxu2 }
 0x3c9   :  { %v1070_v48 = vadd.f32 %v1069_v35, %v997_v43  ;;  %1158 = vmatmul.bf16.vlgmr.msrb.gmra.mxu0 %v1144_v7  ;;  %1206 = vmatmul.bf16.vlgmr.msra.gmra.mxu1 %v1144_v7  ;;  %v3237_v35 = vld [vmem:[%s4899_s7 + $0x30] sm:$0xff] }
 0x3ca   :  { %v990_v56 = vpop.f32.mrf.mxu0 }
 0x3cb   :  { %v1142_v59 = vadd.f32 %v1130_v49, %v1070_v48  ;;  %v1063_v3 = vadd.f32 %v1062_v53, %v990_v56  ;;  %v3238_v48 = vld [vmem:[%s4899_s7 + $0x38] sm:$0xff] }
 0x3cd   :  { %v1148_v63 = vpack.c.bf16 %v1142_v59, %v1140_v57  ;;  %v1136_v40 = vadd.f32 %v1115_v19, %v1063_v3 }
 0x3cf   :  { %1367 = vmatpush.bf16.msrb.mxu1 %v1148_v63 }
 0x3d0   :  { %v1009_v8 = vpop.f32.mrf.mxu2 }
 0x3d1   :  { %v1082_v29 = vadd.f32 %v1081_v18, %v1009_v8 }
 0x3d2   :  { %v992_v61 = vpop.f32.mrf.mxu0 }
 0x3d3   :  { %v1065_v24 = vadd.f32 %v1064_v47, %v992_v61  ;;  %v1133_v52 = vadd.f32 %v1105_v16, %v1082_v29 }
 0x3d5   :  { %v1138_v28 = vadd.f32 %v1120_v25, %v1065_v24 }
 0x3d7   :  { %v1146_v22 = vpack.c.bf16 %v1138_v28, %v1136_v40 }
 0x3d8   :  { %v1011_v10 = vpop.f32.mrf.mxu2 }
 0x3d9   :  { %v1084_v32 = vadd.f32 %v1083_v27, %v1011_v10  ;;  %1163 = vmatmul.bf16.gmra.mxu0 %v1146_v22  ;;  %1211 = vmatmul.bf16.gmra.mxu1 %v1146_v22 }
 0x3da   :  { %1368 = vmatpush.bf16.msrb.mxu1 %v1146_v22 }
 0x3db   :  { %v1135_v46 = vadd.f32 %v1110_v44, %v1084_v32 }
 0x3dd   :  { %v1145_v1 = vpack.c.bf16 %v1135_v46, %v1133_v52  ;;  %v3239_v52 = vld [vmem:[%s4899_s7 + $0x40] sm:$0xff] }
 0x3de   :  { %1369 = vmatpush.bf16.msrb.mxu1 %v1144_v7 }
 0x3df   :  { %1182 = vmatmul.bf16.vlgmr.msra.gmra.mxu2 %v1145_v1  ;;  %1230 = vmatmul.bf16.vlgmr.msra.gmra.mxu3 %v1145_v1 }
 0x3e0   :  { %v1014_v15 = vpop.f32.mrf.mxu2 }
 0x3e1   :  { %v1087_v33 = vadd.f32 %v1086_v39, %v1014_v15 }
 0x3e3   :  { %v1137_v21 = vadd.f32 %v1115_v19, %v1087_v33 }
 0x3e8   :  { %v1016_v38 = vpop.f32.mrf.mxu2 }
 0x3e9   :  { %v1089_v58 = vadd.f32 %v1088_v62, %v1016_v38  ;;  %1168 = vmatmul.bf16.gmra.mxu0 %v1148_v63  ;;  %1216 = vmatmul.bf16.gmra.mxu1 %v1148_v63 }
 0x3eb   :  { %v1139_v5 = vadd.f32 %v1120_v25, %v1089_v58 }
 0x3ed   :  { %v1147_v50 = vpack.c.bf16 %v1139_v5, %v1137_v21 }
 0x3ef   :  { %1187 = vmatmul.bf16.gmra.mxu2 %v1147_v50  ;;  %1235 = vmatmul.bf16.gmra.mxu3 %v1147_v50 }
 0x3f0   :  { %v1019_v9 = vpop.f32.mrf.mxu2 }
 0x3f1   :  { %v1092_v45 = vadd.f32 %v1091_v54, %v1019_v9  ;;  %v3240_v54 = vld [vmem:[%s4899_s7 + $0x48] sm:$0xff]  ;;  %v3241_v9 = vld [vmem:[%s4899_s7 + $0x50] sm:$0xff] }
 0x3f3   :  { %v1141_v47 = vadd.f32 %v1125_v41, %v1092_v45  ;;  %v3242_v45 = vld [vmem:[%s4899_s7 + $0x58] sm:$0xff] }
 0x3f8   :  { %v1021_v37 = vpop.f32.mrf.mxu2 }
 0x3f9   :  { %v1094_v53 = vadd.f32 %v1093_v26, %v1021_v37  ;;  %3051 = vmatmul.msk.bf16.vlgmr.msrb.gmra.mxu1 %vm966_vm14, %v3237_v35  ;;  %v3250_v26 = vld [vmem:[%s4901_s9 + $0x38] sm:$0xff]  ;;  %v3249_v37 = vld [vmem:[%s4901_s9 + $0x30] sm:$0xff] }
 0x3fb   :  { %v1143_v6 = vadd.f32 %v1130_v49, %v1094_v53 }
 0x3fd   :  { %v1149_v34 = vpack.c.bf16 %v1143_v6, %v1141_v47  ;;  %v3248_v47 = vld [vmem:[%s4901_s9 + $0x28] sm:$0xff]  ;;  %v3247_v6 = vld [vmem:[%s4901_s9 + $0x20] sm:$0xff] }
 0x3ff   :  { %1192 = vmatmul.bf16.gmra.mxu2 %v1149_v34  ;;  %1240 = vmatmul.bf16.gmra.mxu3 %v1149_v34 }
 0x400   :  { %1391 = vmatpush.bf16.msrb.mxu3 %v1149_v34 }
 0x404   :  { %1392 = vmatpush.bf16.msrb.mxu3 %v1147_v50 }
 0x408   :  { %1393 = vmatpush.bf16.msrb.mxu3 %v1145_v1 }
 0x409   :  { %3052 = vmatmul.msk.bf16.gmra.mxu1 %vm966_vm14, %v3238_v48 }
 0x40f   :  { %3054 = vmatmul.msk.bf16.vlgmr.msrb.gmra.mxu3 %vm966_vm14, %v3237_v35 }
 0x419   :  { %3053 = vmatmul.msk.bf16.gmra.mxu1 %vm966_vm14, %v3239_v52 }
 0x41f   :  { %3055 = vmatmul.msk.bf16.gmra.mxu3 %vm966_vm14, %v3238_v48 }
 0x42f   :  { %3056 = vmatmul.msk.bf16.gmra.mxu3 %vm966_vm14, %v3239_v52 }
 0x446   :  { %v1159_v44 = vpop.f32.mrf.mxu0  ;;  %v1207_v19 = vpop.f32.mrf.mxu1 }
 0x44e   :  { %v1161_v25 = vpop.f32.mrf.mxu0  ;;  %v1209_v0 = vpop.f32.mrf.mxu1 }
 0x456   :  { %v1164_v20 = vpop.f32.mrf.mxu0  ;;  %v1212_v30 = vpop.f32.mrf.mxu1 }
 0x45e   :  { %v1166_v41 = vpop.f32.mrf.mxu0  ;;  %v1214_v7 = vpop.f32.mrf.mxu1 }
 0x462   :  { %v1183_v36 = vpop.f32.mrf.mxu2  ;;  %v1231_v16 = vpop.f32.mrf.mxu3 }
 0x463   :  { %v1184_v58 = vadd.f32 %v1183_v36, %v1159_v44  ;;  %v1232_v21 = vadd.f32 %v1231_v16, %v1207_v19  ;;  %v3246_v19 = vld [vmem:[%s4901_s9 + $0x18] sm:$0xff]  ;;  %v3245_v16 = vld [vmem:[%s4901_s9 + $0x10] sm:$0xff] }
 0x466   :  { %v1169_v56 = vpop.f32.mrf.mxu0  ;;  %v1217_v57 = vpop.f32.mrf.mxu1 }
 0x46a   :  { %v1185_v4 = vpop.f32.mrf.mxu2  ;;  %v1233_v17 = vpop.f32.mrf.mxu3 }
 0x46b   :  { %v1186_v15 = vadd.f32 %v1185_v4, %v1161_v25  ;;  %v1234_v62 = vadd.f32 %v1233_v17, %v1209_v0  ;;  %v1420_v0 = vpop.permute.xlu1 %1419 }
 0x46d   :  { %v1260_v5 = vpack.c.bf16 %v1186_v15, %v1184_v58  ;;  %v1261_v50 = vpack.c.bf16 %v1234_v62, %v1232_v21 }
 0x46e   :  { %v1171_v3 = vpop.f32.mrf.mxu0  ;;  %v1219_v8 = vpop.f32.mrf.mxu1 }
 0x472   :  { %v1188_v18 = vpop.f32.mrf.mxu2  ;;  %v1236_v55 = vpop.f32.mrf.mxu3 }
 0x473   :  { %v1189_v46 = vadd.f32 %v1188_v18, %v1164_v20  ;;  %v1237_v1 = vadd.f32 %v1236_v55, %v1212_v30  ;;  %v3244_v30 = vld [vmem:[%s4901_s9 + $0x8] sm:$0xff] }
 0x476   :  { %v1371_v18 = vpop.f32.mrf.mxu1 }
 0x47a   :  { %v1190_v43 = vpop.f32.mrf.mxu2  ;;  %v1238_v49 = vpop.f32.mrf.mxu3 }
 0x47b   :  { %v1191_v22 = vadd.f32 %v1190_v43, %v1166_v41  ;;  %v1239_v10 = vadd.f32 %v1238_v49, %v1214_v7  ;;  %v1425_v41 = vpop.permute.xlu0 %1424  ;;  %v3243_v49 = vld [vmem:[%s4901_s9] sm:$0xff]  ;;  %s3410_s9 = smov 104  }
 0x47d   :  { %v1262_v33 = vpack.c.bf16 %v1191_v22, %v1189_v46  ;;  %v1263_v38 = vpack.c.bf16 %v1239_v10, %v1237_v1  ;;  %v4390_v1 = vpop.permute.xlu1 %1434 }
 0x482   :  { %v1193_v59 = vpop.f32.mrf.mxu2  ;;  %v1241_v63 = vpop.f32.mrf.mxu3 }
 0x483   :  { %v1194_v40 = vadd.f32 %v1193_v59, %v1169_v56  ;;  %v1242_v24 = vadd.f32 %v1241_v63, %v1217_v57 }
 0x48a   :  { %v1195_v27 = vpop.f32.mrf.mxu2  ;;  %v1243_v61 = vpop.f32.mrf.mxu3 }
 0x48b   :  { %v1196_v28 = vadd.f32 %v1195_v27, %v1171_v3  ;;  %v1244_v29 = vadd.f32 %v1243_v61, %v1219_v8  ;;  %v4382_v8 = vpop.permute.xlu2 %1429  ;;  %v1373_v61 = vpop.f32.mrf.mxu1 }
 0x48d   :  { %v1264_v32 = vpack.c.bf16 %v1196_v28, %v1194_v40  ;;  %v1265_v39 = vpack.c.bf16 %v1244_v29, %v1242_v24 }
 0x48f   :  { %1295 = vmatpush.bf16.msra.mxu0 %v1264_v32  ;;  %1319 = vmatpush.bf16.msrb.mxu2 %v1265_v39 }
 0x492   :  { %v1395_v53 = vpop.f32.mrf.mxu3 }
 0x493   :  { %1296 = vmatpush.bf16.msra.mxu0 %v1262_v33  ;;  %1320 = vmatpush.bf16.msrb.mxu2 %v1263_v38  ;;  %v4396_v21 = vpop.f32.mrf.mxu1 }
 0x497   :  { %1297 = vmatpush.bf16.msra.mxu0 %v1260_v5  ;;  %1321 = vmatpush.bf16.msrb.mxu2 %v1261_v50 }
 0x49a   :  { %3033 = vmatmul.msk.bf16.vlgmr.msra.gmra.mxu0 %vm966_vm14, %v3240_v54  ;;  %3036 = vmatmul.msk.bf16.vlgmr.msrb.gmra.mxu2 %vm966_vm14, %v3240_v54  ;;  %v1397_v44 = vpop.f32.mrf.mxu3 }
 0x49b   :  { %1664 = vmatpush.bf16.msrb.mxu0 %v3250_v26 }
 0x49f   :  { %1665 = vmatpush.bf16.msrb.mxu0 %v3249_v37 }
 0x4a2   :  { %v1400_v7 = vpop.f32.mrf.mxu3 }
 0x4a3   :  { %1666 = vmatpush.bf16.msrb.mxu0 %v3248_v47 }
 0x4a7   :  { %1667 = vmatpush.bf16.msrb.mxu0 %v3247_v6 }
 0x4aa   :  { %3034 = vmatmul.msk.bf16.gmra.mxu0 %vm966_vm14, %v3241_v9  ;;  %3037 = vmatmul.msk.bf16.gmra.mxu2 %vm966_vm14, %v3241_v9  ;;  %v1402_v24 = vpop.f32.mrf.mxu3 }
 0x4ab   :  { %1668 = vmatpush.bf16.msrb.mxu0 %v3246_v19  ;;  %v4402_v19 = vpop.permute.xlu0 %1439 }
 0x4af   :  { %1669 = vmatpush.bf16.msrb.mxu0 %v3245_v16 }
 0x4b2   :  { %v1405_v54 = vpop.f32.mrf.mxu3 }
 0x4b3   :  { %1670 = vmatpush.bf16.msrb.mxu0 %v3244_v30 }
 0x4b7   :  { %1671 = vmatpush.bf16.msrb.mxu0 %v3243_v49 }
 0x4ba   :  { %3035 = vmatmul.msk.bf16.gmra.mxu0 %vm966_vm14, %v3242_v45  ;;  %3038 = vmatmul.msk.bf16.gmra.mxu2 %vm966_vm14, %v3242_v45 }
 0x517   :  { %v1299_v35 = vpop.f32.mrf.mxu0 }
 0x518   :  { %v1372_v33 = vadd.f32 %v1371_v18, %v1299_v35 }
 0x51a   :  { %v1447_v37 = vadd.f32 %v1420_v0, %v1372_v33 }
 0x51c   :  { %vm1573_vm1 = vcmp.ge.f32.partialorder %v1447_v37, 0.0 }
 0x51d   :  { %v1323_v34 = vpop.f32.mrf.mxu2 }
 0x51e   :  { %v1396_v25 = vadd.f32 %v1395_v53, %v1323_v34 }
 0x51f   :  { %v1301_v27 = vpop.f32.mrf.mxu0 }
 0x520   :  { %v1448_v36 = vadd.f32 %v1420_v0, %v1396_v25  ;;  %v1374_v50 = vadd.f32 %v1373_v61, %v1301_v27 }
 0x522   :  { %v1459_v4 = vsub.f32 0.0, %v1448_v36  ;;  %v1449_v36 = vadd.f32 %v1425_v41, %v1374_v50 }
 0x524   :  { %v1465_v17 = vmul.f32 1.442695, %v1459_v4  ;;  %vm1574_vm4 = vcmp.ge.f32.partialorder %v1449_v36, 0.0 }
 0x525   :  { %v1325_v20 = vpop.f32.mrf.mxu2 }
 0x526   :  { %3322 = vpow2.f32 %v1465_v17  ;;  %v1398_v55 = vadd.f32 %v1397_v44, %v1325_v20 }
 0x527   :  { %v4394_v58 = vpop.f32.mrf.mxu0 }
 0x528   :  { %v1450_v43 = vadd.f32 %v1425_v41, %v1398_v55  ;;  %v1579_v41 = vmul.f32 0.01, %v1447_v37 }
 0x52a   :  { %v1460_v48 = vsub.f32 0.0, %v1450_v43  ;;  %v1580_v43 = vmul.f32 0.01, %v1449_v36 }
 0x52c   :  { %v3323_v56 = vpop.eup %3322  ;;  %v1467_v57 = vmul.f32 1.442695, %v1460_v48 }
 0x52d   :  { %v4380_v59 = vadd.f32 1.0, %v3323_v56  ;;  %v1328_v63 = vpop.f32.mrf.mxu2  ;;  %v1378_v56 = vpop.f32.mrf.mxu1 }
 0x52e   :  { %3324 = vpow2.f32 %v1467_v57  ;;  %v1401_v3 = vadd.f32 %v1400_v7, %v1328_v63 }
 0x52f   :  { %3326 = vrcp.f32 %v4380_v59  ;;  %v1494_v25 = vand.u32 2147483648, %v4380_v59  ;;  %vm1488_vm0 = vweird.f32 %v4380_v59  ;;  %v1492_v4 = vand.u32 2147483647, %v4380_v59  ;;  %v1306_v48 = vpop.f32.mrf.mxu0 }
 0x530   :  { %v1452_v40 = vadd.f32 %v4382_v8, %v1401_v3 }
 0x531   :  { %v1495_v7 = vor.u32 1.1754944e-38, %v1494_v25  ;;  %vm1493_vm6 = vcmp.eq.f32.partialorder %v1492_v4, 8.507059e+37 }
 0x532   :  { %v1461_v28 = vsub.f32 0.0, %v1452_v40  ;;  %v1407_v40 = vpop.f32.mrf.mxu3 }
 0x534   :  { %v3325_v29 = vpop.eup %3324  ;;  %v1469_v22 = vmul.f32 1.442695, %v1461_v28 }
 0x535   :  { %v4386_v10 = vpop.eup %3326  ;;  %v1478_v32 = vadd.f32 1.0, %v3325_v29  ;;  %v1330_v39 = vpop.f32.mrf.mxu2 }
 0x536   :  { %v1484_v52 = vmul.f32 %v4386_v10, %v4380_v59  ;;  %3328 = vpow2.f32 %v1469_v22  ;;  %v1403_v46 = vadd.f32 %v1402_v24, %v1330_v39  ;;  %vm1489_vm15 = vweird.f32 %v4386_v10  ;;  %v1381_v25 = vpop.f32.mrf.mxu1 }
 0x537   :  { %3330 = vrcp.f32 %v1478_v32  ;;  %vm4411_vm2 = vmor %vm1488_vm0, %vm1489_vm15  ;;  %v1509_v20 = vand.u32 2147483648, %v1478_v32  ;;  %v1507_v30 = vand.u32 2147483647, %v1478_v32  ;;  %vm1503_vm5 = vweird.f32 %v1478_v32 }
 0x538   :  { %v1485_v15 = vsub.f32 1.0, %v1484_v52  ;;  %v1454_v62 = vadd.f32 %v4390_v1, %v1403_v46  ;;  %v1585_v39 = vsel %vm1573_vm1, %v1447_v37, %v1579_v41  ;;  %v1586_v52 = vsel %vm1574_vm4, %v1449_v36, %v1580_v43 }
 0x539   :  { %v1510_v27 = vor.u32 1.1754944e-38, %v1509_v20  ;;  %vm1508_vm8 = vcmp.eq.f32.partialorder %v1507_v30, 8.507059e+37 }
 0x53a   :  { %v1486_v38 = vmul.f32 %v4386_v10, %v1485_v15  ;;  %v1462_v5 = vsub.f32 0.0, %v1454_v62 }
 0x53c   :  { %v3329_v9 = vpop.eup %3328  ;;  %v1471_v45 = vmul.f32 1.442695, %v1462_v5  ;;  %v1487_v44 = vadd.f32 %v4386_v10, %v1486_v38  ;;  %v1377_v5 = vadd.f32 %v4396_v21, %v4394_v58 }
 0x53d   :  { %v3331_v26 = vpop.eup %3330  ;;  %v4399_v53 = vadd.f32 1.0, %v3329_v9  ;;  %v1333_v47 = vpop.f32.mrf.mxu2 }
 0x53e   :  { %v1499_v6 = vmul.f32 %v3331_v26, %v1478_v32  ;;  %3332 = vpow2.f32 %v1471_v45  ;;  %v1406_v34 = vadd.f32 %v1405_v54, %v1333_v47  ;;  %vm1504_vm3 = vweird.f32 %v3331_v26  ;;  %v4431_v32 = vpop.permute.xlu2 %1444 }
 0x53f   :  { %3334 = vrcp.f32 %v4399_v53  ;;  %v1491_v55 = vsel %vm4411_vm2, %v4386_v10, %v1487_v44  ;;  %vm4421_vm7 = vmor %vm1503_vm5, %vm1504_vm3  ;;  %v1379_v45 = vadd.f32 %v1378_v56, %v1306_v48  ;;  %v1309_v44 = vpop.f32.mrf.mxu0  ;;  %vm1518_vm10 = vweird.f32 %v4399_v53 }
 0x540   :  { %v1500_v0 = vsub.f32 1.0, %v1499_v6  ;;  %v1456_v16 = vadd.f32 %v4402_v19, %v1406_v34  ;;  %v1496_v28 = vsel %vm1493_vm6, %v1495_v7, %v1491_v55  ;;  %v1451_v6 = vadd.f32 %v4382_v8, %v1377_v5 }
 0x541   :  { %v1591_v62 = vmul.f32 %v1585_v39, %v1496_v28  ;;  %v1453_v36 = vadd.f32 %v4390_v1, %v1379_v45  ;;  %v1522_v8 = vand.u32 2147483647, %v4399_v53  ;;  %v1382_v55 = vadd.f32 %v1381_v25, %v1309_v44  ;;  %v1383_v28 = vpop.f32.mrf.mxu1 }
 0x542   :  { %v1501_v35 = vmul.f32 %v3331_v26, %v1500_v0  ;;  %v1463_v18 = vsub.f32 0.0, %v1456_v16  ;;  %v1524_v0 = vand.u32 2147483648, %v4399_v53  ;;  %v1581_v4 = vmul.f32 0.01, %v1451_v6 }
 0x543   :  { %vm1575_vm13 = vcmp.ge.f32.partialorder %v1451_v6, 0.0  ;;  %vm1576_vm15 = vcmp.ge.f32.partialorder %v1453_v36, 0.0  ;;  %vm1523_vm0 = vcmp.eq.f32.partialorder %v1522_v8, 8.507059e+37  ;;  %v1455_v3 = vadd.f32 %v4402_v19, %v1382_v55 }
 0x544   :  { %v3333_v49 = vpop.eup %3332  ;;  %v1473_v57 = vmul.f32 1.442695, %v1463_v18  ;;  %v1502_v59 = vadd.f32 %v3331_v26, %v1501_v35  ;;  %v1582_v18 = vmul.f32 0.01, %v1453_v36 }
 0x545   :  { %v4418_v63 = vpop.eup %3334  ;;  %v4425_v61 = vadd.f32 1.0, %v3333_v49  ;;  %v1335_v24 = vpop.f32.mrf.mxu2  ;;  %vm1577_vm5 = vcmp.ge.f32.partialorder %v1455_v3, 0.0 }
 0x546   :  { %3336 = vpow2.f32 %v1473_v57  ;;  %v1408_v29 = vadd.f32 %v1407_v40, %v1335_v24  ;;  %v1506_v22 = vsel %vm4421_vm7, %v3331_v26, %v1502_v59  ;;  %v1514_v10 = vmul.f32 %v4418_v63, %v4399_v53 }
 0x547   :  { %3338 = vrcp.f32 %v4425_v61  ;;  %v1511_v46 = vsel %vm1508_vm8, %v1510_v27, %v1506_v22  ;;  %vm1519_vm9 = vweird.f32 %v4418_v63  ;;  %v1539_v20 = vand.u32 2147483648, %v4425_v61  ;;  %v1311_v24 = vpop.f32.mrf.mxu0 }
 0x548   :  { %v1458_v15 = vadd.f32 %v4431_v32, %v1408_v29  ;;  %v1592_v33 = vmul.f32 %v1586_v52, %v1511_v46  ;;  %v1515_v38 = vsub.f32 1.0, %v1514_v10  ;;  %vm4454_vm11 = vmor %vm1518_vm10, %vm1519_vm9  ;;  %v1537_v35 = vand.u32 2147483647, %v4425_v61 }
 0x549   :  { %v1525_v53 = vor.u32 1.1754944e-38, %v1524_v0  ;;  %vm1533_vm1 = vweird.f32 %v4425_v61  ;;  %v1540_v56 = vor.u32 1.1754944e-38, %v1539_v20  ;;  %v1587_v59 = vsel %vm1575_vm13, %v1451_v6, %v1581_v4 }
 0x54a   :  { %v1464_v50 = vsub.f32 0.0, %v1458_v15  ;;  %v4439_v54 = vpack.c.bf16 %v1592_v33, %v1591_v62  ;;  %v1516_v9 = vmul.f32 %v4418_v63, %v1515_v38  ;;  %vm1538_vm3 = vcmp.eq.f32.partialorder %v1537_v35, 8.507059e+37 }
 0x54b   :  { %v1588_v40 = vsel %vm1576_vm15, %v1453_v36, %v1582_v18  ;;  %v1583_v46 = vmul.f32 0.01, %v1455_v3  ;;  %v1384_v15 = vadd.f32 %v1383_v28, %v1311_v24  ;;  %vm2446_vm15 = vcmask 1043456   ;;  %v1831_v28 = vld [vmem:[%s4902_s11] sm:$0xff] }
 0x54c   :  { %v3337_v26 = vpop.eup %3336  ;;  %v1475_v37 = vmul.f32 1.442695, %v1464_v50  ;;  %1672 = vmatmul.bf16.vlgmr.msrb.gmra.mxu0 %v4439_v54  ;;  %v1517_v58 = vadd.f32 %v4418_v63, %v1516_v9 }
 0x54d   :  { %v3339_v47 = vpop.eup %3338  ;;  %v4444_v34 = vadd.f32 1.0, %v3337_v26  ;;  %v1457_v9 = vadd.f32 %v4431_v32, %v1384_v15  ;;  %v1589_v26 = vsel %vm1577_vm5, %v1455_v3, %v1583_v46 }
 0x54e   :  { %3340 = vpow2.f32 %v1475_v37  ;;  %v1529_v21 = vmul.f32 %v3339_v47, %v4425_v61  ;;  %v1521_v1 = vsel %vm4454_vm11, %v4418_v63, %v1517_v58  ;;  %vm1534_vm12 = vweird.f32 %v3339_v47 }
 0x54f   :  { %3342 = vrcp.f32 %v4444_v34  ;;  %v1526_v48 = vsel %vm1523_vm0, %v1525_v53, %v1521_v1  ;;  %vm1535_vm2 = vmor %vm1533_vm1, %vm1534_vm12  ;;  %v1554_v10 = vand.u32 2147483648, %v4444_v34  ;;  %v1552_v19 = vand.u32 2147483647, %v4444_v34 }
 0x550   :  { %v1530_v16 = vsub.f32 1.0, %v1529_v21  ;;  %v4468_v61 = vmul.f32 %v1587_v59, %v1526_v48  ;;  %vm1548_vm6 = vweird.f32 %v4444_v34  ;;  %v1584_v58 = vmul.f32 0.01, %v1457_v9 }
 0x551   :  { %v1555_v38 = vor.u32 1.1754944e-38, %v1554_v10  ;;  %vm1553_vm8 = vcmp.eq.f32.partialorder %v1552_v19, 8.507059e+37  ;;  %vm1578_vm10 = vcmp.ge.f32.partialorder %v1457_v9, 0.0  ;;  %v1832_v19 = vld [vmem:[%s4902_s11 + $0x8] sm:$0xff]  ;;  %vm1986_vm0 = vcmask 64512  }
 0x552   :  { %v1531_v30 = vmul.f32 %v3339_v47, %v1530_v16  ;;  %v1590_v8 = vsel %vm1578_vm10, %v1457_v9, %v1584_v58  ;;  %v1833_v9 = vld [vmem:[%s4902_s11 + $0x10] sm:$0xff] }
 0x554   :  { %v3341_v41 = vpop.eup %3340  ;;  %v1532_v7 = vadd.f32 %v3339_v47, %v1531_v30 }
 0x555   :  { %v3343_v43 = vpop.eup %3342  ;;  %v1482_v49 = vadd.f32 1.0, %v3341_v41 }
 0x556   :  { %v1536_v57 = vsel %vm1535_vm2, %v3339_v47, %v1532_v7  ;;  %v1544_v63 = vmul.f32 %v3343_v43, %v4444_v34  ;;  %vm1549_vm4 = vweird.f32 %v3343_v43 }
 0x557   :  { %3344 = vrcp.f32 %v1482_v49  ;;  %v1541_v27 = vsel %vm1538_vm3, %v1540_v56, %v1536_v57  ;;  %vm1550_vm7 = vmor %vm1548_vm6, %vm1549_vm4  ;;  %v1569_v6 = vand.u32 2147483648, %v1482_v49  ;;  %v1567_v25 = vand.u32 2147483647, %v1482_v49 }
 0x558   :  { %v4470_v29 = vmul.f32 %v1588_v40, %v1541_v27  ;;  %v1545_v22 = vsub.f32 1.0, %v1544_v63  ;;  %vm1563_vm11 = vweird.f32 %v1482_v49 }
 0x559   :  { %v1570_v36 = vor.u32 1.1754944e-38, %v1569_v6  ;;  %vm1568_vm13 = vcmp.eq.f32.partialorder %v1567_v25, 8.507059e+37 }
 0x55a   :  { %v1614_v39 = vpack.c.bf16 %v4470_v29, %v4468_v61  ;;  %v1546_v52 = vmul.f32 %v3343_v43, %v1545_v22 }
 0x55c   :  { %1677 = vmatmul.bf16.gmra.mxu0 %v1614_v39  ;;  %v1547_v62 = vadd.f32 %v3343_v43, %v1546_v52 }
 0x55d   :  { %v3345_v33 = vpop.eup %3344 }
 0x55e   :  { %v1551_v5 = vsel %vm1550_vm7, %v3343_v43, %v1547_v62  ;;  %v1559_v50 = vmul.f32 %v3345_v33, %v1482_v49  ;;  %vm1564_vm9 = vweird.f32 %v3345_v33 }
 0x55f   :  { %v1556_v45 = vsel %vm1553_vm8, %v1555_v38, %v1551_v5  ;;  %vm1565_vm12 = vmor %vm1563_vm11, %vm1564_vm9  ;;  %v3113_v5 = vld [vmem:[%s4902_s11 + $0x30] sm:$0xff] }
 0x560   :  { %v1560_v37 = vsub.f32 1.0, %v1559_v50  ;;  %v4478_v47 = vmul.f32 %v1589_v26, %v1556_v45  ;;  %v1688_v45 = vld [vmem:[%s4903_s10] sm:$0xff] }
 0x562   :  { %v1561_v44 = vmul.f32 %v3345_v33, %v1560_v37  ;;  %v2538_v34 = vpack.c.bf16 %v4478_v47, %v4470_v29  ;;  %v2080_v29 = vld [vmem:[%s4905_s12 + $0x28] sm:$0xff] }
 0x564   :  { %v1562_v21 = vadd.f32 %v3345_v33, %v1561_v44  ;;  %v3114_v44 = vld [vmem:[%s4902_s11 + $0x38] sm:$0xff] }
 0x566   :  { %v1566_v0 = vsel %vm1565_vm12, %v3345_v33, %v1562_v21  ;;  %v2439_v33 = vpack.c.bf16 %v4468_v61, %v4468_v61  ;;  %v1834_v21 = vld [vmem:[%s4902_s11 + $0x18] sm:$0xff] }
 0x567   :  { %v1571_v32 = vsel %vm1568_vm13, %v1570_v36, %v1566_v0  ;;  %v1689_v36 = vld [vmem:[%s4903_s10 + $0x8] sm:$0xff] }
 0x568   :  { %v1596_v16 = vmul.f32 %v1590_v8, %v1571_v32  ;;  %v2448_v50 = vsel %vm2446_vm15, %v2439_v33, 0  ;;  %v3115_v8 = vld [vmem:[%s4902_s11 + $0x40] sm:$0xff] }
 0x56a   :  { %v1615_v4 = vpack.c.bf16 %v1596_v16, %v4478_v47  ;;  %v2539_v17 = vpack.c.bf16 %v1596_v16, %v1596_v16  ;;  %v3095_v16 = vld [vmem:[%s4903_s10 + $0x30] sm:$0xff] }
 0x56c   :  { %1682 = vmatmul.bf16.gmra.mxu0 %v1615_v4  ;;  %v4484_v20 = vsel %vm2446_vm15, %v2539_v17, 0  ;;  %v1690_v4 = vld [vmem:[%s4903_s10 + $0x10] sm:$0xff]  ;;  %v1835_v17 = vld [vmem:[%s4902_s11 + $0x20] sm:$0xff] }
 0x5c9   :  { %v1673_v1 = vpop.f32.mrf.mxu0 }
 0x5d1   :  { %v1675_v30 = vpop.f32.mrf.mxu0 }
 0x5d2   :  { %v3294_v43 = vpack.i.bf16 %v1673_v1, %v1675_v30 }
 0x5d9   :  { %v1678_v35 = vpop.f32.mrf.mxu0 }
 0x5e1   :  { %v1680_v18 = vpop.f32.mrf.mxu0 }
 0x5e2   :  { %v3269_v55 = vpack.i.bf16 %v1678_v35, %v1680_v18 }
 0x5e4   :  { %3270 = vrot.lane.b32.xlu0 %v3269_v55, %s3410_s9 }
 0x5e9   :  { %v1683_v53 = vpop.f32.mrf.mxu0 }
 0x5ec   :  { %3285 = vrot.lane.b32.xlu0 %v3269_v55, %s3411_s21 }
 0x5f1   :  { %v1685_v41 = vpop.f32.mrf.mxu0 }
 0x5f2   :  { %1806 = vmatpush.msra.mxu1 %v1685_v41  ;;  %v3289_v7 = vpack.i.bf16 %v1683_v53, %v1685_v41  ;;  %v1692_v41 = vld [vmem:[%s4903_s10 + $0x20] sm:$0xff] }
 0x5f4   :  { %3305 = vrot.lane.b32.xlu0 %v3269_v55, %s3412_s23  ;;  %3290 = vrot.lane.b32.xlu2 %v3289_v7, %s3411_s21  ;;  %v3117_v55 = vld [vmem:[%s4902_s11 + $0x50] sm:$0xff] }
 0x5f5   :  { %3275 = vrot.lane.b32.xlu1 %v3289_v7, %s3410_s9  ;;  %1807 = vmatpush.msra.mxu1 %v1683_v53  ;;  %v3097_v53 = vld [vmem:[%s4903_s10 + $0x40] sm:$0xff] }
 0x5f7   :  { %1808 = vmatpush.msra.mxu1 %v1680_v18  ;;  %v1836_v18 = vld [vmem:[%s4902_s11 + $0x28] sm:$0xff] }
 0x5f9   :  { %1809 = vmatpush.msra.mxu1 %v1678_v35  ;;  %v1691_v35 = vld [vmem:[%s4903_s10 + $0x18] sm:$0xff] }
 0x5fb   :  { %1810 = vmatpush.msra.mxu1 %v1675_v30  ;;  %v3096_v30 = vld [vmem:[%s4903_s10 + $0x38] sm:$0xff] }
 0x5fc   :  { %3295 = vrot.lane.b32.xlu2 %v3294_v43, %s3411_s21 }
 0x5fd   :  { %3280 = vrot.lane.b32.xlu1 %v3294_v43, %s3410_s9  ;;  %1811 = vmatpush.msra.mxu1 %v1673_v1  ;;  %v3116_v1 = vld [vmem:[%s4902_s11 + $0x48] sm:$0xff] }
 0x5fe   :  { %3107 = vmatmul.msk.f32.vlgmr.msra.gmra.mxu1 %vm966_vm14, %v1688_v45 }
 0x604   :  { %3310 = vrot.lane.b32.xlu2 %v3294_v43, %s3412_s23  ;;  %v3098_v43 = vld [vmem:[%s4903_s10 + $0x48] sm:$0xff] }
 0x605   :  { %3300 = vrot.lane.b32.xlu1 %v3289_v7, %s3412_s23  ;;  %v3118_v7 = vld [vmem:[%s4902_s11 + $0x58] sm:$0xff] }
 0x606   :  { %3108 = vmatmul.msk.f32.gmra.mxu1 %vm966_vm14, %v1689_v36 }
 0x60e   :  { %3109 = vmatmul.msk.f32.gmra.mxu1 %vm966_vm14, %v1690_v4 }
 0x616   :  { %3110 = vmatmul.msk.f32.gmra.mxu1 %vm966_vm14, %v1691_v35  ;;  %v2082_v35 = vld [vmem:[%s4904_s13 + $0x8] sm:$0xff] }
 0x61e   :  { %3111 = vmatmul.msk.f32.gmra.mxu1 %vm966_vm14, %v1692_v41  ;;  %v2084_v41 = vld [vmem:[%s4904_s13 + $0x18] sm:$0xff] }
 0x64e   :  { %v3291_v49 = vpop.permute.xlu2 %3290 }
 0x64f   :  { %v3292_v48 = vunpack.i.l.bf16 %v3291_v49  ;;  %v3293_v56 = vunpack.i.h.bf16 %v3291_v49  ;;  %v1693_v49 = vld [vmem:[%s4903_s10 + $0x28] sm:$0xff] }
 0x650   :  { %3112 = vmatmul.msk.f32.gmra.mxu1 %vm966_vm14, %v1693_v49 }
 0x651   :  { %1961 = vmatpush.msra.mxu0 %v3292_v48  ;;  %v3099_v48 = vld [vmem:[%s4903_s10 + $0x50] sm:$0xff] }
 0x653   :  { %1962 = vmatpush.msra.mxu0 %v3293_v56  ;;  %v3100_v56 = vld [vmem:[%s4903_s10 + $0x58] sm:$0xff] }
 0x656   :  { %v3271_v57 = vpop.permute.xlu0 %3270  ;;  %v3296_v3 = vpop.permute.xlu2 %3295 }
 0x657   :  { %v3297_v40 = vunpack.i.l.bf16 %v3296_v3  ;;  %v3298_v24 = vunpack.i.h.bf16 %v3296_v3  ;;  %v3272_v52 = vunpack.i.l.bf16 %v3271_v57  ;;  %v3273_v46 = vunpack.i.h.bf16 %v3271_v57 }
 0x65e   :  { %v3286_v59 = vpop.permute.xlu0 %3285  ;;  %v3311_v58 = vpop.permute.xlu2 %3310 }
 0x65f   :  { %v3287_v63 = vunpack.i.l.bf16 %v3286_v59  ;;  %v3288_v27 = vunpack.i.h.bf16 %v3286_v59  ;;  %v3313_v32 = vunpack.i.h.bf16 %v3311_v58 }
 0x661   :  { %1963 = vmatpush.msra.mxu0 %v3287_v63 }
 0x663   :  { %1964 = vmatpush.msra.mxu0 %v3288_v27 }
 0x665   :  { %1965 = vmatpush.msra.mxu0 %v3297_v40 }
 0x666   :  { %v3306_v37 = vpop.permute.xlu0 %3305 }
 0x667   :  { %v3276_v22 = vpop.permute.xlu1 %3275  ;;  %1966 = vmatpush.msra.mxu0 %v3298_v24  ;;  %v3307_v25 = vunpack.i.l.bf16 %v3306_v37  ;;  %v3308_v0 = vunpack.i.h.bf16 %v3306_v37 }
 0x668   :  { %v3277_v10 = vunpack.i.l.bf16 %v3276_v22  ;;  %3125 = vmatmul.msk.f32.vlgmr.msra.gmra.mxu0 %vm966_vm14, %v1831_v28  ;;  %v3278_v39 = vunpack.i.h.bf16 %v3276_v22 }
 0x66a   :  { %1890 = vmatpush.msra.mxu3 %v3277_v10 }
 0x66c   :  { %1891 = vmatpush.msra.mxu3 %v3278_v39 }
 0x66e   :  { %1892 = vmatpush.msra.mxu3 %v3272_v52 }
 0x66f   :  { %v3281_v15 = vpop.permute.xlu1 %3280 }
 0x670   :  { %v3282_v62 = vunpack.i.l.bf16 %v3281_v15  ;;  %1893 = vmatpush.msra.mxu3 %v3273_v46  ;;  %3126 = vmatmul.msk.f32.gmra.mxu0 %vm966_vm14, %v1832_v19  ;;  %v3283_v38 = vunpack.i.h.bf16 %v3281_v15 }
 0x672   :  { %1894 = vmatpush.msra.mxu3 %v3282_v62 }
 0x674   :  { %1895 = vmatpush.msra.mxu3 %v3283_v38 }
 0x675   :  { %3119 = vmatmul.msk.f32.vlgmr.msra.gmra.mxu3 %vm966_vm14, %v3113_v5 }
 0x676   :  { %2456 = vmatpush.bf16.msrb.mxu3 %v2448_v50 }
 0x677   :  { %v3301_v61 = vpop.permute.xlu1 %3300 }
 0x678   :  { %v3302_v26 = vunpack.i.l.bf16 %v3301_v61  ;;  %3127 = vmatmul.msk.f32.gmra.mxu0 %vm966_vm14, %v1833_v9  ;;  %v3303_v6 = vunpack.i.h.bf16 %v3301_v61 }
 0x67a   :  { %2457 = vmatpush.bf16.msrb.mxu3 %v4439_v54  ;;  %1753 = vmatpush.msra.mxu2 %v3302_v26  ;;  %v3312_v54 = vunpack.i.l.bf16 %v3311_v58 }
 0x67b   :  { %v1813_v40 = vpop.f32.mrf.mxu1 }
 0x67c   :  { %1754 = vmatpush.msra.mxu2 %v3303_v6 }
 0x67d   :  { %3120 = vmatmul.msk.f32.gmra.mxu3 %vm966_vm14, %v3114_v44 }
 0x67e   :  { %1755 = vmatpush.msra.mxu2 %v3307_v25 }
 0x680   :  { %1756 = vmatpush.msra.mxu2 %v3308_v0  ;;  %3128 = vmatmul.msk.f32.gmra.mxu0 %vm966_vm14, %v1834_v21 }
 0x682   :  { %1757 = vmatpush.msra.mxu2 %v3312_v54 }
 0x683   :  { %v1816_v52 = vpop.f32.mrf.mxu1 }
 0x684   :  { %1758 = vmatpush.msra.mxu2 %v3313_v32 }
 0x685   :  { %3121 = vmatmul.msk.f32.gmra.mxu3 %vm966_vm14, %v3115_v8  ;;  %3101 = vmatmul.msk.f32.vlgmr.msra.gmra.mxu2 %vm966_vm14, %v3095_v16 }
 0x688   :  { %3129 = vmatmul.msk.f32.gmra.mxu0 %vm966_vm14, %v1835_v17 }
 0x68b   :  { %v1819_v50 = vpop.f32.mrf.mxu1 }
 0x68d   :  { %3122 = vmatmul.msk.f32.gmra.mxu3 %vm966_vm14, %v3116_v1  ;;  %3102 = vmatmul.msk.f32.gmra.mxu2 %vm966_vm14, %v3096_v30  ;;  %v2081_v1 = vld [vmem:[%s4904_s13] sm:$0xff] }
 0x690   :  { %3130 = vmatmul.msk.f32.gmra.mxu0 %vm966_vm14, %v1836_v18 }
 0x693   :  { %v1822_v44 = vpop.f32.mrf.mxu1 }
 0x695   :  { %3123 = vmatmul.msk.f32.gmra.mxu3 %vm966_vm14, %v3117_v55  ;;  %3103 = vmatmul.msk.f32.gmra.mxu2 %vm966_vm14, %v3097_v53  ;;  %v2083_v53 = vld [vmem:[%s4904_s13 + $0x10] sm:$0xff] }
 0x69b   :  { %v1825_v0 = vpop.f32.mrf.mxu1 }
 0x69d   :  { %3124 = vmatmul.msk.f32.gmra.mxu3 %vm966_vm14, %v3118_v7  ;;  %3104 = vmatmul.msk.f32.gmra.mxu2 %vm966_vm14, %v3098_v43 }
 0x6a5   :  { %3105 = vmatmul.msk.f32.gmra.mxu2 %vm966_vm14, %v3099_v48 }
 0x6ad   :  { %3106 = vmatmul.msk.f32.gmra.mxu2 %vm966_vm14, %v3100_v56 }
 0x6cd   :  { %v1828_v8 = vpop.f32.mrf.mxu1 }
 0x6e5   :  { %v1968_v57 = vpop.f32.mrf.mxu0 }
 0x6ed   :  { %v1971_v59 = vpop.f32.mrf.mxu0 }
 0x6f5   :  { %v1974_v27 = vpop.f32.mrf.mxu0 }
 0x6f8   :  { %v1897_v63 = vpop.f32.mrf.mxu3 }
 0x6f9   :  { %v1969_v15 = vadd.f32 %v1968_v57, %v1897_v63 }
 0x6fd   :  { %v1977_v10 = vpop.f32.mrf.mxu0 }
 0x700   :  { %v1900_v3 = vpop.f32.mrf.mxu3 }
 0x701   :  { %v1972_v39 = vadd.f32 %v1971_v59, %v1900_v3 }
 0x705   :  { %v1980_v33 = vpop.f32.mrf.mxu0 }
 0x708   :  { %v1903_v24 = vpop.f32.mrf.mxu3  ;;  %v1760_v28 = vpop.f32.mrf.mxu2 }
 0x709   :  { %v1975_v22 = vadd.f32 %v1974_v27, %v1903_v24  ;;  %v1814_v62 = vadd.f32 %v1813_v40, %v1760_v28  ;;  %v2085_v40 = vld [vmem:[%s4904_s13 + $0x20] sm:$0xff] }
 0x70b   :  { %3131 = vmatpush.xpose.msk.msrb.mxu2 %vm1986_vm0, %v1975_v22 }
 0x70d   :  { %v1983_v45 = vpop.f32.mrf.mxu0 }
 0x70f   :  { %3132 = vmatpush.xpose.msk.msrb.mxu2 %vm1986_vm0, %v1972_v39 }
 0x710   :  { %v1906_v19 = vpop.f32.mrf.mxu3  ;;  %v1763_v46 = vpop.f32.mrf.mxu2 }
 0x711   :  { %v1817_v9 = vadd.f32 %v1816_v52, %v1763_v46  ;;  %v1978_v58 = vadd.f32 %v1977_v10, %v1906_v19  ;;  %v2086_v46 = vld [vmem:[%s4904_s13 + $0x28] sm:$0xff] }
 0x713   :  { %3133 = vmatpush.xpose.msk.msrb.mxu2 %vm1986_vm0, %v1969_v15 }
 0x716   :  { %3134 = vmatmul.msk.f32.vlgmr.msrb.gmra.mxu2 %vm1986_vm0, %v1814_v62 }
 0x718   :  { %v1909_v38 = vpop.f32.mrf.mxu3  ;;  %v1766_v5 = vpop.f32.mrf.mxu2 }
 0x719   :  { %v1820_v37 = vadd.f32 %v1819_v50, %v1766_v5  ;;  %v1981_v25 = vadd.f32 %v1980_v33, %v1909_v38 }
 0x71e   :  { %3135 = vmatmul.msk.f32.gmra.mxu2 %vm1986_vm0, %v1817_v9 }
 0x720   :  { %v1912_v61 = vpop.f32.mrf.mxu3  ;;  %v1769_v6 = vpop.f32.mrf.mxu2 }
 0x721   :  { %v1984_v26 = vadd.f32 %v1983_v45, %v1912_v61  ;;  %v1823_v21 = vadd.f32 %v1822_v44, %v1769_v6 }
 0x723   :  { %3137 = vmatpush.xpose.msk.msra.mxu2 %vm1986_vm0, %v1984_v26 }
 0x726   :  { %3136 = vmatmul.msk.f32.gmra.mxu2 %vm1986_vm0, %v1820_v37 }
 0x727   :  { %3138 = vmatpush.xpose.msk.msra.mxu2 %vm1986_vm0, %v1981_v25 }
 0x728   :  { %v1772_v36 = vpop.f32.mrf.mxu2 }
 0x729   :  { %v1826_v54 = vadd.f32 %v1825_v0, %v1772_v36 }
 0x72b   :  { %3139 = vmatpush.xpose.msk.msra.mxu2 %vm1986_vm0, %v1978_v58 }
 0x72e   :  { %3140 = vmatmul.msk.f32.vlgmr.msra.gmra.mxu2 %vm1986_vm0, %v1823_v21 }
 0x730   :  { %v1775_v32 = vpop.f32.mrf.mxu2 }
 0x731   :  { %v1829_v16 = vadd.f32 %v1828_v8, %v1775_v32 }
 0x736   :  { %3141 = vmatmul.msk.f32.gmra.mxu2 %vm1986_vm0, %v1826_v54 }
 0x73e   :  { %3142 = vmatmul.msk.f32.gmra.mxu2 %vm1986_vm0, %v1829_v16 }
 0x799   :  { %v2022_v4 = vpop.f32.mrf.mxu2 }
 0x79a   :  { %v2087_v18 = vadd.f32 %v2081_v1, %v2022_v4 }
 0x79c   :  { %v2093_v7 = vsub.f32 0.0, %v2087_v18 }
 0x79e   :  { %v2099_v57 = vmul.f32 1.442695, %v2093_v7 }
 0x7a0   :  { %3346 = vpow2.f32 %v2099_v57 }
 0x7a1   :  { %v2025_v17 = vpop.f32.mrf.mxu2 }
 0x7a2   :  { %v2088_v55 = vadd.f32 %v2082_v35, %v2025_v17 }
 0x7a4   :  { %v2094_v43 = vsub.f32 0.0, %v2088_v55 }
 0x7a6   :  { %v2101_v63 = vmul.f32 1.442695, %v2094_v43  ;;  %v3347_v39 = vpop.eup %3346 }
 0x7a7   :  { %v4616_v62 = vadd.f32 1.0, %v3347_v39 }
 0x7a8   :  { %3348 = vpow2.f32 %v2101_v63 }
 0x7a9   :  { %v2028_v30 = vpop.f32.mrf.mxu2 }
 0x7aa   :  { %v2089_v49 = vadd.f32 %v2083_v53, %v2028_v30 }
 0x7ac   :  { %v2095_v3 = vsub.f32 0.0, %v2089_v49 }
 0x7ae   :  { %v2103_v24 = vmul.f32 1.442695, %v2095_v3  ;;  %v3349_v19 = vpop.eup %3348 }
 0x7af   :  { %v4618_v38 = vadd.f32 1.0, %v3349_v19 }
 0x7b1   :  { %v2066_v48 = vpop.f32.mrf.mxu2 }
 0x7b2   :  { %v2090_v56 = vadd.f32 %v2084_v41, %v2066_v48 }
 0x7b4   :  { %v2096_v59 = vsub.f32 0.0, %v2090_v56 }
 0x7b6   :  { %v2105_v27 = vmul.f32 1.442695, %v2096_v59 }
 0x7b8   :  { %3350 = vpow2.f32 %v2105_v27 }
 0x7b9   :  { %v2069_v28 = vpop.f32.mrf.mxu2  ;;  %3352 = vpow2.f32 %v2103_v24 }
 0x7ba   :  { %v2091_v22 = vadd.f32 %v2085_v40, %v2069_v28 }
 0x7bc   :  { %v2097_v10 = vsub.f32 0.0, %v2091_v22 }
 0x7be   :  { %v2107_v52 = vmul.f32 1.442695, %v2097_v10  ;;  %v3351_v15 = vpop.eup %3350 }
 0x7bf   :  { %v3353_v50 = vpop.eup %3352  ;;  %v4620_v9 = vadd.f32 1.0, %v3351_v15 }
 0x7c0   :  { %3354 = vpow2.f32 %v2107_v52  ;;  %v4624_v26 = vadd.f32 1.0, %v3353_v50 }
 0x7c1   :  { %v2072_v33 = vpop.f32.mrf.mxu2  ;;  %3356 = vrcp.f32 %v4616_v62  ;;  %vm2167_vm11 = vweird.f32 %v4620_v9  ;;  %v2171_v52 = vand.u32 2147483647, %v4620_v9  ;;  %v2173_v19 = vand.u32 2147483648, %v4620_v9 }
 0x7c2   :  { %v2092_v5 = vadd.f32 %v2086_v46, %v2072_v33  ;;  %3358 = vrcp.f32 %v4618_v38  ;;  %vm2152_vm15 = vweird.f32 %v4624_v26 }
 0x7c3   :  { %3360 = vrcp.f32 %v4620_v9 }
 0x7c4   :  { %v2098_v45 = vsub.f32 0.0, %v2092_v5 }
 0x7c6   :  { %v3355_v61 = vpop.eup %3354  ;;  %v2109_v37 = vmul.f32 1.442695, %v2098_v45 }
 0x7c7   :  { %v4627_v6 = vadd.f32 1.0, %v3355_v61  ;;  %v4631_v44 = vpop.eup %3356  ;;  %v2158_v61 = vand.u32 2147483648, %v4624_v26 }
 0x7c8   :  { %3362 = vpow2.f32 %v2109_v37  ;;  %v4633_v25 = vpop.eup %3358  ;;  %v2118_v16 = vmul.f32 %v4631_v44, %v4616_v62  ;;  %vm2123_vm4 = vweird.f32 %v4631_v44  ;;  %v2156_v37 = vand.u32 2147483647, %v4624_v26 }
 0x7c9   :  { %3364 = vrcp.f32 %v4627_v6  ;;  %v4635_v58 = vpop.eup %3360  ;;  %v2133_v17 = vmul.f32 %v4633_v25, %v4618_v38  ;;  %vm2138_vm1 = vweird.f32 %v4633_v25  ;;  %vm2182_vm5 = vweird.f32 %v4627_v6 }
 0x7ca   :  { %3366 = vrcp.f32 %v4624_v26  ;;  %v2163_v8 = vmul.f32 %v4635_v58, %v4620_v9  ;;  %v2119_v35 = vsub.f32 1.0, %v2118_v16  ;;  %v2188_v40 = vand.u32 2147483648, %v4627_v6 }
 0x7cb   :  { %v2134_v53 = vsub.f32 1.0, %v2133_v17  ;;  %vm2168_vm6 = vweird.f32 %v4635_v58  ;;  %v2186_v22 = vand.u32 2147483647, %v4627_v6 }
 0x7cc   :  { %v2164_v30 = vsub.f32 1.0, %v2163_v8  ;;  %v2120_v48 = vmul.f32 %v4631_v44, %v2119_v35  ;;  %v2189_v50 = vor.u32 1.1754944e-38, %v2188_v40  ;;  %vm4672_vm13 = vmor %vm2167_vm11, %vm2168_vm6 }
 0x7cd   :  { %v2135_v59 = vmul.f32 %v4633_v25, %v2134_v53  ;;  %vm2187_vm0 = vcmp.eq.f32.partialorder %v2186_v22, 8.507059e+37 }
 0x7ce   :  { %v3363_v21 = vpop.eup %3362  ;;  %v2165_v49 = vmul.f32 %v4635_v58, %v2164_v30  ;;  %v2121_v8 = vadd.f32 %v4631_v44, %v2120_v48  ;;  %v3413_v48 = vmov 48.0  }
 0x7cf   :  { %v3365_v36 = vpop.eup %3364  ;;  %v2116_v0 = vadd.f32 1.0, %v3363_v21 }
 0x7d0   :  { %v4637_v54 = vpop.eup %3366  ;;  %v2178_v32 = vmul.f32 %v3365_v36, %v4627_v6  ;;  %vm2183_vm2 = vweird.f32 %v3365_v36  ;;  %v2166_v10 = vadd.f32 %v4635_v58, %v2165_v49  ;;  %v2136_v6 = vadd.f32 %v4633_v25, %v2135_v59 }
 0x7d1   :  { %3368 = vrcp.f32 %v2116_v0  ;;  %v2148_v4 = vmul.f32 %v4637_v54, %v4624_v26  ;;  %v2203_v56 = vand.u32 2147483648, %v2116_v0  ;;  %v2201_v3 = vand.u32 2147483647, %v2116_v0  ;;  %vm4658_vm9 = vmor %vm2182_vm5, %vm2183_vm2 }
 0x7d2   :  { %v2179_v1 = vsub.f32 1.0, %v2178_v32  ;;  %vm2153_vm7 = vweird.f32 %v4637_v54  ;;  %vm2197_vm8 = vweird.f32 %v2116_v0  ;;  %v2170_v9 = vsel %vm4672_vm13, %v4635_v58, %v2166_v10 }
 0x7d3   :  { %v2149_v55 = vsub.f32 1.0, %v2148_v4  ;;  %v2204_v39 = vor.u32 1.1754944e-38, %v2203_v56  ;;  %vm2202_vm12 = vcmp.eq.f32.partialorder %v2201_v3, 8.507059e+37  ;;  %vm4685_vm2 = vmor %vm2152_vm15, %vm2153_vm7  ;;  %v2143_v32 = vand.u32 2147483648, %v4618_v38 }
 0x7d4   :  { %v2180_v7 = vmul.f32 %v3365_v36, %v2179_v1  ;;  %vm2172_vm5 = vcmp.eq.f32.partialorder %v2171_v52, 8.507059e+37  ;;  %v2141_v58 = vand.u32 2147483647, %v4618_v38  ;;  %v2159_v4 = vor.u32 1.1754944e-38, %v2158_v61 }
 0x7d5   :  { %v2150_v57 = vmul.f32 %v4637_v54, %v2149_v55  ;;  %v2128_v1 = vand.u32 2147483648, %v4616_v62  ;;  %vm2157_vm7 = vcmp.eq.f32.partialorder %v2156_v37, 8.507059e+37  ;;  %v2144_v35 = vor.u32 1.1754944e-38, %v2143_v32 }
 0x7d6   :  { %v2181_v27 = vadd.f32 %v3365_v36, %v2180_v7  ;;  %v2078_v7 = vld [vmem:[%s4905_s12 + $0x18] sm:$0xff]  ;;  %3370 = vrcp.f32 %v3413_v48 }
 0x7d7   :  { %v3369_v18 = vpop.eup %3368  ;;  %v2151_v33 = vadd.f32 %v4637_v54, %v2150_v57  ;;  %v2129_v53 = vor.u32 1.1754944e-38, %v2128_v1 }
 0x7d8   :  { %v2193_v41 = vmul.f32 %v3369_v18, %v2116_v0  ;;  %vm2198_vm3 = vweird.f32 %v3369_v18  ;;  %v2185_v15 = vsel %vm4658_vm9, %v3365_v36, %v2181_v27  ;;  %v2174_v36 = vor.u32 1.1754944e-38, %v2173_v19 }
 0x7d9   :  { %vm2199_vm10 = vmor %vm2197_vm8, %vm2198_vm3  ;;  %v2190_v21 = vsel %vm2187_vm0, %v2189_v50, %v2185_v15  ;;  %vm2137_vm3 = vweird.f32 %v4618_v38  ;;  %v2155_v26 = vsel %vm4685_vm2, %v4637_v54, %v2151_v33  ;;  %vm2122_vm8 = vweird.f32 %v4616_v62 }
 0x7da   :  { %v2194_v43 = vsub.f32 1.0, %v2193_v41  ;;  %v2175_v16 = vsel %vm2172_vm5, %v2174_v36, %v2170_v9  ;;  %vm4698_vm6 = vmor %vm2137_vm3, %vm2138_vm1  ;;  %v2126_v38 = vand.u32 2147483647, %v4616_v62  ;;  %v2160_v30 = vsel %vm2157_vm7, %v2159_v4, %v2155_v26  ;;  %v2075_v41 = vld [vmem:[%s4905_s12] sm:$0xff] }
 0x7db   :  { %v2140_v54 = vsel %vm4698_vm6, %v4633_v25, %v2136_v6  ;;  %vm2124_vm1 = vmor %vm2122_vm8, %vm2123_vm4  ;;  %vm2142_vm9 = vcmp.eq.f32.partialorder %v2141_v58, 8.507059e+37  ;;  %v2076_v25 = vld [vmem:[%s4905_s12 + $0x8] sm:$0xff]  ;;  %vm2260_vm4 = vcmask 195584  }
 0x7dc   :  { %v2195_v63 = vmul.f32 %v3369_v18, %v2194_v43  ;;  %v2145_v55 = vsel %vm2142_vm9, %v2144_v35, %v2140_v54  ;;  %v3371_v3 = vpop.eup %3370 }
 0x7dd   :  { %v2279_v22 = vmul.f32 48.0, %v3371_v3 }
 0x7de   :  { %v2196_v24 = vadd.f32 %v3369_v18, %v2195_v63 }
 0x7e0   :  { %v2200_v46 = vsel %vm2199_vm10, %v3369_v18, %v2196_v24  ;;  %v2125_v18 = vsel %vm2124_vm1, %v4631_v44, %v2121_v8  ;;  %vm2127_vm10 = vcmp.eq.f32.partialorder %v2126_v38, 8.507059e+37  ;;  %v2077_v44 = vld [vmem:[%s4905_s12 + $0x10] sm:$0xff] }
 0x7e1   :  { %v2205_v5 = vsel %vm2202_vm12, %v2204_v39, %v2200_v46  ;;  %v2130_v62 = vsel %vm2127_vm10, %v2129_v53, %v2125_v18  ;;  %v2280_v46 = vsub.f32 1.0, %v2279_v22  ;;  %v3314_v22 = vld [vmem:[%s4906_s14] ss:$0 sm:$0xff] }
 0x7e2   :  { %2235 = vmatpush.msrb.mxu0 %v2205_v5  ;;  %3254 = vmatpush.msrb.mxu1 %v2205_v5 }
 0x7e3   :  { %v2281_v5 = vmul.f32 %v3371_v3, %v2280_v46 }
 0x7e4   :  { %2236 = vmatpush.msrb.mxu0 %v2190_v21  ;;  %3255 = vmatpush.msrb.mxu1 %v2190_v21 }
 0x7e5   :  { %v2282_v61 = vadd.f32 %v3371_v3, %v2281_v5 }
 0x7e6   :  { %2237 = vmatpush.msrb.mxu0 %v2175_v16  ;;  %3256 = vmatpush.msrb.mxu1 %v2175_v16 }
 0x7e8   :  { %2238 = vmatpush.msrb.mxu0 %v2160_v30  ;;  %3257 = vmatpush.msrb.mxu1 %v2160_v30 }
 0x7ea   :  { %2239 = vmatpush.msrb.mxu0 %v2145_v55  ;;  %3258 = vmatpush.msrb.mxu1 %v2145_v55 }
 0x7ec   :  { %2240 = vmatpush.msrb.mxu0 %v2130_v62  ;;  %3259 = vmatpush.msrb.mxu1 %v2130_v62 }
 0x7ed   :  { %3144 = vmatmul.msk.f32.vlgmr.msrb.gmra.mxu1 %vm966_vm14, %v2076_v25  ;;  %3143 = vmatmul.msk.f32.vlgmr.msrb.gmra.mxu0 %vm966_vm14, %v2075_v41 }
 0x7ee   :  { %2555 = vmatpush.bf16.msra.mxu0 %v4484_v20  ;;  %v2079_v20 = vld [vmem:[%s4905_s12 + $0x20] sm:$0xff] }
 0x7f2   :  { %2556 = vmatpush.bf16.msra.mxu0 %v2538_v34 }
 0x7f5   :  { %3145 = vmatmul.msk.f32.gmra.mxu1 %vm966_vm14, %v2077_v44 }
 0x7fd   :  { %3146 = vmatmul.msk.f32.gmra.mxu1 %vm966_vm14, %v2078_v7 }
 0x805   :  { %3147 = vmatmul.msk.f32.gmra.mxu1 %vm966_vm14, %v2079_v20 }
 0x80d   :  { %3148 = vmatmul.msk.f32.gmra.mxu1 %vm966_vm14, %v2080_v29  ;;  %vm2283_vm14 = vweird.f32 %v3371_v3 }
 0x80e   :  { %v2284_v6 = vsel %vm2283_vm14, %v3371_v3, %v2282_v61 }
 0x86a   :  { %v2245_v47 = vpop.f32.mrf.mxu1  ;;  %v2242_v49 = vpop.f32.mrf.mxu0 }
 0x86b   :  { %v2262_v56 = vsel %vm2260_vm4, %v2245_v47, 0.0  ;;  %v2261_v57 = vsel %vm2260_vm4, %v2242_v49, 0.0 }
 0x86c   :  { %v2263_v27 = vadd.f32 %v2262_v56, %v2261_v57 }
 0x872   :  { %v2248_v34 = vpop.f32.mrf.mxu1 }
 0x873   :  { %v2264_v63 = vsel %vm2260_vm4, %v2248_v34, 0.0 }
 0x874   :  { %v2265_v24 = vadd.f32 %v2264_v63, %v2263_v27 }
 0x87a   :  { %v2251_v43 = vpop.f32.mrf.mxu1 }
 0x87b   :  { %v2266_v40 = vsel %vm2260_vm4, %v2251_v43, 0.0 }
 0x87c   :  { %v2267_v10 = vadd.f32 %v2266_v40, %v2265_v24 }
 0x882   :  { %v2254_v59 = vpop.f32.mrf.mxu1 }
 0x883   :  { %v2268_v28 = vsel %vm2260_vm4, %v2254_v59, 0.0 }
 0x884   :  { %v2269_v39 = vadd.f32 %v2268_v28, %v2267_v10 }
 0x88a   :  { %v2257_v52 = vpop.f32.mrf.mxu1 }
 0x88b   :  { %v2270_v19 = vsel %vm2260_vm4, %v2257_v52, 0.0 }
 0x88c   :  { %v2271_v15 = vadd.f32 %v2270_v19, %v2269_v39  ;;  %v3315_v19 = vld [vmem:[%s4907_s15] ss:$0 sm:$0xff] }
 0x88e   :  { %v2272_v33 = vrot.slane %v2271_v15, 4 }
 0x890   :  { %v2273_v50 = vadd.f32 %v2272_v33, %v2271_v15 }
 0x892   :  { %v2274_v45 = vrot.slane %v2273_v50, 2 }
 0x894   :  { %v2275_v9 = vadd.f32 %v2274_v45, %v2273_v50 }
 0x896   :  { %v2276_v37 = vrot.slane %v2275_v9, 1 }
 0x898   :  { %v2277_v21 = vadd.f32 %v2276_v37, %v2275_v9  ;;  %v2356_v37 = vld [vmem:[%s4908_s16 + $0x18] sm:$0xff] }
 0x89a   :  { %v2285_v36 = vmul.f32 %v2284_v6, %v2277_v21  ;;  %v2353_v21 = vld [vmem:[%s4908_s16] sm:$0xff] }
 0x89c   :  { %v2286_v0 = vsub.f32 %v2242_v49, %v2285_v36  ;;  %v2287_v32 = vsub.f32 %v2245_v47, %v2285_v36  ;;  %v2288_v26 = vsub.f32 %v2248_v34, %v2285_v36  ;;  %v2289_v58 = vsub.f32 %v2251_v43, %v2285_v36 }
 0x89d   :  { %v2290_v8 = vsub.f32 %v2254_v59, %v2285_v36  ;;  %v2291_v1 = vsub.f32 %v2257_v52, %v2285_v36 }
 0x89e   :  { %v2292_v16 = vmul.f32 %v2286_v0, %v2286_v0  ;;  %v2293_v4 = vmul.f32 %v2287_v32, %v2287_v32  ;;  %v2294_v17 = vmul.f32 %v2288_v26, %v2288_v26  ;;  %v2295_v54 = vmul.f32 %v2289_v58, %v2289_v58 }
 0x89f   :  { %v2296_v18 = vmul.f32 %v2290_v8, %v2290_v8  ;;  %v2297_v25 = vmul.f32 %v2291_v1, %v2291_v1 }
 0x8a0   :  { %v2298_v38 = vsel %vm2260_vm4, %v2292_v16, 0.0  ;;  %v2299_v30 = vsel %vm2260_vm4, %v2293_v4, 0.0  ;;  %v2301_v55 = vsel %vm2260_vm4, %v2294_v17, 0.0  ;;  %v2303_v62 = vsel %vm2260_vm4, %v2295_v54, 0.0 }
 0x8a1   :  { %v2300_v35 = vadd.f32 %v2299_v30, %v2298_v38  ;;  %v2305_v44 = vsel %vm2260_vm4, %v2296_v18, 0.0  ;;  %v2307_v20 = vsel %vm2260_vm4, %v2297_v25, 0.0  ;;  %v2358_v18 = vld [vmem:[%s4908_s16 + $0x28] sm:$0xff] }
 0x8a3   :  { %v2302_v53 = vadd.f32 %v2301_v55, %v2300_v35  ;;  %v2355_v35 = vld [vmem:[%s4908_s16 + $0x10] sm:$0xff] }
 0x8a5   :  { %v2304_v41 = vadd.f32 %v2303_v62, %v2302_v53  ;;  %v2357_v53 = vld [vmem:[%s4908_s16 + $0x20] sm:$0xff] }
 0x8a7   :  { %v2306_v7 = vadd.f32 %v2305_v44, %v2304_v41 }
 0x8a9   :  { %v2308_v29 = vadd.f32 %v2307_v20, %v2306_v7 }
 0x8ab   :  { %v2309_v47 = vrot.slane %v2308_v29, 4 }
 0x8ad   :  { %v2310_v34 = vadd.f32 %v2309_v47, %v2308_v29 }
 0x8af   :  { %v2311_v43 = vrot.slane %v2310_v34, 2 }
 0x8b1   :  { %v2312_v49 = vadd.f32 %v2311_v43, %v2310_v34 }
 0x8b3   :  { %v2313_v48 = vrot.slane %v2312_v49, 1 }
 0x8b5   :  { %v2314_v56 = vadd.f32 %v2313_v48, %v2312_v49 }
 0x8b7   :  { %v2315_v57 = vmul.f32 %v2314_v56, %v2284_v6  ;;  %v2354_v6 = vld [vmem:[%s4908_s16 + $0x8] sm:$0xff] }
 0x8b9   :  { %v2316_v59 = vadd.f32 1e-05, %v2315_v57 }
 0x8bb   :  { %3372 = vrsqrt.f32 %v2316_v59  ;;  %vm2323_vm12 = vweird.f32 %v2316_v59 }
 0x8c1   :  { %v3373_v63 = vpop.eup %3372 }
 0x8c2   :  { %v2318_v3 = vmul.f32 %v3373_v63, %v2316_v59  ;;  %vm2324_vm11 = vweird.f32 %v3373_v63 }
 0x8c3   :  { %vm2325_vm13 = vmor %vm2323_vm12, %vm2324_vm11 }
 0x8c4   :  { %v2319_v27 = vmul.f32 %v3373_v63, %v2318_v3 }
 0x8c6   :  { %v2320_v40 = vmul.f32 0.5, %v2319_v27 }
 0x8c8   :  { %v2321_v24 = vsub.f32 1.5, %v2320_v40 }
 0x8ca   :  { %v2322_v28 = vmul.f32 %v3373_v63, %v2321_v24 }
 0x8cc   :  { %v2326_v10 = vsel %vm2325_vm13, %v3373_v63, %v2322_v28 }
 0x8cd   :  { %v2332_v39 = vmul.f32 %v2326_v10, %v2291_v1  ;;  %v2330_v52 = vmul.f32 %v2326_v10, %v2289_v58  ;;  %v2328_v46 = vmul.f32 %v2326_v10, %v2287_v32  ;;  %v2327_v15 = vmul.f32 %v2326_v10, %v2286_v0 }
 0x8ce   :  { %v2329_v33 = vmul.f32 %v2326_v10, %v2288_v26  ;;  %v2331_v5 = vmul.f32 %v2326_v10, %v2290_v8 }
 0x8cf   :  { %v2340_v50 = vmul.f32 %v3314_v22, %v2330_v52  ;;  %v2338_v45 = vmul.f32 %v3314_v22, %v2328_v46  ;;  %v2337_v61 = vmul.f32 %v3314_v22, %v2327_v15  ;;  %v2342_v9 = vmul.f32 %v3314_v22, %v2332_v39 }
 0x8d0   :  { %v2339_v26 = vmul.f32 %v3314_v22, %v2329_v33  ;;  %v2341_v58 = vmul.f32 %v3314_v22, %v2331_v5 }
 0x8d1   :  { %v2350_v36 = vadd.f32 %v3315_v19, %v2340_v50  ;;  %v2348_v0 = vadd.f32 %v3315_v19, %v2338_v45  ;;  %v2347_v32 = vadd.f32 %v3315_v19, %v2337_v61  ;;  %v2352_v17 = vadd.f32 %v3315_v19, %v2342_v9 }
 0x8d2   :  { %v2349_v30 = vadd.f32 %v3315_v19, %v2339_v26  ;;  %v2351_v55 = vadd.f32 %v3315_v19, %v2341_v58 }
 0x8d3   :  { %v2362_v8 = vadd.f32 %v2356_v37, %v2350_v36  ;;  %v2360_v16 = vadd.f32 %v2354_v6, %v2348_v0  ;;  %v2359_v4 = vadd.f32 %v2353_v21, %v2347_v32  ;;  %v2364_v62 = vadd.f32 %v2358_v18, %v2352_v17 }
 0x8d4   :  { %v2361_v25 = vadd.f32 %v2355_v35, %v2349_v30  ;;  %v2363_v41 = vadd.f32 %v2357_v53, %v2351_v55 }
 0x8d5   :  { %v2374_v1 = vsel %vm2260_vm4, %v2362_v8, -inf  ;;  %v2368_v54 = vsel %vm2260_vm4, %v2360_v16, -inf  ;;  %v2365_v38 = vsel %vm2260_vm4, %v2359_v4, -inf  ;;  %v2380_v7 = vsel %vm2260_vm4, %v2364_v62, -inf }
 0x8d6   :  { %2375 = vmax.xlane.f32.xlu2 %v2374_v1  ;;  %2369 = vmax.xlane.f32.xlu0 %v2368_v54  ;;  %v2371_v44 = vsel %vm2260_vm4, %v2361_v25, -inf  ;;  %v2377_v20 = vsel %vm2260_vm4, %v2363_v41, -inf }
 0x8d7   :  { %2366 = vmax.xlane.f32.xlu1 %v2365_v38 }
 0x8de   :  { %2372 = vmax.xlane.f32.xlu2 %v2371_v44  ;;  %2381 = vmax.xlane.f32.xlu0 %v2380_v7 }
 0x8df   :  { %2378 = vmax.xlane.f32.xlu1 %v2377_v20  ;;  %v323_v20 = vadd.f32 %v4093_v2, %v3905_v42 }
 0x949   :  { %v2376_v29 = vpop.xlane.xlu2 %2375  ;;  %v2370_v47 = vpop.xlane.xlu0 %2369 }
 0x94a   :  { %v2386_v34 = vsub.f32 %v2362_v8, %v2376_v29  ;;  %v2384_v43 = vsub.f32 %v2360_v16, %v2370_v47  ;;  %v2367_v49 = vpop.xlane.xlu1 %2366 }
 0x94b   :  { %v2383_v48 = vsub.f32 %v2359_v4, %v2367_v49 }
 0x94c   :  { %v2395_v56 = vmul.f32 1.442695, %v2386_v34  ;;  %v2391_v57 = vmul.f32 1.442695, %v2384_v43 }
 0x94d   :  { %v2389_v59 = vmul.f32 1.442695, %v2383_v48  ;;  %v347_v48 = vadd.f32 %v4095_v31, %v323_v20 }
 0x94e   :  { %3374 = vpow2.f32 %v2395_v56  ;;  %v318_v56 = vadd.f32 %v3998_v12, %v3905_v42  ;;  %v328_v12 = vadd.f32 %v4236_v11, %v3905_v42 }
 0x94f   :  { %3376 = vpow2.f32 %v2391_v57 }
 0x950   :  { %3378 = vpow2.f32 %v2389_v59  ;;  %v342_v2 = vadd.f32 %v4000_v13, %v318_v56 }
 0x951   :  { %v2373_v63 = vpop.xlane.xlu2 %2372  ;;  %v2382_v3 = vpop.xlane.xlu0 %2381 }
 0x952   :  { %v2385_v27 = vsub.f32 %v2361_v25, %v2373_v63  ;;  %v2388_v40 = vsub.f32 %v2364_v62, %v2382_v3  ;;  %v2379_v24 = vpop.xlane.xlu1 %2378 }
 0x953   :  { %v2387_v28 = vsub.f32 %v2363_v41, %v2379_v24 }
 0x954   :  { %v3375_v22 = vpop.eup %3374  ;;  %v2393_v10 = vmul.f32 1.442695, %v2385_v27  ;;  %v2399_v39 = vmul.f32 1.442695, %v2388_v40 }
 0x955   :  { %v3377_v52 = vpop.eup %3376  ;;  %v2397_v19 = vmul.f32 1.442695, %v2387_v28  ;;  %v2410_v46 = vsel %vm2260_vm4, %v3375_v22, 0.0 }
 0x956   :  { %v3379_v15 = vpop.eup %3378  ;;  %3380 = vpow2.f32 %v2393_v10  ;;  %2411 = vadd.xlane.f32.xlu0 %v2410_v46  ;;  %v2404_v33 = vsel %vm2260_vm4, %v3377_v52, 0.0  ;;  %v352_v46 = vadd.f32 %v4220_v23, %v328_v12 }
 0x957   :  { %3382 = vpow2.f32 %v2399_v39  ;;  %2405 = vadd.xlane.f32.xlu2 %v2404_v33  ;;  %v2401_v5 = vsel %vm2260_vm4, %v3379_v15, 0.0 }
 0x958   :  { %3384 = vpow2.f32 %v2397_v19  ;;  %2402 = vadd.xlane.f32.xlu1 %v2401_v5 }
 0x95c   :  { %v3381_v50 = vpop.eup %3380 }
 0x95d   :  { %v3383_v45 = vpop.eup %3382  ;;  %v2407_v61 = vsel %vm2260_vm4, %v3381_v50, 0.0 }
 0x95e   :  { %v3385_v9 = vpop.eup %3384  ;;  %v2416_v37 = vsel %vm2260_vm4, %v3383_v45, 0.0 }
 0x95f   :  { %2408 = vadd.xlane.f32.xlu2 %v2407_v61  ;;  %2417 = vadd.xlane.f32.xlu0 %v2416_v37  ;;  %v2413_v6 = vsel %vm2260_vm4, %v3385_v9, 0.0 }
 0x960   :  { %2414 = vadd.xlane.f32.xlu1 %v2413_v6 }
 0x9c9   :  { %v2412_v21 = vpop.xlane.xlu0 %2411 }
 0x9ca   :  { %v2406_v36 = vpop.xlane.xlu2 %2405  ;;  %3386 = vrcp.f32 %v2412_v21 }
 0x9cb   :  { %3388 = vrcp.f32 %v2406_v36  ;;  %v2403_v0 = vpop.xlane.xlu1 %2402 }
 0x9cc   :  { %3390 = vrcp.f32 %v2403_v0 }
 0x9d0   :  { %v3387_v32 = vpop.eup %3386 }
 0x9d1   :  { %v3389_v26 = vpop.eup %3388  ;;  %v2428_v58 = vmul.f32 %v3387_v32, %v3375_v22 }
 0x9d2   :  { %v3391_v8 = vpop.eup %3390  ;;  %v2426_v16 = vmul.f32 %v3389_v26, %v3377_v52  ;;  %v2409_v4 = vpop.xlane.xlu2 %2408 }
 0x9d3   :  { %v2418_v17 = vpop.xlane.xlu0 %2417  ;;  %2434 = vst.msk [vmem:[%s4909_s18 + $0x18] sm:$0xff] %vm2260_vm4, %v2428_v58  ;;  %v2425_v1 = vmul.f32 %v3391_v8, %v3379_v15  ;;  %3392 = vrcp.f32 %v2409_v4  ;;  %v2415_v54 = vpop.xlane.xlu1 %2414 }
 0x9d4   :  { %2432 = vst.msk [vmem:[%s4909_s18 + $0x8] sm:$0xff] %vm2260_vm4, %v2426_v16  ;;  %3394 = vrcp.f32 %v2418_v17 }
 0x9d5   :  { %2431 = vst.msk [vmem:[%s4909_s18] sm:$0xff] %vm2260_vm4, %v2425_v1  ;;  %v2437_v38 = vpack.c.bf16 %v2426_v16, %v2425_v1  ;;  %3396 = vrcp.f32 %v2415_v54  ;;  %v4938_v54 = vld [vmem:[#allocation2_spill] sm:$0xff] }
 0x9d7   :  { %3149 = vmatmul.msk.bf16.vlgmr.msrb.gmra.mxu3 %vm2260_vm4, %v2437_v38 }
 0x9d9   :  { %v3393_v30 = vpop.eup %3392 }
 0x9da   :  { %v3395_v35 = vpop.eup %3394  ;;  %v2427_v18 = vmul.f32 %v3393_v30, %v3381_v50 }
 0x9db   :  { %v3397_v55 = vpop.eup %3396  ;;  %v2430_v53 = vmul.f32 %v3395_v35, %v3383_v45 }
 0x9dc   :  { %2433 = vst.msk [vmem:[%s4909_s18 + $0x10] sm:$0xff] %vm2260_vm4, %v2427_v18  ;;  %v2429_v25 = vmul.f32 %v3397_v55, %v3385_v9  ;;  %v2438_v41 = vpack.c.bf16 %v2427_v18, %v2427_v18 }
 0x9dd   :  { %2436 = vst.msk [vmem:[%s4909_s18 + $0x28] sm:$0xff] %vm2260_vm4, %v2430_v53  ;;  %v2537_v44 = vpack.c.bf16 %v2430_v53, %v2430_v53 }
 0x9de   :  { %2435 = vst.msk [vmem:[%s4909_s18 + $0x20] sm:$0xff] %vm2260_vm4, %v2429_v25  ;;  %v2536_v62 = vpack.c.bf16 %v2429_v25, %v2428_v58 }
 0x9e0   :  { %3151 = vmatmul.msk.bf16.vlgmr.msra.gmra.mxu0 %vm2260_vm4, %v2536_v62 }
 0x9e7   :  { %3150 = vmatmul.msk.bf16.gmra.mxu3 %vm2260_vm4, %v2438_v41 }
 0x9f0   :  { %3152 = vmatmul.msk.bf16.gmra.mxu0 %vm2260_vm4, %v2537_v44 }
 0xa5a   :  { %v2459_v7 = vpop.f32.mrf.mxu3 }
 0xa5b   :  { %vm2468_vm15 = vcmp.ge.f32.partialorder %v2459_v7, 0.0  ;;  %v2471_v29 = vmul.f32 0.01, %v2459_v7 }
 0xa5d   :  { %v2558_v47 = vpop.f32.mrf.mxu0  ;;  %v2474_v34 = vsel %vm2468_vm15, %v2459_v7, %v2471_v29 }
 0xa5e   :  { %vm2567_vm0 = vcmp.ge.f32.partialorder %v2558_v47, 0.0  ;;  %v2570_v43 = vmul.f32 0.01, %v2558_v47  ;;  %v2477_v49 = vadd.f32 %v2474_v34, %v3951_v51 }
 0xa60   :  { %2480 = vadd.xlane.f32.xlu1 %v2477_v49  ;;  %v2573_v57 = vsel %vm2567_vm0, %v2558_v47, %v2570_v43 }
 0xa61   :  { %v2576_v59 = vadd.f32 %v2573_v57, %v347_v48 }
 0xa62   :  { %v2461_v63 = vpop.f32.mrf.mxu3 }
 0xa63   :  { %vm2469_vm2 = vcmp.ge.f32.partialorder %v2461_v63, 0.0  ;;  %v2472_v3 = vmul.f32 0.01, %v2461_v63  ;;  %2579 = vadd.xlane.f32.xlu0 %v2576_v59 }
 0xa65   :  { %v2560_v27 = vpop.f32.mrf.mxu0  ;;  %v2475_v40 = vsel %vm2469_vm2, %v2461_v63, %v2472_v3 }
 0xa66   :  { %vm2568_vm3 = vcmp.ge.f32.partialorder %v2560_v27, 0.0  ;;  %v2571_v24 = vmul.f32 0.01, %v2560_v27  ;;  %v2478_v28 = vadd.f32 %v2475_v40, %v342_v2 }
 0xa68   :  { %2482 = vadd.xlane.f32.xlu2 %v2478_v28  ;;  %v2574_v51 = vsel %vm2568_vm3, %v2560_v27, %v2571_v24 }
 0xa69   :  { %v2577_v31 = vadd.f32 %v2574_v51, %v4098_v14 }
 0xa6a   :  { %v2464_v22 = vpop.f32.mrf.mxu3 }
 0xa6b   :  { %vm2470_vm5 = vcmp.ge.f32.partialorder %v2464_v22, 0.0  ;;  %v2473_v10 = vmul.f32 0.01, %v2464_v22  ;;  %2581 = vadd.xlane.f32.xlu1 %v2577_v31 }
 0xa6d   :  { %v2563_v39 = vpop.f32.mrf.mxu0  ;;  %v2476_v52 = vsel %vm2470_vm5, %v2464_v22, %v2473_v10 }
 0xa6e   :  { %vm2569_vm6 = vcmp.ge.f32.partialorder %v2563_v39, 0.0  ;;  %v2572_v13 = vmul.f32 0.01, %v2563_v39  ;;  %v2479_v19 = vadd.f32 %v2476_v52, %v4088_v60 }
 0xa70   :  { %2484 = vadd.xlane.f32.xlu2 %v2479_v19  ;;  %v2575_v15 = vsel %vm2569_vm6, %v2563_v39, %v2572_v13 }
 0xa71   :  { %v2578_v33 = vadd.f32 %v2575_v15, %v352_v46 }
 0xa72   :  { %v2466_v5 = vpop.f32.mrf.mxu3 }
 0xa73   :  { %2583 = vadd.xlane.f32.xlu0 %v2578_v33 }
 0xa75   :  { %v2565_v14 = vpop.f32.mrf.mxu0 }
 0xad3   :  { %v2481_v50 = vpop.xlane.xlu1 %2480 }
 0xad6   :  { %v2580_v42 = vpop.xlane.xlu0 %2579 }
 0xadb   :  { %v2483_v45 = vpop.xlane.xlu2 %2482 }
 0xadc   :  { %v2486_v11 = vadd.f32 %v2483_v45, %v2481_v50 }
 0xade   :  { %v2582_v61 = vpop.xlane.xlu1 %2581 }
 0xadf   :  { %v2585_v6 = vadd.f32 %v2582_v61, %v2580_v42 }
 0xae3   :  { %v2485_v9 = vpop.xlane.xlu2 %2484 }
 0xae4   :  { %v2487_v37 = vadd.f32 %v2486_v11, %v2485_v9 }
 0xae6   :  { %v2488_v21 = vrot.slane %v2487_v37, 4  ;;  %v2584_v36 = vpop.xlane.xlu0 %2583 }
 0xae7   :  { %v2586_v0 = vadd.f32 %v2585_v6, %v2584_v36 }
 0xae8   :  { %v2489_v60 = vadd.f32 %v2488_v21, %v2487_v37 }
 0xae9   :  { %v2587_v32 = vrot.slane %v2586_v0, 4 }
 0xaea   :  { %v2490_v23 = vrot.slane %v2489_v60, 2 }
 0xaeb   :  { %v2588_v26 = vadd.f32 %v2587_v32, %v2586_v0 }
 0xaec   :  { %v2491_v58 = vadd.f32 %v2490_v23, %v2489_v60 }
 0xaed   :  { %v2589_v8 = vrot.slane %v2588_v26, 2 }
 0xaee   :  { %v2492_v16 = vrot.slane %v2491_v58, 1 }
 0xaef   :  { %v2590_v4 = vadd.f32 %v2589_v8, %v2588_v26 }
 0xaf0   :  { %v2493_v17 = vadd.f32 %v2492_v16, %v2491_v58  ;;  %v3402_v58 = vld [vmem:[%s4896_s3] sm:$0xff]  ;;  %v3403_v16 = vld [vmem:[%s4896_s3 + $0x8] sm:$0xff] }
 0xaf1   :  { %v2591_v1 = vrot.slane %v2590_v4, 1 }
 0xaf2   :  { %v2494_v38 = vmul.f32 %v2493_v17, %v4938_v54  ;;  %v3404_v17 = vld [vmem:[%s4896_s3 + $0x10] sm:$0xff] }
 0xaf3   :  { %v2592_v30 = vadd.f32 %v2591_v1, %v2590_v4 }
 0xaf4   :  { %v4828_v35 = vsub.f32 %v2478_v28, %v2494_v38  ;;  %v4830_v18 = vsub.f32 %v2477_v49, %v2494_v38  ;;  %v2497_v44 = vsub.f32 %v2479_v19, %v2494_v38 }
 0xaf5   :  { %v2593_v55 = vmul.f32 %v2592_v30, %v4938_v54 }
 0xaf6   :  { %v2499_v53 = vmul.f32 %v4828_v35, %v4828_v35  ;;  %v2498_v25 = vmul.f32 %v4830_v18, %v4830_v18  ;;  %v2500_v29 = vmul.f32 %v2497_v44, %v2497_v44 }
 0xaf7   :  { %v4837_v62 = vsub.f32 %v2576_v59, %v2593_v55  ;;  %v4841_v7 = vsub.f32 %v2577_v31, %v2593_v55  ;;  %v4843_v20 = vsub.f32 %v2578_v33, %v2593_v55 }
 0xaf8   :  { %2503 = vadd.xlane.f32.xlu2 %v2499_v53  ;;  %2501 = vadd.xlane.f32.xlu1 %v2498_v25  ;;  %v3406_v53 = vld [vmem:[%s4897_s4 + $0x8] sm:$0xff] }
 0xaf9   :  { %v2597_v41 = vmul.f32 %v4837_v62, %v4837_v62  ;;  %v2598_v47 = vmul.f32 %v4841_v7, %v4841_v7  ;;  %v2599_v34 = vmul.f32 %v4843_v20, %v4843_v20 }
 0xafb   :  { %2600 = vadd.xlane.f32.xlu0 %v2597_v41  ;;  %v3407_v41 = vld [vmem:[%s4897_s4 + $0x10] sm:$0xff] }
 0xb00   :  { %2505 = vadd.xlane.f32.xlu2 %v2500_v29  ;;  %2602 = vadd.xlane.f32.xlu1 %v2598_v47 }
 0xb03   :  { %2604 = vadd.xlane.f32.xlu0 %v2599_v34 }
 0xb6b   :  { %v2504_v43 = vpop.xlane.xlu2 %2503  ;;  %v2502_v49 = vpop.xlane.xlu1 %2501 }
 0xb6c   :  { %v2507_v56 = vadd.f32 %v2504_v43, %v2502_v49 }
 0xb6e   :  { %v2601_v48 = vpop.xlane.xlu0 %2600 }
 0xb73   :  { %v2506_v57 = vpop.xlane.xlu2 %2505  ;;  %v2603_v59 = vpop.xlane.xlu1 %2602 }
 0xb74   :  { %v2508_v63 = vadd.f32 %v2507_v56, %v2506_v57  ;;  %v2606_v3 = vadd.f32 %v2603_v59, %v2601_v48 }
 0xb76   :  { %v2509_v2 = vrot.slane %v2508_v63, 4  ;;  %v2605_v27 = vpop.xlane.xlu0 %2604 }
 0xb77   :  { %v2607_v40 = vadd.f32 %v2606_v3, %v2605_v27 }
 0xb78   :  { %v2510_v24 = vadd.f32 %v2509_v2, %v2508_v63 }
 0xb79   :  { %v2608_v28 = vrot.slane %v2607_v40, 4 }
 0xb7a   :  { %v2511_v51 = vrot.slane %v2510_v24, 2 }
 0xb7b   :  { %v2609_v31 = vadd.f32 %v2608_v28, %v2607_v40 }
 0xb7c   :  { %v2512_v22 = vadd.f32 %v2511_v51, %v2510_v24 }
 0xb7d   :  { %v2610_v12 = vrot.slane %v2609_v31, 2 }
 0xb7e   :  { %v2513_v10 = vrot.slane %v2512_v22, 1 }
 0xb7f   :  { %v2611_v39 = vadd.f32 %v2610_v12, %v2609_v31 }
 0xb80   :  { %v2514_v52 = vadd.f32 %v2513_v10, %v2512_v22 }
 0xb81   :  { %v2612_v13 = vrot.slane %v2611_v39, 1 }
 0xb82   :  { %v2515_v19 = vmul.f32 %v2514_v52, %v4938_v54 }
 0xb83   :  { %v2613_v46 = vadd.f32 %v2612_v13, %v2611_v39 }
 0xb84   :  { %v2516_v15 = vadd.f32 1e-05, %v2515_v19 }
 0xb85   :  { %v2614_v33 = vmul.f32 %v2613_v46, %v4938_v54 }
 0xb86   :  { %3398 = vrsqrt.f32 %v2516_v15  ;;  %vm2523_vm8 = vweird.f32 %v2516_v15 }
 0xb87   :  { %v2615_v5 = vadd.f32 1e-05, %v2614_v33 }
 0xb89   :  { %3400 = vrsqrt.f32 %v2615_v5  ;;  %vm2622_vm10 = vweird.f32 %v2615_v5 }
 0xb8c   :  { %v3399_v14 = vpop.eup %3398 }
 0xb8d   :  { %v2518_v50 = vmul.f32 %v3399_v14, %v2516_v15  ;;  %vm2524_vm7 = vweird.f32 %v3399_v14 }
 0xb8e   :  { %vm2525_vm1 = vmor %vm2523_vm8, %vm2524_vm7 }
 0xb8f   :  { %v3401_v45 = vpop.eup %3400  ;;  %v2519_v42 = vmul.f32 %v3399_v14, %v2518_v50 }
 0xb90   :  { %v2617_v11 = vmul.f32 %v3401_v45, %v2615_v5  ;;  %vm2623_vm9 = vweird.f32 %v3401_v45 }
 0xb91   :  { %v2520_v61 = vmul.f32 0.5, %v2519_v42  ;;  %vm2624_vm4 = vmor %vm2622_vm10, %vm2623_vm9 }
 0xb92   :  { %v2618_v9 = vmul.f32 %v3401_v45, %v2617_v11 }
 0xb93   :  { %v2521_v37 = vsub.f32 1.5, %v2520_v61 }
 0xb94   :  { %v2619_v6 = vmul.f32 0.5, %v2618_v9 }
 0xb95   :  { %v2522_v21 = vmul.f32 %v3399_v14, %v2521_v37 }
 0xb96   :  { %v2620_v36 = vsub.f32 1.5, %v2619_v6 }
 0xb97   :  { %v2526_v0 = vsel %vm2525_vm1, %v3399_v14, %v2522_v21 }
 0xb98   :  { %v2527_v60 = vmul.f32 %v2526_v0, %v4830_v18  ;;  %v2528_v32 = vmul.f32 %v2526_v0, %v4828_v35  ;;  %v2529_v23 = vmul.f32 %v2526_v0, %v2497_v44  ;;  %v2621_v26 = vmul.f32 %v3401_v45, %v2620_v36  ;;  %v3405_v18 = vld [vmem:[%s4897_s4] sm:$0xff] }
 0xb9a   :  { %v2530_v8 = vmul.f32 %v3402_v58, %v2527_v60  ;;  %v2531_v4 = vmul.f32 %v3403_v16, %v2528_v32  ;;  %v2532_v1 = vmul.f32 %v3404_v17, %v2529_v23  ;;  %v2625_v54 = vsel %vm2624_vm4, %v3401_v45, %v2621_v26 }
 0xb9b   :  { %v2626_v38 = vmul.f32 %v2625_v54, %v4837_v62  ;;  %v2627_v30 = vmul.f32 %v2625_v54, %v4841_v7  ;;  %v2628_v35 = vmul.f32 %v2625_v54, %v4843_v20 }
 0xb9c   :  { %v2533_v55 = vadd.f32 %v3405_v18, %v2530_v8  ;;  %v2534_v25 = vadd.f32 %v3406_v53, %v2531_v4  ;;  %v2535_v44 = vadd.f32 %v3407_v41, %v2532_v1 }
 0xb9d   :  { %v2629_v62 = vmul.f32 %v3402_v58, %v2626_v38  ;;  %v2630_v29 = vmul.f32 %v3403_v16, %v2627_v30  ;;  %v2631_v7 = vmul.f32 %v3404_v17, %v2628_v35 }
 0xb9e   :  { %2635 = vst [vmem:[%s4910_s17] sm:$0xff] %v2533_v55 }
 0xb9f   :  { %2636 = vst [vmem:[%s4910_s17 + $0x8] sm:$0xff] %v2534_v25  ;;  %v2632_v20 = vadd.f32 %v3405_v18, %v2629_v62  ;;  %v2633_v47 = vadd.f32 %v3406_v53, %v2630_v29  ;;  %v2634_v34 = vadd.f32 %v3407_v41, %v2631_v7 }
 0xba0   :  { %2637 = vst [vmem:[%s4910_s17 + $0x10] sm:$0xff] %v2535_v44 }
 0xba1   :  { %2638 = vst [vmem:[%s4910_s17 + $0x18] sm:$0xff] %v2632_v20 }
 0xba2   :  { %2639 = vst [vmem:[%s4910_s17 + $0x20] sm:$0xff] %v2633_v47 }
 0xba3   :  { %2640 = vst [vmem:[%s4910_s17 + $0x28] sm:$0xff] %v2634_v34 }

</bundles_post_ra>
